<compile_context>
chip_gen: v6e
topology: v6e:2x2x1
jax: 0.10.0
libtpu: 0.0.40
codegen_flags: <defaults>
</compile_context>

<pallas_src>
import math
import numpy as np
import jax
import jax.numpy as jnp
from jax import lax
from jax.experimental import pallas as pl
from jax.experimental.pallas import tpu as pltpu

# ----------------------------- configuration --------------------------------
B = 2
W_DIM = 32
IN_CH = 16
OUT_CH = 16
IN_SIZE = 16
OUT_SIZE = 16
IN_SR = 16.0
OUT_SR = 16.0
LRELU_UP = 2
FILTER_SIZE = 6
IN_CUTOFF = 6.0
OUT_CUTOFF = 6.0
IN_HALFWIDTH = 4.0
OUT_HALFWIDTH = 4.0
CONV_K = 3
CONV_CLAMP = 256.0
IS_TORGB = False

TMP_SR = max(IN_SR, OUT_SR) * (1 if IS_TORGB else LRELU_UP)
UP_FACTOR = int(round(TMP_SR / IN_SR))
DOWN_FACTOR = int(round(TMP_SR / OUT_SR))
UP_TAPS = FILTER_SIZE * UP_FACTOR if (UP_FACTOR > 1 and not IS_TORGB) else 1
DOWN_TAPS = FILTER_SIZE * DOWN_FACTOR if (DOWN_FACTOR > 1 and not IS_TORGB) else 1

ACT_GAIN = 1.0 if IS_TORGB else math.sqrt(2.0)
SLOPE = 1.0 if IS_TORGB else 0.2
AFFINE_GAIN = 1.0 / math.sqrt(W_DIM)

CONV_PAD = CONV_K - 1
H_CONV = IN_SIZE + CONV_K - 1          # 18 : spatial size after modulated conv
H_PAD = IN_SIZE + 2 * CONV_PAD         # 20 : padded-input row pitch

# filtered_lrelu padding (same formula as the module; square case)
_pad_total = (OUT_SIZE - 1) * DOWN_FACTOR + 1
_pad_total -= (IN_SIZE + CONV_K - 1) * UP_FACTOR
_pad_total += UP_TAPS + DOWN_TAPS - 2
PAD_LO = (_pad_total + UP_FACTOR) // 2
PAD_HI = _pad_total - PAD_LO

KK = CONV_K * CONV_K
ICKK = IN_CH * KK


def _round_up(n, m):
    return ((n + m - 1) // m) * m


# derived operator sizes (validated against the dense matrices in __main__)
HU = H_CONV * UP_FACTOR + PAD_LO + PAD_HI - UP_TAPS + 1        # 42
HO = (HU - DOWN_TAPS) // DOWN_FACTOR + 1                       # 16
NU = HU * HU                                                   # 1764
NO = HO * HO                                                   # 256
NU_PAD = _round_up(NU, 128)                                    # 1792
NO_PAD = _round_up(NO, 128)                                    # 256
# lane-dense widths for the 20-pitch conv-output slab and the padded input slab
Y_W = _round_up((H_CONV - 1) * H_PAD + H_CONV, 128)            # 358 -> 384
X_W = _round_up(max(H_PAD * H_PAD, Y_W + (CONV_K - 1) * (H_PAD + 1)), 128)  # 512


# --------------------- filter design (no scipy needed) ----------------------
def design_lowpass_filter(numtaps, cutoff, width, fs):
    """Equivalent of scipy.signal.firwin(numtaps, cutoff, width=width, fs=fs)."""
    assert numtaps >= 1
    if numtaps == 1:
        return None
    nyq = fs / 2.0
    atten = 2.285 * (numtaps - 1) * np.pi * (width / nyq) + 7.95
    if atten > 50:
        beta = 0.1102 * (atten - 8.7)
    elif atten > 21:
        beta = 0.5842 * (atten - 21) ** 0.4 + 0.07886 * (atten - 21)
    else:
        beta = 0.0
    win = np.kaiser(numtaps, beta)
    alpha = 0.5 * (numtaps - 1)
    m = np.arange(numtaps) - alpha
    c = cutoff / nyq
    h = c * np.sinc(c * m) * win
    h = h / np.sum(h)                   # DC-gain normalization (pass_zero)
    return h.astype(np.float32)


# -------- upfirdn2d expressed as dense operators (separable 1-D case) -------
def upfirdn_up_matrix(f, up, pad0, pad1, n_in, gain):
    """y = M @ x == zero-upsample by `up`, pad (pad0,pad1), conv(valid, flip(f*gain^.5))."""
    T = len(f)
    ff = (np.asarray(f, np.float64) * (gain ** 0.5))[::-1]
    n_up = n_in * up
    n_out = n_up + pad0 + pad1 - T + 1
    M = np.zeros((n_out, n_in), np.float64)
    for i in range(n_out):
        for t in range(T):
            k = i + t - pad0
            if 0 <= k < n_up and k % up == 0:
                M[i, k // up] += ff[t]
    return M.astype(np.float32)


def upfirdn_down_matrix(f, down, n_in):
    """y = D @ x == conv(valid, flip(f)) then decimate by `down`."""
    T = len(f)
    ff = np.asarray(f, np.float64)[::-1]
    n_conv = n_in - T + 1
    n_out = (n_conv + down - 1) // down
    D = np.zeros((n_out, n_in), np.float64)
    for i in range(n_out):
        for t in range(T):
            D[i, i * down + t] += ff[t]
    return D.astype(np.float32)


# ------------------------------ fused forward --------------------------------
def synthesis_layer_forward(x, latmask, w_lat, params):
    # TODO(synk): fix_size/multimask (size is not None and up==2), the noise
    # injection and the update_emas magnitude-EMA update are statically dead
    # with this config; latmask is therefore unused.
    del latmask

    kup_t = params['KupT']          # (Y_W, NU_PAD)  bf16 constant operator
    kdn_t = params['KdnT']          # (NU_PAD, NO_PAD) bf16 constant operator
    assert kup_t.shape == (Y_W, NU_PAD) and kdn_t.shape == (NU_PAD, NO_PAD)

    # ---- tiny hoisted preprocessing (all on <10 KB tensors) -----------------
    aw = params['affine_w'] * AFFINE_GAIN                              # (IC, W)
    w = params['weight']
    wn = w * lax.rsqrt(jnp.mean(w * w, axis=(1, 2, 3), keepdims=True))  # weight norm
    # column order (ky, kx, ic) to match the in-kernel im2col stacking
    wn_flat = jnp.transpose(wn, (0, 2, 3, 1)).reshape(OUT_CH, ICKK)
    bias2 = jnp.tile(params['bias'].reshape(OUT_CH, 1), (B, 1))        # (B*OC, 1)
    ig = jnp.reshape(lax.rsqrt(params['magnitude_ema']).astype(jnp.float32), (1, 1))

    # zero-pad x for the 3x3 conv and flatten to a lane-dense 20-pitch slab
    xp = jnp.pad(x, ((0, 0), (0, 0), (CONV_PAD, CONV_PAD), (CONV_PAD, CONV_PAD)))
    xpf = xp.reshape(B, IN_CH, H_PAD * H_PAD)
    xpf = jnp.pad(xpf, ((0, 0), (0, 0), (0, X_W - H_PAD * H_PAD)))     # (B, IC, X_W)

    def kernel(wlat_ref, aw_ref, ab_ref, wn_ref, b_ref, ig_ref, xpf_ref,
               ku_ref, kd_ref, o_ref):
        # --- affine (FullyConnectedLayer) + batch-wide style normalization ---
        styles = lax.dot_general(wlat_ref[...], aw_ref[...],
                                 (((1,), (1,)), ((), ())),
                                 preferred_element_type=jnp.float32)
        styles = styles + ab_ref[...]                                   # (B, IC)
        if IS_TORGB:
            styles = styles * (1.0 / math.sqrt(IN_CH * CONV_K ** 2))
        styles = styles * lax.rsqrt(jnp.mean(styles * styles, keepdims=True))
        # expand over the K*K taps: columns are ordered (ky, kx, ic)
        s_exp = jnp.concatenate([styles] * KK, axis=1)                  # (B, ICKK)

        in_gain = ig_ref[0, 0]
        ys = []
        for smp in range(B):                       # static unroll over batch
            # modulate / demodulate / input_gain
            wm = wn_ref[...] * s_exp[smp:smp + 1, :]                    # (OC, ICKK)
            dc = lax.rsqrt(jnp.sum(wm * wm, axis=1, keepdims=True) + 1e-8)
            wm = wm * (dc * in_gain)
            # in-kernel im2col on the 20-pitch slab: 9 static lane-shifted views
            xb = xpf_ref[smp]                                           # (IC, X_W)
            parts = [xb[:, ky * H_PAD + kx: ky * H_PAD + kx + Y_W]
                     for ky in range(CONV_K) for kx in range(CONV_K)]
            xcol = jnp.concatenate(parts, axis=0)                       # (ICKK, Y_W)
            ys.append(jnp.dot(wm, xcol, preferred_element_type=jnp.float32))
        y = jnp.concatenate(ys, axis=0) + b_ref[...]                    # (B*OC, Y_W)

        # --- filtered_lrelu: batched bf16 Kronecker FIR matmuls --------------
        u = jnp.dot(y.astype(jnp.bfloat16), ku_ref[...],
                    preferred_element_type=jnp.float32)                 # (B*OC, NU_PAD)
        u = jnp.where(u >= 0.0, u, u * SLOPE) * ACT_GAIN
        u = jnp.clip(u, -CONV_CLAMP, CONV_CLAMP)
        o_ref[...] = jnp.dot(u.astype(jnp.bfloat16), kd_ref[...],
                             preferred_element_type=jnp.float32)        # (B*OC, NO_PAD)

    out = pl.pallas_call(
        kernel,
        out_shape=jax.ShapeDtypeStruct((B * OUT_CH, NO_PAD), jnp.float32),
        grid=(1,),
        in_specs=[
            pl.BlockSpec((B, W_DIM), lambda i: (0, 0)),            # latents
            pl.BlockSpec((IN_CH, W_DIM), lambda i: (0, 0)),        # affine W (pre-scaled)
            pl.BlockSpec((1, IN_CH), lambda i: (0, 0)),            # affine bias
            pl.BlockSpec((OUT_CH, ICKK), lambda i: (0, 0)),        # pre-normalized conv W
            pl.BlockSpec((B * OUT_CH, 1), lambda i: (0, 0)),       # conv bias (tiled per sample)
            pl.BlockSpec(memory_space=pltpu.MemorySpace.SMEM),     # input_gain scalar
            pl.BlockSpec((B, IN_CH, X_W), lambda i: (0, 0, 0)),    # padded/flattened x
            pl.BlockSpec((Y_W, NU_PAD), lambda i: (0, 0)),         # kron up operator^T (bf16)
            pl.BlockSpec((NU_PAD, NO_PAD), lambda i: (0, 0)),      # kron down operator^T (bf16)
        ],
        out_specs=pl.BlockSpec((B * OUT_CH, NO_PAD), lambda i: (0, 0)),
        compiler_params=pltpu.CompilerParams(
            dimension_semantics=("arbitrary",),
            vmem_limit_bytes=32 * 1024 * 1024),
    )(w_lat, aw, params['affine_b'], wn_flat, bias2, ig, xpf, kup_t, kdn_t)

    return out[:, :NO].reshape(B, OUT_CH, OUT_SIZE, OUT_SIZE)


# --------------------------- pure-JAX reference ------------------------------
def _upfirdn2d_ref(x, f, up, down, padding, gain):
    Bn, C, H, W = x.shape
    if up > 1:
        z = jnp.zeros((Bn, C, H, up, W, up), x.dtype)
        z = z.at[:, :, :, 0, :, 0].set(x)
        x = z.reshape(Bn, C, H * up, W * up)
    px0, px1, py0, py1 = padding
    x = jnp.pad(x, ((0, 0), (0, 0), (py0, py1), (px0, px1)))
    f = jnp.asarray(f, jnp.float32) * (gain ** 0.5)
    f = f[::-1]
    kx = f.reshape(1, 1, 1, -1)
    ky = f.reshape(1, 1, -1, 1)
    xr = x.reshape(Bn * C, 1, x.shape[2], x.shape[3])
    xr = lax.conv_general_dilated(xr, kx, (1, 1), 'VALID',
                                  dimension_numbers=('NCHW', 'OIHW', 'NCHW'),
                                  precision=lax.Precision.HIGHEST)
    xr = lax.conv_general_dilated(xr, ky, (1, 1), 'VALID',
                                  dimension_numbers=('NCHW', 'OIHW', 'NCHW'),
                                  precision=lax.Precision.HIGHEST)
    x = xr.reshape(Bn, C, xr.shape[2], xr.shape[3])
    return x[:, :, ::down, ::down]


def reference_forward(x, w_lat, params):
    wg = 1.0 / math.sqrt(W_DIM)
    styles = jnp.matmul(w_lat, (params['affine_w'] * wg).T,
                        precision=lax.Precision.HIGHEST) + params['affine_b']
    input_gain = lax.rsqrt(params['magnitude_ema'])
    w = params['weight']
    wn = w * lax.rsqrt(jnp.mean(w ** 2, axis=(1, 2, 3), keepdims=True))
    sn = styles * lax.rsqrt(jnp.mean(styles ** 2))
    wB = wn[None] * sn[:, None, :, None, None]
    dc = lax.rsqrt(jnp.sum(wB ** 2, axis=(2, 3, 4), keepdims=True) + 1e-8)
    wB = wB * dc * input_gain
    ys = []
    for b in range(B):
        ys.append(lax.conv_general_dilated(
            x[b:b + 1], wB[b], (1, 1), [(CONV_PAD, CONV_PAD)] * 2,
            dimension_numbers=('NCHW', 'OIHW', 'NCHW'),
            precision=lax.Precision.HIGHEST))
    y = jnp.concatenate(ys, axis=0)
    y = y + params['bias'][None, :, None, None]
    y = _upfirdn2d_ref(y, params['up_filter'], up=UP_FACTOR, down=1,
                       padding=(PAD_LO, PAD_HI, PAD_LO, PAD_HI),
                       gain=float(UP_FACTOR ** 2))
    y = jnp.where(y >= 0, y, y * SLOPE) * ACT_GAIN
    y = jnp.clip(y, -CONV_CLAMP, CONV_CLAMP)
    y = _upfirdn2d_ref(y, params['down_filter'], up=1, down=DOWN_FACTOR,
                       padding=(0, 0, 0, 0), gain=1.0)
    return y


# ----------------------------------- main ------------------------------------
if __name__ == "__main__":
    key = jax.random.PRNGKey(0)
    k1, k2, k3, k4 = jax.random.split(key, 4)

    # 1-D FIR filters and their dense upfirdn operators (host-side constants).
    up_f = design_lowpass_filter(UP_TAPS, IN_CUTOFF, IN_HALFWIDTH * 2, TMP_SR)
    down_f = design_lowpass_filter(DOWN_TAPS, OUT_CUTOFF, OUT_HALFWIDTH * 2, TMP_SR)
    Mh = upfirdn_up_matrix(up_f, UP_FACTOR, PAD_LO, PAD_HI, H_CONV, UP_FACTOR ** 2)
    Dh = upfirdn_down_matrix(down_f, DOWN_FACTOR, Mh.shape[0])
    assert Mh.shape[0] == HU and Dh.shape[0] == HO and HO == OUT_SIZE

    # Kronecker (separable) 2-D upfirdn operators, remapped to the kernel's
    # lane-dense layouts (conv output on a 20-pixel row pitch) and cast to bf16.
    kup = np.kron(Mh, Mh)                  # (NU, H_CONV*H_CONV), cols = i*18 + j
    kdn = np.kron(Dh, Dh)                  # (NO, NU)
    kup_t = np.zeros((Y_W, NU_PAD), np.float32)
    for i in range(H_CONV):
        kup_t[i * H_PAD: i * H_PAD + H_CONV, :NU] = \
            kup[:, i * H_CONV:(i + 1) * H_CONV].T
    kdn_t = np.zeros((NU_PAD, NO_PAD), np.float32)
    kdn_t[:NU, :NO] = kdn.T

    params = {
        'affine_w': jax.random.normal(k1, (IN_CH, W_DIM), jnp.float32),
        'affine_b': jnp.ones((1, IN_CH), jnp.float32),           # bias_init=1
        'weight': jax.random.normal(k2, (OUT_CH, IN_CH, CONV_K, CONV_K), jnp.float32),
        'bias': jnp.zeros((OUT_CH,), jnp.float32),
        'magnitude_ema': jnp.ones((), jnp.float32),
        'up_filter': jnp.asarray(up_f),
        'down_filter': jnp.asarray(down_f),
        'KupT': jnp.asarray(kup_t, dtype=jnp.bfloat16),
        'KdnT': jnp.asarray(kdn_t, dtype=jnp.bfloat16),
    }

    x = jax.random.normal(k3, (B, IN_CH, IN_SIZE, IN_SIZE), jnp.float32)
    w_lat = jax.random.normal(k4, (B, W_DIM), jnp.float32)
    latmask = None   # unused: size=None so the multimask branch is never taken

    fwd = jax.jit(synthesis_layer_forward)
    out = jax.block_until_ready(fwd(x, latmask, w_lat, params))

    ref = jax.block_until_ready(reference_forward(x, w_lat, params))
    assert out.shape == (B, OUT_CH, OUT_SIZE, OUT_SIZE) and out.dtype == jnp.float32
    err = float(jnp.max(jnp.abs(out - ref)))
    scale = float(jnp.max(jnp.abs(ref)))
    # bf16 FIR operators/operands with f32 accumulation: allow 3e-2 of scale.
    if not (err <= 3e-2 * max(scale, 1.0)):
        raise SystemExit("mismatch: max abs err = %g (ref scale %g)" % (err, scale))
    print("KERNEL_OK")
</pallas_src>

<mosaic_0001>
module attributes {stable_mosaic.version = 11 : i64} {
  func.func @kernel(%arg0: i32, %arg1: memref<2x32xf32, #tpu.memory_space<vmem>>, %arg2: memref<16x32xf32, #tpu.memory_space<vmem>>, %arg3: memref<1x16xf32, #tpu.memory_space<vmem>>, %arg4: memref<16x144xf32, #tpu.memory_space<vmem>>, %arg5: memref<32x1xf32, #tpu.memory_space<vmem>>, %arg6: memref<1x1xf32, #tpu.memory_space<smem>>, %arg7: memref<2x16x512xf32, #tpu.memory_space<vmem>>, %arg8: memref<384x1792xbf16, #tpu.memory_space<vmem>>, %arg9: memref<1792x256xbf16, #tpu.memory_space<vmem>>, %arg10: memref<32x256xf32, #tpu.memory_space<vmem>>) attributes {dimension_semantics = [#tpu.dimension_semantics<arbitrary>], iteration_bounds = array<i64: 1>, scalar_prefetch = 0 : i64, scratch_operands = 0 : i64, tpu.core_type = #tpu.core_type<tc>, window_params = [{pipeline_mode = #tpu.pipeline_mode<synchronous>, transform_indices = @transform_0, window_bounds = array<i64: 2, 32>}, {pipeline_mode = #tpu.pipeline_mode<synchronous>, transform_indices = @transform_1, window_bounds = array<i64: 16, 32>}, {pipeline_mode = #tpu.pipeline_mode<synchronous>, transform_indices = @transform_2, window_bounds = array<i64: 1, 16>}, {pipeline_mode = #tpu.pipeline_mode<synchronous>, transform_indices = @transform_3, window_bounds = array<i64: 16, 144>}, {pipeline_mode = #tpu.pipeline_mode<synchronous>, transform_indices = @transform_4, window_bounds = array<i64: 32, 1>}, {transform_indices = @transform_5, window_bounds = array<i64: 1, 1>}, {pipeline_mode = #tpu.pipeline_mode<synchronous>, transform_indices = @transform_6, window_bounds = array<i64: 2, 16, 512>}, {pipeline_mode = #tpu.pipeline_mode<synchronous>, transform_indices = @transform_7, window_bounds = array<i64: 384, 1792>}, {pipeline_mode = #tpu.pipeline_mode<synchronous>, transform_indices = @transform_8, window_bounds = array<i64: 1792, 256>}, {pipeline_mode = #tpu.pipeline_mode<synchronous>, transform_indices = @transform_9, window_bounds = array<i64: 32, 256>}]} {
    %c0 = arith.constant 0 : index
    %c0_0 = arith.constant 0 : index
    %0 = vector.load %arg1[%c0, %c0_0] : memref<2x32xf32, #tpu.memory_space<vmem>>, vector<2x32xf32>
    %c0_1 = arith.constant 0 : index
    %c0_2 = arith.constant 0 : index
    %1 = vector.load %arg2[%c0_1, %c0_2] : memref<16x32xf32, #tpu.memory_space<vmem>>, vector<16x32xf32>
    %cst = arith.constant dense<0.000000e+00> : vector<2x16xf32>
    %2 = tpu.matmul %0, %1, %cst {dimension_numbers = #tpu.dot_dimension_numbers<[1], [1], [0], [0], [0, 0, 1, 0], [], []>} : vector<2x32xf32>, vector<16x32xf32>, vector<2x16xf32> -> vector<2x16xf32>
    %c0_3 = arith.constant 0 : index
    %c0_4 = arith.constant 0 : index
    %3 = vector.load %arg3[%c0_3, %c0_4] : memref<1x16xf32, #tpu.memory_space<vmem>>, vector<1x16xf32>
    %4 = vector.broadcast %3 : vector<1x16xf32> to vector<2x16xf32>
    %5 = arith.addf %2, %4 : vector<2x16xf32>
    %6 = arith.mulf %5, %5 : vector<2x16xf32>
    %7 = vector.shape_cast %6 : vector<2x16xf32> to vector<1x2x16xf32>
    %cst_5 = arith.constant dense<0.000000e+00> : vector<1xf32>
    %8 = vector.multi_reduction <add>, %7, %cst_5 [1, 2] : vector<1x2x16xf32> to vector<1xf32>
    %9 = vector.shape_cast %8 : vector<1xf32> to vector<1x1x1xf32>
    %10 = vector.extract %9[0, 0, 0] : f32 from vector<1x1x1xf32>
    %11 = vector.broadcast %10 : f32 to vector<1x1xf32>
    %cst_6 = arith.constant 3.200000e+01 : f32
    %12 = vector.broadcast %cst_6 : f32 to vector<1x1xf32>
    %13 = arith.divf %11, %12 : vector<1x1xf32>
    %14 = math.rsqrt %13 : vector<1x1xf32>
    %15 = vector.broadcast %14 : vector<1x1xf32> to vector<2x16xf32>
    %16 = arith.mulf %5, %15 : vector<2x16xf32>
    %17 = tpu.concatenate %16, %16, %16, %16, %16, %16, %16, %16, %16 in 1 : vector<2x16xf32>, vector<2x16xf32>, vector<2x16xf32>, vector<2x16xf32>, vector<2x16xf32>, vector<2x16xf32>, vector<2x16xf32>, vector<2x16xf32>, vector<2x16xf32> -> vector<2x144xf32>
    %c0_7 = arith.constant 0 : index
    %c0_8 = arith.constant 0 : index
    %18 = memref.load %arg6[%c0_7, %c0_8] : memref<1x1xf32, #tpu.memory_space<smem>>
    %c0_9 = arith.constant 0 : index
    %c0_10 = arith.constant 0 : index
    %19 = vector.load %arg4[%c0_9, %c0_10] : memref<16x144xf32, #tpu.memory_space<vmem>>, vector<16x144xf32>
    %20 = vector.extract_strided_slice %17 {offsets = [0, 0], sizes = [1, 144], strides = [1, 1]} : vector<2x144xf32> to vector<1x144xf32>
    %21 = vector.broadcast %20 : vector<1x144xf32> to vector<16x144xf32>
    %22 = arith.mulf %19, %21 : vector<16x144xf32>
    %23 = arith.mulf %22, %22 : vector<16x144xf32>
    %cst_11 = arith.constant dense<0.000000e+00> : vector<16xf32>
    %24 = vector.multi_reduction <add>, %23, %cst_11 [1] : vector<16x144xf32> to vector<16xf32>
    %25 = vector.shape_cast %24 : vector<16xf32> to vector<16x1xf32>
    %cst_12 = arith.constant 9.99999993E-9 : f32
    %26 = vector.broadcast %cst_12 : f32 to vector<16x1xf32>
    %27 = arith.addf %25, %26 : vector<16x1xf32>
    %28 = math.rsqrt %27 : vector<16x1xf32>
    %29 = vector.broadcast %18 : f32 to vector<16x1xf32>
    %30 = arith.mulf %28, %29 : vector<16x1xf32>
    %31 = vector.broadcast %30 : vector<16x1xf32> to vector<16x144xf32>
    %32 = arith.mulf %22, %31 : vector<16x144xf32>
    %c0_13 = arith.constant 0 : index
    %c0_14 = arith.constant 0 : index
    %c0_15 = arith.constant 0 : index
    %33 = vector.load %arg7[%c0_13, %c0_14, %c0_15] : memref<2x16x512xf32, #tpu.memory_space<vmem>>, vector<1x16x512xf32>
    %34 = vector.shape_cast %33 : vector<1x16x512xf32> to vector<16x512xf32>
    %35 = vector.extract_strided_slice %34 {offsets = [0, 0], sizes = [16, 384], strides = [1, 1]} : vector<16x512xf32> to vector<16x384xf32>
    %36 = vector.extract_strided_slice %34 {offsets = [0, 1], sizes = [16, 384], strides = [1, 1]} : vector<16x512xf32> to vector<16x384xf32>
    %37 = vector.extract_strided_slice %34 {offsets = [0, 2], sizes = [16, 384], strides = [1, 1]} : vector<16x512xf32> to vector<16x384xf32>
    %38 = vector.extract_strided_slice %34 {offsets = [0, 20], sizes = [16, 384], strides = [1, 1]} : vector<16x512xf32> to vector<16x384xf32>
    %39 = vector.extract_strided_slice %34 {offsets = [0, 21], sizes = [16, 384], strides = [1, 1]} : vector<16x512xf32> to vector<16x384xf32>
    %40 = vector.extract_strided_slice %34 {offsets = [0, 22], sizes = [16, 384], strides = [1, 1]} : vector<16x512xf32> to vector<16x384xf32>
    %41 = vector.extract_strided_slice %34 {offsets = [0, 40], sizes = [16, 384], strides = [1, 1]} : vector<16x512xf32> to vector<16x384xf32>
    %42 = vector.extract_strided_slice %34 {offsets = [0, 41], sizes = [16, 384], strides = [1, 1]} : vector<16x512xf32> to vector<16x384xf32>
    %43 = vector.extract_strided_slice %34 {offsets = [0, 42], sizes = [16, 384], strides = [1, 1]} : vector<16x512xf32> to vector<16x384xf32>
    %44 = tpu.concatenate %35, %36, %37, %38, %39, %40, %41, %42, %43 in 0 : vector<16x384xf32>, vector<16x384xf32>, vector<16x384xf32>, vector<16x384xf32>, vector<16x384xf32>, vector<16x384xf32>, vector<16x384xf32>, vector<16x384xf32>, vector<16x384xf32> -> vector<144x384xf32>
    %cst_16 = arith.constant dense<0.000000e+00> : vector<16x384xf32>
    %45 = tpu.matmul %32, %44, %cst_16 {dimension_numbers = #tpu.dot_dimension_numbers<[1], [0], [0], [1], [0, 0, 1, 1], [], []>} : vector<16x144xf32>, vector<144x384xf32>, vector<16x384xf32> -> vector<16x384xf32>
    %c0_17 = arith.constant 0 : index
    %c0_18 = arith.constant 0 : index
    %46 = vector.load %arg4[%c0_17, %c0_18] : memref<16x144xf32, #tpu.memory_space<vmem>>, vector<16x144xf32>
    %47 = vector.extract_strided_slice %17 {offsets = [1, 0], sizes = [1, 144], strides = [1, 1]} : vector<2x144xf32> to vector<1x144xf32>
    %48 = vector.broadcast %47 : vector<1x144xf32> to vector<16x144xf32>
    %49 = arith.mulf %46, %48 : vector<16x144xf32>
    %50 = arith.mulf %49, %49 : vector<16x144xf32>
    %cst_19 = arith.constant dense<0.000000e+00> : vector<16xf32>
    %51 = vector.multi_reduction <add>, %50, %cst_19 [1] : vector<16x144xf32> to vector<16xf32>
    %52 = vector.shape_cast %51 : vector<16xf32> to vector<16x1xf32>
    %cst_20 = arith.constant 9.99999993E-9 : f32
    %53 = vector.broadcast %cst_20 : f32 to vector<16x1xf32>
    %54 = arith.addf %52, %53 : vector<16x1xf32>
    %55 = math.rsqrt %54 : vector<16x1xf32>
    %56 = vector.broadcast %18 : f32 to vector<16x1xf32>
    %57 = arith.mulf %55, %56 : vector<16x1xf32>
    %58 = vector.broadcast %57 : vector<16x1xf32> to vector<16x144xf32>
    %59 = arith.mulf %49, %58 : vector<16x144xf32>
    %c1 = arith.constant 1 : index
    %c0_21 = arith.constant 0 : index
    %c0_22 = arith.constant 0 : index
    %60 = vector.load %arg7[%c1, %c0_21, %c0_22] : memref<2x16x512xf32, #tpu.memory_space<vmem>>, vector<1x16x512xf32>
    %61 = vector.shape_cast %60 : vector<1x16x512xf32> to vector<16x512xf32>
    %62 = vector.extract_strided_slice %61 {offsets = [0, 0], sizes = [16, 384], strides = [1, 1]} : vector<16x512xf32> to vector<16x384xf32>
    %63 = vector.extract_strided_slice %61 {offsets = [0, 1], sizes = [16, 384], strides = [1, 1]} : vector<16x512xf32> to vector<16x384xf32>
    %64 = vector.extract_strided_slice %61 {offsets = [0, 2], sizes = [16, 384], strides = [1, 1]} : vector<16x512xf32> to vector<16x384xf32>
    %65 = vector.extract_strided_slice %61 {offsets = [0, 20], sizes = [16, 384], strides = [1, 1]} : vector<16x512xf32> to vector<16x384xf32>
    %66 = vector.extract_strided_slice %61 {offsets = [0, 21], sizes = [16, 384], strides = [1, 1]} : vector<16x512xf32> to vector<16x384xf32>
    %67 = vector.extract_strided_slice %61 {offsets = [0, 22], sizes = [16, 384], strides = [1, 1]} : vector<16x512xf32> to vector<16x384xf32>
    %68 = vector.extract_strided_slice %61 {offsets = [0, 40], sizes = [16, 384], strides = [1, 1]} : vector<16x512xf32> to vector<16x384xf32>
    %69 = vector.extract_strided_slice %61 {offsets = [0, 41], sizes = [16, 384], strides = [1, 1]} : vector<16x512xf32> to vector<16x384xf32>
    %70 = vector.extract_strided_slice %61 {offsets = [0, 42], sizes = [16, 384], strides = [1, 1]} : vector<16x512xf32> to vector<16x384xf32>
    %71 = tpu.concatenate %62, %63, %64, %65, %66, %67, %68, %69, %70 in 0 : vector<16x384xf32>, vector<16x384xf32>, vector<16x384xf32>, vector<16x384xf32>, vector<16x384xf32>, vector<16x384xf32>, vector<16x384xf32>, vector<16x384xf32>, vector<16x384xf32> -> vector<144x384xf32>
    %cst_23 = arith.constant dense<0.000000e+00> : vector<16x384xf32>
    %72 = tpu.matmul %59, %71, %cst_23 {dimension_numbers = #tpu.dot_dimension_numbers<[1], [0], [0], [1], [0, 0, 1, 1], [], []>} : vector<16x144xf32>, vector<144x384xf32>, vector<16x384xf32> -> vector<16x384xf32>
    %73 = tpu.concatenate %45, %72 in 0 : vector<16x384xf32>, vector<16x384xf32> -> vector<32x384xf32>
    %c0_24 = arith.constant 0 : index
    %c0_25 = arith.constant 0 : index
    %74 = vector.load %arg5[%c0_24, %c0_25] : memref<32x1xf32, #tpu.memory_space<vmem>>, vector<32x1xf32>
    %75 = vector.broadcast %74 : vector<32x1xf32> to vector<32x384xf32>
    %76 = arith.addf %73, %75 : vector<32x384xf32>
    %77 = arith.truncf %76 : vector<32x384xf32> to vector<32x384xbf16>
    %c0_26 = arith.constant 0 : index
    %c0_27 = arith.constant 0 : index
    %78 = vector.load %arg8[%c0_26, %c0_27] : memref<384x1792xbf16, #tpu.memory_space<vmem>>, vector<384x1792xbf16>
    %cst_28 = arith.constant dense<0.000000e+00> : vector<32x1792xf32>
    %79 = tpu.matmul %77, %78, %cst_28 {dimension_numbers = #tpu.dot_dimension_numbers<[1], [0], [0], [1], [0, 0, 1, 1], [], []>} : vector<32x384xbf16>, vector<384x1792xbf16>, vector<32x1792xf32> -> vector<32x1792xf32>
    %cst_29 = arith.constant 0.000000e+00 : f32
    %80 = vector.broadcast %cst_29 : f32 to vector<32x1792xf32>
    %81 = arith.cmpf oge, %79, %80 : vector<32x1792xf32>
    %cst_30 = arith.constant 2.000000e-01 : f32
    %82 = vector.broadcast %cst_30 : f32 to vector<32x1792xf32>
    %83 = arith.mulf %79, %82 : vector<32x1792xf32>
    %84 = arith.select %81, %79, %83 : vector<32x1792xi1>, vector<32x1792xf32>
    %cst_31 = arith.constant 1.41421354 : f32
    %85 = vector.broadcast %cst_31 : f32 to vector<32x1792xf32>
    %86 = arith.mulf %84, %85 : vector<32x1792xf32>
    %cst_32 = arith.constant -2.560000e+02 : f32
    %cst_33 = arith.constant 2.560000e+02 : f32
    %87 = vector.broadcast %cst_32 : f32 to vector<32x1792xf32>
    %88 = arith.maximumf %87, %86 : vector<32x1792xf32>
    %89 = vector.broadcast %cst_33 : f32 to vector<32x1792xf32>
    %90 = arith.minimumf %89, %88 : vector<32x1792xf32>
    %91 = arith.truncf %90 : vector<32x1792xf32> to vector<32x1792xbf16>
    %c0_34 = arith.constant 0 : index
    %c0_35 = arith.constant 0 : index
    %92 = vector.load %arg9[%c0_34, %c0_35] : memref<1792x256xbf16, #tpu.memory_space<vmem>>, vector<1792x256xbf16>
    %cst_36 = arith.constant dense<0.000000e+00> : vector<32x256xf32>
    %93 = tpu.matmul %91, %92, %cst_36 {dimension_numbers = #tpu.dot_dimension_numbers<[1], [0], [0], [1], [0, 0, 1, 1], [], []>} : vector<32x1792xbf16>, vector<1792x256xbf16>, vector<32x256xf32> -> vector<32x256xf32>
    %c0_37 = arith.constant 0 : index
    %c0_38 = arith.constant 0 : index
    %94 = vector.load %arg10[%c0_37, %c0_38] : memref<32x256xf32, #tpu.memory_space<vmem>>, vector<32x256xf32>
    tpu.vector_store %arg10[%c0_37, %c0_38], %93 {strides = array<i32>} : memref<32x256xf32, #tpu.memory_space<vmem>>, vector<32x256xf32>,
    return
  }
  func.func @transform_0(%arg0: i32) -> (i32, i32) {
    %c0_i32 = arith.constant 0 : i32
    %c0_i32_0 = arith.constant 0 : i32
    %c0_i32_1 = arith.constant 0 : i32
    return %c0_i32, %c0_i32_0 : i32, i32
  }
  func.func @transform_1(%arg0: i32) -> (i32, i32) {
    %c0_i32 = arith.constant 0 : i32
    %c0_i32_0 = arith.constant 0 : i32
    %c0_i32_1 = arith.constant 0 : i32
    return %c0_i32, %c0_i32_0 : i32, i32
  }
  func.func @transform_2(%arg0: i32) -> (i32, i32) {
    %c0_i32 = arith.constant 0 : i32
    %c0_i32_0 = arith.constant 0 : i32
    %c0_i32_1 = arith.constant 0 : i32
    return %c0_i32, %c0_i32_0 : i32, i32
  }
  func.func @transform_3(%arg0: i32) -> (i32, i32) {
    %c0_i32 = arith.constant 0 : i32
    %c0_i32_0 = arith.constant 0 : i32
    %c0_i32_1 = arith.constant 0 : i32
    return %c0_i32, %c0_i32_0 : i32, i32
  }
  func.func @transform_4(%arg0: i32) -> (i32, i32) {
    %c0_i32 = arith.constant 0 : i32
    %c0_i32_0 = arith.constant 0 : i32
    %c0_i32_1 = arith.constant 0 : i32
    return %c0_i32, %c0_i32_0 : i32, i32
  }
  func.func @transform_5(%arg0: i32) -> (i32, i32) {
    %c0_i32 = arith.constant 0 : i32
    %c0_i32_0 = arith.constant 0 : i32
    %c0_i32_1 = arith.constant 0 : i32
    return %c0_i32, %c0_i32_0 : i32, i32
  }
  func.func @transform_6(%arg0: i32) -> (i32, i32, i32) {
    %c0_i32 = arith.constant 0 : i32
    %c0_i32_0 = arith.constant 0 : i32
    %c0_i32_1 = arith.constant 0 : i32
    %c0_i32_2 = arith.constant 0 : i32
    return %c0_i32, %c0_i32_0, %c0_i32_1 : i32, i32, i32
  }
  func.func @transform_7(%arg0: i32) -> (i32, i32) {
    %c0_i32 = arith.constant 0 : i32
    %c0_i32_0 = arith.constant 0 : i32
    %c0_i32_1 = arith.constant 0 : i32
    return %c0_i32, %c0_i32_0 : i32, i32
  }
  func.func @transform_8(%arg0: i32) -> (i32, i32) {
    %c0_i32 = arith.constant 0 : i32
    %c0_i32_0 = arith.constant 0 : i32
    %c0_i32_1 = arith.constant 0 : i32
    return %c0_i32, %c0_i32_0 : i32, i32
  }
  func.func @transform_9(%arg0: i32) -> (i32, i32) {
    %c0_i32 = arith.constant 0 : i32
    %c0_i32_0 = arith.constant 0 : i32
    %c0_i32_1 = arith.constant 0 : i32
    return %c0_i32, %c0_i32_0 : i32, i32
  }
}

</mosaic_0001>

<bundles_post_ra>
// kernel: synthesis_layer_forward.1
= control target key start
LH: loop header
LB: loop body
LE: loop exit
PB: predicated region body
PF: predicated region fallthrough
CT: control target
= control target key end

     0   :  { %15 = vsyncpa [#allocation4], 0  ;;  %s7514_s30 = smov [#allocation3]   ;;  %s9777_s0 = inlined_call_operand.vmem [shape: f32[2,32], index: 0, kind: input, shape index: {}]   ;;  %s9778_s1 = inlined_call_operand.vmem [shape: f32[16,32], index: 1, kind: input, shape index: {}]   ;;  %s9779_s2 = inlined_call_operand.vmem [shape: f32[1,16], index: 2, kind: input, shape index: {}]   ;;  %s9780_s3 = inlined_call_operand.vmem [shape: f32[16,144], index: 3, kind: input, shape index: {}]   ;;  %s9781_s4 = inlined_call_operand.vmem [shape: f32[32,1], index: 4, kind: input, shape index: {}]   ;;  %s9782_s5 = inlined_call_operand.<no memory space> [shape: f32[1,1], index: 5, kind: input, shape index: {}]   ;;  %s9783_s6 = inlined_call_operand.vmem [shape: f32[2,16,512], index: 6, kind: input, shape index: {}]   ;;  %s9784_s7 = inlined_call_operand.vmem [shape: bf16[384,1792], index: 7, kind: input, shape index: {}]   ;;  %s9785_s8 = inlined_call_operand.hbm [shape: bf16[1792,256], index: 8, kind: input, shape index: {}]   ;;  %s9786_s9 = inlined_call_operand.vmem [shape: f32[32,256], index: 9, kind: output, shape index: {}]  }
   0x1   :  { %s37_s10 = sshll.u32 %s7514_s30, 4  ;;  %s38_s10 = int_to_ptr.vmem [resolvable:$true] %s37_s10 }
   0x2   :  { %s7500_s11 = scalar_lea.vmem %s38_s10, 28672  ;;  %p7505_p1 = scmp.lt.s32.totalorder %s38_s10, %s38_s10 }
   0x3   :  { %p7501_p0 = scmp.ne.s32.totalorder %s38_s10, %s7500_s11  ;;  %p7506_p2 = scmp.lt.s32.totalorder %s7500_s11, %s7500_s11 }
   0x5   :  { %p7507_p3 = por %p7506_p2, %p7505_p1 }
   0x7   :  { %p7508_p4 = pnand %p7507_p3, %p7501_p0 }
   0x9   :  { %7511 = shalt.err (!%p7508_p4)
}
   0xa   :  { %s7515_s12 = smov 128   ;;  %s7516_s13 = smov 8  }
   0xb   :  { %43 = dma.hbm_to_vmem [thread:$0]  %s9785_s8, 28672, %s38_s10, [#allocation4], %s7515_s12, %s7515_s12, %s7516_s13  }
   0xc   :  { %7512 = dma.done.wait [#allocation4], 28672  }
   0xd   :  { %7513 = vsyncadd [#allocation4], 4294938624  ;;  %v9787_v0 = vmov 0.0   ;;  %vm7518_vm0 = vmmov 0   ;;  %vm58_vm1 = vcmask 261120   ;;  %v50_v1 = vld [vmem:[%s9778_s1 + $0x8] sm:$0xff] }
   0xe   :  { %6600 = vmatprep.subr.mxu1 %v9787_v0  ;;  %6604 = vmatprep.mubr.msk.f32.mxu1 %vm7518_vm0, %v9787_v0  ;;  %v236_v2 = vld [vmem:[%s9783_s6 + $0x30] sm:$0xff]  ;;  %v237_v3 = vld [vmem:[%s9783_s6 + $0x38] sm:$0xff]  ;;  %v49_v4 = vld [vmem:[%s9778_s1] sm:$0xff]  ;;  %s7519_s23 = smov 87   ;;  %s7520_s1 = smov 106   ;;  %vm436_vm2 = vcmask 711680  }
   0xf   :  { %561 = vmatprep.subr.mxu0 %v9787_v0  ;;  %6601 = vmatpush3.xpose.msk.msra.mxu1 %vm58_vm1, %v50_v1  ;;  %v48_v5 = vld [vmem:[%s9777_s0] sm:$0x3]  ;;  %v232_v6 = vld [vmem:[%s9783_s6 + $0x10] sm:$0xff]  ;;  %v233_v7 = vld [vmem:[%s9783_s6 + $0x18] sm:$0xff]  ;;  %s7521_s0 = smov 88   ;;  %s7522_s30 = smov 107  }
  0x10   :  { %6602 = vmatprep.subr.mxu1 %v9787_v0  ;;  %432 = vrot.lane.b32.xlu1 %v236_v2, %s7519_s23  ;;  %s7523_s10 = smov 108   ;;  %s7524_s11 = smov 126   ;;  %v235_v8 = vld [vmem:[%s9783_s6 + $0x28] sm:$0xff]  ;;  %v234_v9 = vld [vmem:[%s9783_s6 + $0x20] sm:$0xff]  ;;  %vm407_vm3 = vcmask 719872   ;;  %vm378_vm4 = vcmask 867328  }
  0x11   :  { %434 = vrot.lane.b32.xlu0 %v237_v3, %s7519_s23  ;;  %s7525_s12 = smov 127   ;;  %v231_v10 = vld [vmem:[%s9783_s6 + $0x8] sm:$0xff]  ;;  %v7657_v11 = vld [vmem:[%s9783_s6] sm:$0xff]  ;;  %s7526_s20 = smov 86   ;;  %vm349_vm5 = vcmask 875520   ;;  %vm320_vm6 = vcmask 883712  }
  0x12   :  { %vm291_vm7 = vcmask 1031168   ;;  %v7737_v46 = vld [vmem:[%s9783_s6 + $0x70] sm:$0xff]  ;;  %vm262_vm8 = vcmask 1039360   ;;  %vm139_vm9 = vcmask 123904   ;;  %vm465_vm10 = vcmask 703488   ;;  %s7528_s22 = smov 16  }
  0x13   :  { %6603 = vmatpush3.xpose.msk.msra.mxu1 %vm58_vm1, %v49_v4  ;;  %v7482_v58 = vld [vmem:[%s9783_s6 + $0x30] sm:$0xff]  ;;  %s7530_s24 = smov 64   ;;  %s7531_s25 = smov 80   ;;  %vm177_vm11 = vcmask 130048   ;;  %vm180_vm12 = vcmask 392192   ;;  %vm182_vm13 = vcmask 523264  }
  0x14   :  { %424 = vrot.lane.b32.xlu1 %v232_v6, %s7519_s23  ;;  %v7483_v60 = vld [vmem:[%s9783_s6 + $0x10] sm:$0xff]  ;;  %s7532_s26 = smov 96   ;;  %s7533_s27 = smov 112   ;;  %vm184_vm14 = vcmask 654336   ;;  %vm186_vm15 = vcmask 785408   ;;  %vm188_vm0 = vcmask 916480  }
  0x15   :  { %426 = vrot.lane.b32.xlu0 %v233_v7, %s7519_s23  ;;  %v7767_v62 = vld [vmem:[%s9783_s6 + $0x50] sm:$0xff] }
  0x16   :  { %6605 = vmatmul.mubr.msk.f32.vlgmr.msra.gmra.mxu1 %vm58_vm1, %v48_v5 }
  0x18   :  { %374 = vrot.lane.b32.xlu1 %v236_v2, %s7520_s1 }
  0x19   :  { %403 = vrot.lane.b32.xlu0 %v236_v2, %s7521_s0 }
  0x1c   :  { %366 = vrot.lane.b32.xlu1 %v232_v6, %s7520_s1 }
  0x1d   :  { %405 = vrot.lane.b32.xlu0 %v237_v3, %s7521_s0 }
  0x20   :  { %368 = vrot.lane.b32.xlu1 %v233_v7, %s7520_s1 }
  0x21   :  { %395 = vrot.lane.b32.xlu0 %v232_v6, %s7521_s0 }
  0x24   :  { %345 = vrot.lane.b32.xlu1 %v236_v2, %s7522_s30 }
  0x25   :  { %397 = vrot.lane.b32.xlu0 %v233_v7, %s7521_s0 }
  0x28   :  { %347 = vrot.lane.b32.xlu1 %v237_v3, %s7522_s30 }
  0x29   :  { %376 = vrot.lane.b32.xlu0 %v237_v3, %s7520_s1 }
  0x2c   :  { %337 = vrot.lane.b32.xlu1 %v232_v6, %s7522_s30 }
  0x2d   :  { %339 = vrot.lane.b32.xlu0 %v233_v7, %s7522_s30 }
  0x30   :  { %316 = vrot.lane.b32.xlu1 %v236_v2, %s7523_s10 }
  0x31   :  { %318 = vrot.lane.b32.xlu0 %v237_v3, %s7523_s10 }
  0x34   :  { %308 = vrot.lane.b32.xlu1 %v232_v6, %s7523_s10 }
  0x35   :  { %310 = vrot.lane.b32.xlu0 %v233_v7, %s7523_s10 }
  0x38   :  { %287 = vrot.lane.b32.xlu1 %v236_v2, %s7524_s11 }
  0x39   :  { %289 = vrot.lane.b32.xlu0 %v237_v3, %s7524_s11 }
  0x3c   :  { %279 = vrot.lane.b32.xlu1 %v232_v6, %s7524_s11 }
  0x3d   :  { %281 = vrot.lane.b32.xlu0 %v233_v7, %s7524_s11 }
  0x40   :  { %258 = vrot.lane.b32.xlu1 %v236_v2, %s7525_s12 }
  0x41   :  { %260 = vrot.lane.b32.xlu0 %v237_v3, %s7525_s12 }
  0x44   :  { %250 = vrot.lane.b32.xlu1 %v232_v6, %s7525_s12 }
  0x45   :  { %252 = vrot.lane.b32.xlu0 %v233_v7, %s7525_s12  ;;  %v7798_v7 = vld [vmem:[%s9783_s6 + $0x58] sm:$0xff] }
  0x48   :  { %430 = vrot.lane.b32.xlu1 %v235_v8, %s7519_s23 }
  0x49   :  { %428 = vrot.lane.b32.xlu0 %v234_v9, %s7519_s23  ;;  %v7808_v9 = vld [vmem:[%s9783_s6 + $0x60] sm:$0xff] }
  0x4a   :  { %9801 = vst [vmem:[#allocation6_spill] sm:$0xff] %v7808_v9 }
  0x4c   :  { %422 = vrot.lane.b32.xlu1 %v231_v10, %s7519_s23 }
  0x4d   :  { %420 = vrot.lane.b32.xlu0 %v7657_v11, %s7519_s23 }
  0x50   :  { %461 = vrot.lane.b32.xlu1 %v236_v2, %s7526_s20 }
  0x54   :  { %401 = vrot.lane.b32.xlu1 %v235_v8, %s7521_s0 }
  0x58   :  { %453 = vrot.lane.b32.xlu1 %v232_v6, %s7526_s20  ;;  %v7789_v6 = vld [vmem:[%s9783_s6 + $0x78] sm:$0xff] }
  0x5c   :  { %393 = vrot.lane.b32.xlu1 %v231_v10, %s7521_s0 }
  0x60   :  { %372 = vrot.lane.b32.xlu1 %v235_v8, %s7520_s1 }
  0x64   :  { %364 = vrot.lane.b32.xlu1 %v231_v10, %s7520_s1 }
  0x68   :  { %343 = vrot.lane.b32.xlu1 %v235_v8, %s7522_s30 }
  0x6c   :  { %335 = vrot.lane.b32.xlu1 %v231_v10, %s7522_s30 }
  0x70   :  { %314 = vrot.lane.b32.xlu1 %v235_v8, %s7523_s10 }
  0x74   :  { %306 = vrot.lane.b32.xlu1 %v231_v10, %s7523_s10 }
  0x78   :  { %285 = vrot.lane.b32.xlu1 %v235_v8, %s7524_s11 }
  0x7c   :  { %277 = vrot.lane.b32.xlu1 %v231_v10, %s7524_s11 }
  0x80   :  { %256 = vrot.lane.b32.xlu1 %v235_v8, %s7525_s12  ;;  %v5961_v8 = vld [vmem:[%s9779_s2] ss:$0 sm:$0xff]  ;;  %s7529_s2 = smov 48  }
  0x82   :  { %v7676_v12 = vpop.permute.xlu1 %432 }
  0x83   :  { %v435_v13 = vpop.permute.xlu0 %434 }
  0x84   :  { %v442_v14 = vsel %vm436_vm2, %v7676_v12, %v435_v13  ;;  %248 = vrot.lane.b32.xlu1 %v231_v10, %s7525_s12  ;;  %v7817_v13 = vld [vmem:[%s9783_s6 + $0x48] sm:$0xff] }
  0x85   :  { %562 = vmatpush1.msra.mxu0 %v442_v14  ;;  %9802 = vst [vmem:[#allocation7_spill] sm:$0xff] %v7817_v13 }
  0x86   :  { %v7681_v15 = vpop.permute.xlu1 %424  ;;  %563 = vmatprep.subr.mxu0 %v9787_v0 }
  0x87   :  { %v427_v16 = vpop.permute.xlu0 %426 }
  0x88   :  { %v439_v17 = vsel %vm436_vm2, %v7681_v15, %v427_v16  ;;  %867 = vrot.lane.b32.xlu1 %v7737_v46, %s7519_s23  ;;  %v7830_v16 = vld [vmem:[%s9783_s6 + $0x68] sm:$0xff] }
  0x89   :  { %564 = vmatpush1.msra.mxu0 %v439_v17  ;;  %9803 = vst [vmem:[#allocation8_spill] sm:$0xff] %v7830_v16  ;;  %v7484_v17 = vld [vmem:[%s9783_s6 + $0x38] sm:$0xff] }
  0x8a   :  { %v7686_v18 = vpop.permute.xlu1 %374  ;;  %565 = vmatprep.subr.mxu0 %v9787_v0 }
  0x8b   :  { %v7689_v19 = vpop.permute.xlu0 %403 }
  0x8c   :  { %859 = vrot.lane.b32.xlu1 %v7767_v62, %s7519_s23 }
  0x8e   :  { %v7691_v20 = vpop.permute.xlu1 %366 }
  0x8f   :  { %v406_v21 = vpop.permute.xlu0 %405 }
  0x90   :  { %v413_v22 = vsel %vm407_vm3, %v7689_v19, %v406_v21  ;;  %449 = vrot.lane.b32.xlu1 %v7657_v11, %s7526_s20  ;;  %v7845_v21 = vld [vmem:[%s9783_s6 + $0x20] sm:$0xff] }
  0x91   :  { %566 = vmatpush1.msra.mxu0 %v413_v22  ;;  %v7486_v22 = vld [vmem:[%s9783_s6 + $0x18] sm:$0xff] }
  0x92   :  { %v369_v23 = vpop.permute.xlu1 %368  ;;  %567 = vmatprep.subr.mxu0 %v9787_v0 }
  0x93   :  { %v7696_v24 = vpop.permute.xlu0 %395  ;;  %v381_v31 = vsel %vm378_vm4, %v7691_v20, %v369_v23 }
  0x94   :  { %811 = vrot.lane.b32.xlu1 %v7737_v46, %s7520_s1 }
  0x96   :  { %v7698_v25 = vpop.permute.xlu1 %345 }
  0x97   :  { %v398_v26 = vpop.permute.xlu0 %397 }
  0x98   :  { %v410_v27 = vsel %vm407_vm3, %v7696_v24, %v398_v26  ;;  %813 = vrot.lane.b32.xlu1 %v7789_v6, %s7520_s1  ;;  %v7862_v26 = vld [vmem:[%s9783_s6] sm:$0xff] }
  0x99   :  { %568 = vmatpush1.msra.mxu0 %v410_v27 }
  0x9a   :  { %v348_v28 = vpop.permute.xlu1 %347  ;;  %569 = vmatprep.subr.mxu0 %v9787_v0 }
  0x9b   :  { %v377_v29 = vpop.permute.xlu0 %376  ;;  %v355_v33 = vsel %vm349_vm5, %v7698_v25, %v348_v28 }
  0x9c   :  { %v384_v30 = vsel %vm378_vm4, %v7686_v18, %v377_v29  ;;  %803 = vrot.lane.b32.xlu1 %v7767_v62, %s7520_s1 }
  0x9d   :  { %570 = vmatpush1.msra.mxu0 %v384_v30 }
  0x9e   :  { %v7707_v32 = vpop.permute.xlu1 %337  ;;  %571 = vmatprep.subr.mxu0 %v9787_v0 }
  0x9f   :  { %v340_v34 = vpop.permute.xlu0 %339  ;;  %572 = vmatpush1.msra.mxu0 %v381_v31 }
  0xa0   :  { %573 = vmatprep.subr.mxu0 %v9787_v0  ;;  %v352_v35 = vsel %vm349_vm5, %v7707_v32, %v340_v34  ;;  %805 = vrot.lane.b32.xlu1 %v7798_v7, %s7520_s1 }
  0xa1   :  { %574 = vmatpush1.msra.mxu0 %v355_v33 }
  0xa2   :  { %v7715_v36 = vpop.permute.xlu1 %316  ;;  %575 = vmatprep.subr.mxu0 %v9787_v0 }
  0xa3   :  { %v319_v37 = vpop.permute.xlu0 %318  ;;  %576 = vmatpush1.msra.mxu0 %v352_v35 }
  0xa4   :  { %577 = vmatprep.subr.mxu0 %v9787_v0  ;;  %v326_v38 = vsel %vm320_vm6, %v7715_v36, %v319_v37  ;;  %863 = vrot.lane.b32.xlu1 %v7808_v9, %s7519_s23 }
  0xa5   :  { %578 = vmatpush1.msra.mxu0 %v326_v38 }
  0xa6   :  { %v7721_v39 = vpop.permute.xlu1 %308  ;;  %579 = vmatprep.subr.mxu0 %v9787_v0 }
  0xa7   :  { %v311_v40 = vpop.permute.xlu0 %310 }
  0xa8   :  { %v323_v41 = vsel %vm320_vm6, %v7721_v39, %v311_v40  ;;  %857 = vrot.lane.b32.xlu1 %v7817_v13, %s7519_s23 }
  0xa9   :  { %580 = vmatpush1.msra.mxu0 %v323_v41 }
  0xaa   :  { %v7726_v42 = vpop.permute.xlu1 %287  ;;  %581 = vmatprep.subr.mxu0 %v9787_v0 }
  0xab   :  { %v290_v43 = vpop.permute.xlu0 %289 }
  0xac   :  { %v297_v44 = vsel %vm291_vm7, %v7726_v42, %v290_v43  ;;  %783 = vrot.lane.b32.xlu1 %v7737_v46, %s7522_s30  ;;  %v7925_v43 = vld [vmem:[%s9783_s6 + $0x28] sm:$0xff] }
  0xad   :  { %582 = vmatpush1.msra.mxu0 %v297_v44 }
  0xae   :  { %v7731_v45 = vpop.permute.xlu1 %279  ;;  %583 = vmatprep.subr.mxu0 %v9787_v0 }
  0xaf   :  { %v282_v47 = vpop.permute.xlu0 %281 }
  0xb0   :  { %v294_v48 = vsel %vm291_vm7, %v7731_v45, %v282_v47  ;;  %785 = vrot.lane.b32.xlu1 %v7789_v6, %s7522_s30 }
  0xb1   :  { %584 = vmatpush1.msra.mxu0 %v294_v48 }
  0xb2   :  { %v7743_v49 = vpop.permute.xlu1 %258  ;;  %585 = vmatprep.subr.mxu0 %v9787_v0 }
  0xb3   :  { %v261_v50 = vpop.permute.xlu0 %260 }
  0xb4   :  { %v268_v51 = vsel %vm262_vm8, %v7743_v49, %v261_v50  ;;  %837 = vrot.lane.b32.xlu1 %v7830_v16, %s7521_s0 }
  0xb5   :  { %586 = vmatpush1.msra.mxu0 %v268_v51  ;;  %v7946_v51 = vld [vmem:[%s9783_s6 + $0x8] sm:$0xff] }
  0xb6   :  { %v7748_v52 = vpop.permute.xlu1 %250  ;;  %587 = vmatprep.subr.mxu0 %v9787_v0 }
  0xb7   :  { %v253_v53 = vpop.permute.xlu0 %252 }
  0xb8   :  { %v265_v54 = vsel %vm262_vm8, %v7748_v52, %v253_v53  ;;  %777 = vrot.lane.b32.xlu1 %v7798_v7, %s7522_s30  ;;  %v7955_v53 = vld [vmem:[%s9783_s6 + $0x40] sm:$0xff] }
  0xb9   :  { %588 = vmatpush1.msra.mxu0 %v265_v54  ;;  %9804 = vst [vmem:[#allocation9_spill] sm:$0xff] %v7955_v53 }
  0xba   :  { %v431_v55 = vpop.permute.xlu1 %430  ;;  %589 = vmatprep.subr.mxu0 %v9787_v0 }
  0xbb   :  { %v429_v56 = vpop.permute.xlu0 %428  ;;  %v441_v57 = vsel %vm436_vm2, %v431_v55, %v7676_v12  ;;  %590 = vmatpush1.msra.mxu0 %v7482_v58 }
  0xbc   :  { %v440_v59 = vsel %vm436_vm2, %v429_v56, %v431_v55  ;;  %484 = vmatprep.subr.mxu1 %v441_v57  ;;  %591 = vmatprep.subr.mxu0 %v9787_v0 }
  0xbd   :  { %485 = vmatpush1.msra.mxu1 %v440_v59  ;;  %592 = vmatpush1.msra.mxu0 %v7483_v60 }
  0xbe   :  { %v423_v61 = vpop.permute.xlu1 %422  ;;  %621 = vmatprep.subr.mxu0 %v9787_v0  ;;  %829 = vrot.lane.b32.xlu1 %v7817_v13, %s7521_s0 }
  0xbf   :  { %v421_v63 = vpop.permute.xlu0 %420  ;;  %v438_v1 = vsel %vm436_vm2, %v423_v61, %v7681_v15 }
  0xc0   :  { %v437_v2 = vsel %vm436_vm2, %v421_v63, %v423_v61  ;;  %486 = vmatprep.subr.mxu1 %v438_v1 }
  0xc1   :  { %487 = vmatpush1.msra.mxu1 %v437_v2 }
  0xc2   :  { %v7775_v3 = vpop.permute.xlu1 %461  ;;  %757 = vrot.lane.b32.xlu1 %v7789_v6, %s7523_s10 }
  0xc6   :  { %v7779_v4 = vpop.permute.xlu1 %401  ;;  %809 = vrot.lane.b32.xlu1 %v7830_v16, %s7520_s1 }
  0xc7   :  { %v412_v5 = vsel %vm407_vm3, %v7779_v4, %v7689_v19 }
  0xc8   :  { %488 = vmatprep.subr.mxu1 %v412_v5 }
  0xca   :  { %v7840_v19 = vpop.permute.xlu1 %453  ;;  %749 = vrot.lane.b32.xlu1 %v7798_v7, %s7523_s10 }
  0xce   :  { %v7855_v23 = vpop.permute.xlu1 %393 }
  0xcf   :  { %v409_v2 = vsel %vm407_vm3, %v7855_v23, %v7696_v24 }
  0xd2   :  { %v7866_v27 = vpop.permute.xlu1 %372 }
  0xd6   :  { %v134_v10 = vpop.f32.mrf.mxu1  ;;  %v7874_v28 = vpop.permute.xlu1 %364 }
  0xd7   :  { %v7810_v11 = vadd.f32 %v5961_v8, %v134_v10 }
  0xd8   :  { %v6606_v12 = vpop.f32.mrf.mxu1 }
  0xd9   :  { %v138_v14 = vmul.f32 %v7810_v11, %v7810_v11 }
  0xda   :  { %v7878_v29 = vpop.permute.xlu1 %343 }
  0xdb   :  { %v140_v15 = vsel %vm139_vm9, %v138_v14, 0.0 }
  0xdc   :  { %141 = vadd.xlane.f32.xlu0 %v140_v15  ;;  %v380_v15 = vsel %vm378_vm4, %v7874_v28, %v7691_v20 }
  0xde   :  { %v7882_v30 = vpop.permute.xlu1 %335 }
  0xdf   :  { %v351_v20 = vsel %vm349_vm5, %v7882_v30, %v7707_v32 }
  0xe2   :  { %v7888_v31 = vpop.permute.xlu1 %314 }
  0xe6   :  { %v7892_v33 = vpop.permute.xlu1 %306 }
  0xe7   :  { %v322_v32 = vsel %vm320_vm6, %v7892_v33, %v7721_v39 }
  0xea   :  { %v7898_v34 = vpop.permute.xlu1 %285 }
  0xee   :  { %v7902_v35 = vpop.permute.xlu1 %277 }
  0xef   :  { %v293_v39 = vsel %vm291_vm7, %v7902_v35, %v7731_v45 }
  0xf2   :  { %463 = vrot.lane.b32.xlu0 %v7484_v17, %s7526_s20  ;;  %v7908_v37 = vpop.permute.xlu1 %256 }
  0xf6   :  { %399 = vrot.lane.b32.xlu0 %v7845_v21, %s7521_s0  ;;  %v7912_v38 = vpop.permute.xlu1 %248 }
  0xf7   :  { %v264_v45 = vsel %vm262_vm8, %v7912_v38, %v7748_v52 }
  0xfa   :  { %455 = vrot.lane.b32.xlu0 %v7486_v22, %s7526_s20  ;;  %v7916_v40 = vpop.permute.xlu1 %867 }
  0xfe   :  { %391 = vrot.lane.b32.xlu0 %v7862_v26, %s7521_s0  ;;  %v7920_v41 = vpop.permute.xlu1 %859 }
 0x102   :  { %370 = vrot.lane.b32.xlu0 %v7845_v21, %s7520_s1  ;;  %v7929_v44 = vpop.permute.xlu1 %449 }
 0x106   :  { %362 = vrot.lane.b32.xlu0 %v7862_v26, %s7520_s1  ;;  %v7933_v47 = vpop.permute.xlu1 %811 }
 0x10a   :  { %341 = vrot.lane.b32.xlu0 %v7845_v21, %s7522_s30  ;;  %v814_v48 = vpop.permute.xlu1 %813 }
 0x10b   :  { %v7941_v50 = vsel %vm378_vm4, %v7933_v47, %v814_v48 }
 0x10e   :  { %333 = vrot.lane.b32.xlu0 %v7862_v26, %s7522_s30 }
 0x112   :  { %312 = vrot.lane.b32.xlu0 %v7845_v21, %s7523_s10 }
 0x116   :  { %304 = vrot.lane.b32.xlu0 %v7862_v26, %s7523_s10 }
 0x11a   :  { %283 = vrot.lane.b32.xlu0 %v7845_v21, %s7524_s11 }
 0x11e   :  { %275 = vrot.lane.b32.xlu0 %v7862_v26, %s7524_s11 }
 0x122   :  { %254 = vrot.lane.b32.xlu0 %v7845_v21, %s7525_s12 }
 0x126   :  { %246 = vrot.lane.b32.xlu0 %v7862_v26, %s7525_s12 }
 0x12a   :  { %869 = vrot.lane.b32.xlu0 %v7789_v6, %s7519_s23 }
 0x12e   :  { %861 = vrot.lane.b32.xlu0 %v7798_v7, %s7519_s23 }
 0x132   :  { %839 = vrot.lane.b32.xlu0 %v7737_v46, %s7521_s0 }
 0x136   :  { %841 = vrot.lane.b32.xlu0 %v7789_v6, %s7521_s0 }
 0x13a   :  { %459 = vrot.lane.b32.xlu0 %v7925_v43, %s7526_s20 }
 0x13e   :  { %457 = vrot.lane.b32.xlu0 %v7845_v21, %s7526_s20 }
 0x142   :  { %831 = vrot.lane.b32.xlu0 %v7767_v62, %s7521_s0 }
 0x146   :  { %833 = vrot.lane.b32.xlu0 %v7798_v7, %s7521_s0 }
 0x14a   :  { %451 = vrot.lane.b32.xlu0 %v7946_v51, %s7526_s20 }
 0x14e   :  { %865 = vrot.lane.b32.xlu0 %v7830_v16, %s7519_s23 }
 0x152   :  { %855 = vrot.lane.b32.xlu0 %v7955_v53, %s7519_s23 }
 0x156   :  { %775 = vrot.lane.b32.xlu0 %v7767_v62, %s7522_s30 }
 0x15a   :  { %835 = vrot.lane.b32.xlu0 %v7808_v9, %s7521_s0 }
 0x15e   :  { %755 = vrot.lane.b32.xlu0 %v7737_v46, %s7523_s10 }
 0x162   :  { %827 = vrot.lane.b32.xlu0 %v7955_v53, %s7521_s0  ;;  %s7527_s0 = smov 32  }
 0x165   :  { %v142_v54 = vpop.xlane.xlu0 %141 }
 0x166   :  { %v143_v55 = vrot.slane %v142_v54, 4  ;;  %747 = vrot.lane.b32.xlu0 %v7767_v62, %s7523_s10 }
 0x168   :  { %v144_v56 = vadd.f32 %v143_v55, %v142_v54 }
 0x169   :  { %v464_v57 = vpop.permute.xlu0 %463 }
 0x16a   :  { %v145_v58 = vrot.slane %v144_v56, 2  ;;  %v471_v59 = vsel %vm465_vm10, %v7775_v3, %v464_v57 }
 0x16b   :  { %622 = vmatpush2.msra.mxu0 %v471_v59 }
 0x16c   :  { %v146_v60 = vadd.f32 %v145_v58, %v144_v56  ;;  %623 = vmatprep.subr.mxu0 %v9787_v0 }
 0x16d   :  { %v400_v61 = vpop.permute.xlu0 %399 }
 0x16e   :  { %v411_v63 = vsel %vm407_vm3, %v400_v61, %v7779_v4  ;;  %v147_v1 = vrot.slane %v146_v60, 1  ;;  %v383_v4 = vsel %vm378_vm4, %v7866_v27, %v7686_v18  ;;  %v354_v18 = vsel %vm349_vm5, %v7878_v29, %v7698_v25 }
 0x16f   :  { %489 = vmatpush1.msra.mxu1 %v411_v63  ;;  %v325_v25 = vsel %vm320_vm6, %v7888_v31, %v7715_v36  ;;  %v296_v36 = vsel %vm291_vm7, %v7898_v34, %v7726_v42  ;;  %v267_v42 = vsel %vm262_vm8, %v7908_v37, %v7743_v49 }
 0x170   :  { %490 = vmatprep.subr.mxu1 %v409_v2  ;;  %v148_v5 = vadd.f32 %v147_v1, %v146_v60 }
 0x171   :  { %v456_v8 = vpop.permute.xlu0 %455 }
 0x172   :  { %6607 = vpush %v148_v5  ;;  %v468_v10 = vsel %vm465_vm10, %v7840_v19, %v456_v8 }
 0x173   :  { %624 = vmatpush2.msra.mxu0 %v468_v10 }
 0x174   :  { %994 = vmatprep.subr.mxu0 %v9787_v0 }
 0x175   :  { %v392_v12 = vpop.permute.xlu0 %391 }
 0x176   :  { %v408_v14 = vsel %vm407_vm3, %v392_v12, %v7855_v23 }
 0x177   :  { %491 = vmatpush1.msra.mxu1 %v408_v14 }
 0x178   :  { %492 = vmatprep.subr.mxu1 %v383_v4 }
 0x179   :  { %v371_v24 = vpop.permute.xlu0 %370 }
 0x17a   :  { %v382_v17 = vsel %vm378_vm4, %v371_v24, %v7866_v27 }
 0x17b   :  { %493 = vmatpush1.msra.mxu1 %v382_v17 }
 0x17c   :  { %494 = vmatprep.subr.mxu1 %v380_v15 }
 0x17d   :  { %v363_v22 = vpop.permute.xlu0 %362 }
 0x17e   :  { %v379_v23 = vsel %vm378_vm4, %v363_v22, %v7874_v28 }
 0x17f   :  { %495 = vmatpush1.msra.mxu1 %v379_v23 }
 0x180   :  { %496 = vmatprep.subr.mxu1 %v354_v18 }
 0x181   :  { %v342_v48 = vpop.permute.xlu0 %341 }
 0x182   :  { %v353_v27 = vsel %vm349_vm5, %v342_v48, %v7878_v29 }
 0x183   :  { %497 = vmatpush1.msra.mxu1 %v353_v27 }
 0x184   :  { %498 = vmatprep.subr.mxu1 %v351_v20 }
 0x185   :  { %v334_v54 = vpop.permute.xlu0 %333 }
 0x186   :  { %v350_v28 = vsel %vm349_vm5, %v334_v54, %v7882_v30 }
 0x187   :  { %499 = vmatpush1.msra.mxu1 %v350_v28 }
 0x188   :  { %500 = vmatprep.subr.mxu1 %v325_v25 }
 0x189   :  { %v313_v55 = vpop.permute.xlu0 %312 }
 0x18a   :  { %v324_v29 = vsel %vm320_vm6, %v313_v55, %v7888_v31 }
 0x18b   :  { %501 = vmatpush1.msra.mxu1 %v324_v29 }
 0x18c   :  { %502 = vmatprep.subr.mxu1 %v322_v32 }
 0x18d   :  { %v305_v56 = vpop.permute.xlu0 %304 }
 0x18e   :  { %v321_v30 = vsel %vm320_vm6, %v305_v56, %v7892_v33 }
 0x18f   :  { %503 = vmatpush1.msra.mxu1 %v321_v30  ;;  %v195_v30 = vlaneseq }
 0x190   :  { %504 = vmatprep.subr.mxu1 %v296_v36 }
 0x191   :  { %v284_v57 = vpop.permute.xlu0 %283 }
 0x192   :  { %v295_v31 = vsel %vm291_vm7, %v284_v57, %v7898_v34 }
 0x193   :  { %505 = vmatpush1.msra.mxu1 %v295_v31 }
 0x194   :  { %506 = vmatprep.subr.mxu1 %v293_v39  ;;  %v8162_v39 = vshrl.u32 %v195_v30, 7 }
 0x195   :  { %v276_v58 = vpop.permute.xlu0 %275 }
 0x196   :  { %v292_v33 = vsel %vm291_vm7, %v276_v58, %v7902_v35 }
 0x197   :  { %507 = vmatpush1.msra.mxu1 %v292_v33 }
 0x198   :  { %508 = vmatprep.subr.mxu1 %v267_v42  ;;  %v197_v42 = vsub.s32 0, %v8162_v39 }
 0x199   :  { %v255_v59 = vpop.permute.xlu0 %254 }
 0x19a   :  { %v266_v34 = vsel %vm262_vm8, %v255_v59, %v7908_v37 }
 0x19b   :  { %509 = vmatpush1.msra.mxu1 %v266_v34 }
 0x19c   :  { %510 = vmatprep.subr.mxu1 %v264_v45 }
 0x19d   :  { %v247_v60 = vpop.permute.xlu0 %246 }
 0x19e   :  { %v263_v61 = vsel %vm262_vm8, %v247_v60, %v7912_v38 }
 0x19f   :  { %511 = vmatpush1.msra.mxu1 %v263_v61 }
 0x1a0   :  { %512 = vmatprep.subr.mxu1 %v7925_v43 }
 0x1a1   :  { %v8033_v49 = vpop.permute.xlu0 %869  ;;  %513 = vmatpush1.msra.mxu1 %v7845_v21 }
 0x1a2   :  { %514 = vmatprep.subr.mxu1 %v7946_v51 }
 0x1a3   :  { %s6608_s23 = spop %6607  ;;  %515 = vmatpush1.msra.mxu1 %v7862_v26 }
 0x1a4   :  { %v150_v52 = vstv %s6608_s23 }
 0x1a5   :  { %v152_v35 = vmul.f32 0.03125, %v150_v52  ;;  %v8038_v37 = vpop.permute.xlu0 %861  ;;  %v192_v52 = vld [vmem:[%s9780_s3 + $0x8] sm:$0xff] }
 0x1a7   :  { %7472 = vrsqrt.f32 %v152_v35  ;;  %v194_v35 = vld [vmem:[%s9780_s3 + $0x18] sm:$0xff] }
 0x1a9   :  { %v8040_v63 = vpop.permute.xlu0 %839 }
 0x1ad   :  { %v842_v38 = vpop.permute.xlu0 %841 }
 0x1ae   :  { %v8044_v43 = vsel %vm407_vm3, %v8040_v63, %v842_v38 }
 0x1b1   :  { %v460_v1 = vpop.permute.xlu0 %459 }
 0x1b2   :  { %v470_v21 = vsel %vm465_vm10, %v460_v1, %v7775_v3 }
 0x1b3   :  { %544 = vmatprep.subr.mxu1 %v470_v21 }
 0x1b4   :  { %v7473_v51 = vpop.eup %7472 }
 0x1b5   :  { %v8049_v26 = vmul.f32 %v7473_v51, %v7810_v11  ;;  %v458_v2 = vpop.permute.xlu0 %457 }
 0x1b6   :  { %v469_v5 = vsel %vm465_vm10, %v458_v2, %v460_v1 }
 0x1b7   :  { %159 = vrot.lane.b32.xlu1 %v8049_v26, %s7527_s0  ;;  %156 = vrot.lane.b32.xlu0 %v8049_v26, %s7528_s22  ;;  %v202_v34 = vrot.slane %v8049_v26, %v197_v42 }
 0x1b8   :  { %545 = vmatpush2.msra.mxu1 %v469_v5 }
 0x1b9   :  { %v8054_v8 = vpop.permute.xlu0 %831  ;;  %v8179_v2 = vmul.f32 %v202_v34, %v192_v52  ;;  %v8181_v5 = vmul.f32 %v202_v34, %v194_v35 }
 0x1bb   :  { %162 = vrot.lane.b32.xlu1 %v8049_v26, %s7529_s2  ;;  %807 = vrot.lane.b32.xlu0 %v7808_v9, %s7520_s1  ;;  %v208_v30 = vmul.f32 %v8179_v2, %v8179_v2 }
 0x1bd   :  { %v834_v3 = vpop.permute.xlu0 %833 }
 0x1be   :  { %v8061_v11 = vsel %vm407_vm3, %v8054_v8, %v834_v3 }
 0x1bf   :  { %165 = vrot.lane.b32.xlu1 %v8049_v26, %s7530_s24  ;;  %727 = vrot.lane.b32.xlu0 %v7737_v46, %s7524_s11 }
 0x1c1   :  { %v452_v10 = vpop.permute.xlu0 %451 }
 0x1c2   :  { %v466_v12 = vsel %vm465_vm10, %v7929_v44, %v452_v10  ;;  %v467_v4 = vsel %vm465_vm10, %v452_v10, %v7840_v19  ;;  %v8104_v19 = vpop.permute.xlu1 %803 }
 0x1c3   :  { %168 = vrot.lane.b32.xlu1 %v8049_v26, %s7531_s25  ;;  %546 = vmatprep.subr.mxu1 %v467_v4  ;;  %v193_v4 = vld [vmem:[%s9780_s3 + $0x10] sm:$0xff] }
 0x1c4   :  { %547 = vmatpush2.msra.mxu1 %v466_v12  ;;  %799 = vrot.lane.b32.xlu0 %v7955_v53, %s7520_s1  ;;  %v191_v12 = vld [vmem:[%s9780_s3] sm:$0xff] }
 0x1c5   :  { %v8073_v14 = vpop.permute.xlu0 %865 }
 0x1c6   :  { %v875_v24 = vsel %vm436_vm2, %v8073_v14, %v7916_v40  ;;  %v8114_v44 = vpop.permute.xlu1 %805 }
 0x1c7   :  { %171 = vrot.lane.b32.xlu1 %v8049_v26, %s7532_s26  ;;  %917 = vmatprep.subr.mxu1 %v875_v24 }
 0x1c8   :  { %719 = vrot.lane.b32.xlu0 %v7767_v62, %s7524_s11 }
 0x1c9   :  { %v8140_v23 = vpop.permute.xlu0 %855 }
 0x1ca   :  { %v8120_v15 = vpop.permute.xlu1 %863 }
 0x1cb   :  { %174 = vrot.lane.b32.xlu1 %v8049_v26, %s7533_s27 }
 0x1cc   :  { %779 = vrot.lane.b32.xlu0 %v7808_v9, %s7522_s30 }
 0x1cd   :  { %v8144_v20 = vpop.permute.xlu0 %775 }
 0x1ce   :  { %v8126_v17 = vpop.permute.xlu1 %857 }
 0x1cf   :  { %801 = vrot.lane.b32.xlu1 %v7817_v13, %s7520_s1 }
 0x1d0   :  { %699 = vrot.lane.b32.xlu0 %v7737_v46, %s7525_s12 }
 0x1d1   :  { %v8148_v54 = vpop.permute.xlu0 %835 }
 0x1d2   :  { %v8130_v22 = vpop.permute.xlu1 %783 }
 0x1d3   :  { %729 = vrot.lane.b32.xlu1 %v7789_v6, %s7524_s11 }
 0x1d4   :  { %771 = vrot.lane.b32.xlu0 %v7955_v53, %s7522_s30 }
 0x1d7   :  { %781 = vrot.lane.b32.xlu1 %v7830_v16, %s7522_s30 }
 0x1d8   :  { %691 = vrot.lane.b32.xlu0 %v7767_v62, %s7525_s12 }
 0x1db   :  { %721 = vrot.lane.b32.xlu1 %v7798_v7, %s7524_s11 }
 0x1dc   :  { %751 = vrot.lane.b32.xlu0 %v7808_v9, %s7523_s10 }
 0x1df   :  { %773 = vrot.lane.b32.xlu1 %v7817_v13, %s7522_s30 }
 0x1e0   :  { %743 = vrot.lane.b32.xlu0 %v7955_v53, %s7523_s10 }
 0x1e3   :  { %701 = vrot.lane.b32.xlu1 %v7789_v6, %s7525_s12 }
 0x1e4   :  { %723 = vrot.lane.b32.xlu0 %v7808_v9, %s7524_s11 }
 0x1e7   :  { %753 = vrot.lane.b32.xlu1 %v7830_v16, %s7523_s10 }
 0x1e8   :  { %715 = vrot.lane.b32.xlu0 %v7955_v53, %s7524_s11 }
 0x1eb   :  { %693 = vrot.lane.b32.xlu1 %v7798_v7, %s7525_s12 }
 0x1ec   :  { %897 = vrot.lane.b32.xlu0 %v7789_v6, %s7526_s20  ;;  %v8136_v6 = vpop.permute.xlu1 %785 }
 0x1ef   :  { %745 = vrot.lane.b32.xlu1 %v7817_v13, %s7523_s10 }
 0x1f0   :  { %v8138_v18 = vpop.permute.xlu1 %837 }
 0x1f3   :  { %725 = vrot.lane.b32.xlu1 %v7830_v16, %s7524_s11 }
 0x1f4   :  { %v8142_v48 = vpop.permute.xlu1 %777 }
 0x1f7   :  { %717 = vrot.lane.b32.xlu1 %v7817_v13, %s7524_s11 }
 0x1f8   :  { %v8146_v27 = vpop.permute.xlu1 %829 }
 0x1fb   :  { %895 = vrot.lane.b32.xlu1 %v7737_v46, %s7526_s20  ;;  %v8152_v46 = vpop.permute.xlu0 %755 }
 0x1fc   :  { %v8150_v25 = vpop.permute.xlu1 %757 }
 0x1ff   :  { %697 = vrot.lane.b32.xlu1 %v7830_v16, %s7525_s12  ;;  %v8156_v55 = vpop.permute.xlu0 %827 }
 0x200   :  { %v8154_v28 = vpop.permute.xlu1 %809 }
 0x203   :  { %v8160_v29 = vpop.permute.xlu0 %747 }
 0x204   :  { %v8158_v32 = vpop.permute.xlu1 %749 }
 0x205   :  { %9805 = vst [vmem:[#allocation10_spill] sm:$0xff] %v8158_v32 }
 0x229   :  { %v160_v56 = vpop.permute.xlu1 %159  ;;  %v157_v36 = vpop.permute.xlu0 %156 }
 0x22a   :  { %v178_v45 = vsel %vm177_vm11, %v8049_v26, %v157_v36  ;;  %v210_v36 = vmul.f32 %v8181_v5, %v8181_v5 }
 0x22b   :  { %v179_v60 = vsel %vm58_vm1, %v178_v45, %v160_v56 }
 0x22d   :  { %v163_v57 = vpop.permute.xlu1 %162  ;;  %v8164_v31 = vpop.permute.xlu0 %807 }
 0x22e   :  { %v181_v38 = vsel %vm180_vm12, %v179_v60, %v163_v57 }
 0x231   :  { %v166_v58 = vpop.permute.xlu1 %165  ;;  %v8167_v59 = vpop.permute.xlu0 %727 }
 0x232   :  { %v183_v1 = vsel %vm182_vm13, %v181_v38, %v166_v58  ;;  %v211_v38 = vsel %vm177_vm11, %v208_v30, 0.0 }
 0x235   :  { %v169_v33 = vpop.permute.xlu1 %168 }
 0x236   :  { %v800_v21 = vpop.permute.xlu0 %799  ;;  %v185_v51 = vsel %vm184_vm14, %v183_v1, %v169_v33 }
 0x239   :  { %v172_v61 = vpop.permute.xlu1 %171 }
 0x23a   :  { %v187_v3 = vsel %vm186_vm15, %v185_v51, %v172_v61  ;;  %v8199_v45 = vpop.permute.xlu0 %719  ;;  %v215_v61 = vsel %vm177_vm11, %v210_v36, 0.0 }
 0x23d   :  { %v175_v10 = vpop.permute.xlu1 %174 }
 0x23e   :  { %v189_v24 = vsel %vm188_vm0, %v187_v3, %v175_v10 }
 0x23f   :  { %v198_v56 = vrot.slane %v189_v24, %v197_v42 }
 0x241   :  { %v8193_v57 = vmul.f32 %v198_v56, %v191_v12  ;;  %v8195_v58 = vmul.f32 %v198_v56, %v193_v4  ;;  %v8197_v33 = vpop.permute.xlu1 %801 }
 0x242   :  { %v8203_v34 = vsel %vm378_vm4, %v800_v21, %v8197_v33  ;;  %v780_v21 = vpop.permute.xlu0 %779 }
 0x243   :  { %v209_v42 = vmul.f32 %v8195_v58, %v8195_v58  ;;  %v207_v60 = vmul.f32 %v8193_v57, %v8193_v57 }
 0x245   :  { %v730_v1 = vpop.permute.xlu1 %729  ;;  %v216_v51 = vadd.f32 %v215_v61, %v209_v42  ;;  %v212_v3 = vadd.f32 %v211_v38, %v207_v60 }
 0x246   :  { %v8213_v10 = vsel %vm291_vm7, %v8167_v59, %v730_v1  ;;  %v8227_v60 = vpop.permute.xlu0 %699 }
 0x247   :  { %217 = vadd.xlane.f32.xlu0 %v216_v51  ;;  %213 = vadd.xlane.f32.xlu1 %v212_v3 }
 0x249   :  { %v8215_v56 = vpop.permute.xlu1 %781 }
 0x24a   :  { %v8219_v0 = vsel %vm349_vm5, %v780_v21, %v8215_v56 }
 0x24d   :  { %v722_v32 = vpop.permute.xlu1 %721 }
 0x24e   :  { %v8223_v36 = vsel %vm291_vm7, %v8199_v45, %v722_v32  ;;  %v638_v32 = vsub.s32 1, %v8162_v39 }
 0x250   :  { %v643_v38 = vrot.slane %v8049_v26, %v638_v32  ;;  %v639_v1 = vrot.slane %v189_v24, %v638_v32  ;;  %v1070_v24 = vld [vmem:[%s9781_s4 + $0x8] sm:$0xff]  ;;  %v1071_v32 = vld [vmem:[%s9781_s4 + $0x10] sm:$0xff] }
 0x251   :  { %v8225_v30 = vpop.permute.xlu1 %773 }
 0x252   :  { %v8243_v51 = vmul.f32 %v643_v38, %v192_v52  ;;  %v8245_v3 = vmul.f32 %v643_v38, %v194_v35  ;;  %v8247_v21 = vmul.f32 %v639_v1, %v191_v12  ;;  %v8282_v38 = vpop.permute.xlu0 %771 }
 0x254   :  { %9807 = vst [vmem:[#allocation12_spill] sm:$0xff] %v8243_v51  ;;  %9808 = vst [vmem:[#allocation13_spill] sm:$0xff] %v8245_v3  ;;  %v648_v26 = vmul.f32 %v8247_v21, %v8247_v21 }
 0x255   :  { %v702_v42 = vpop.permute.xlu1 %701  ;;  %9809 = vst [vmem:[#allocation14_spill] sm:$0xff] %v8247_v21 }
 0x256   :  { %v8231_v61 = vsel %vm262_vm8, %v8227_v60, %v702_v42  ;;  %v651_v42 = vmul.f32 %v8245_v3, %v8245_v3 }
 0x257   :  { %9806 = vst [vmem:[#allocation11_spill] sm:$0xff] %v8231_v61  ;;  %v649_v61 = vmul.f32 %v8243_v51, %v8243_v51 }
 0x258   :  { %887 = vrot.lane.b32.xlu1 %v7767_v62, %s7526_s20  ;;  %v8249_v62 = vmul.f32 %v639_v1, %v193_v4  ;;  %v656_v39 = vsel %vm177_vm11, %v651_v42, 0.0  ;;  %v1069_v4 = vld [vmem:[%s9781_s4] sm:$0xff]  ;;  %v1072_v1 = vld [vmem:[%s9781_s4 + $0x18] sm:$0xff] }
 0x259   :  { %v652_v52 = vsel %vm177_vm11, %v649_v61, 0.0  ;;  %v9789_v61 = vmov 0   ;;  %v8287_v42 = vpop.permute.xlu1 %753 }
 0x25a   :  { %9810 = vst [vmem:[#allocation15_spill] sm:$0xff] %v8249_v62  ;;  %v653_v12 = vadd.f32 %v652_v52, %v648_v26  ;;  %6630 = vset.pattern.permute.xlu1 %v9789_v61  ;;  %6631 = vset.pattern.permute.xlu0 %v9789_v61 }
 0x25c   :  { %689 = vrot.lane.b32.xlu1 %v7817_v13, %s7525_s12 }
 0x25d   :  { %695 = vrot.lane.b32.xlu0 %v7808_v9, %s7525_s12  ;;  %v8291_v26 = vpop.permute.xlu1 %693 }
 0x25e   :  { %9812 = vst [vmem:[#allocation17_spill] sm:$0xff] %v8291_v26 }
 0x261   :  { %889 = vrot.lane.b32.xlu0 %v7798_v7, %s7526_s20  ;;  %v650_v7 = vmul.f32 %v8249_v62, %v8249_v62  ;;  %v8295_v52 = vpop.permute.xlu1 %745 }
 0x263   :  { %v657_v35 = vadd.f32 %v656_v39, %v650_v7  ;;  %v8289_v7 = vpop.permute.xlu0 %691 }
 0x264   :  { %9811 = vst [vmem:[#allocation16_spill] sm:$0xff] %v8289_v7 }
 0x267   :  { %v8293_v39 = vpop.permute.xlu0 %751 }
 0x280   :  { %658 = vadd.xlane.f32.xlu0 %v657_v35  ;;  %654 = vadd.xlane.f32.xlu1 %v653_v12  ;;  %v8297_v35 = vpop.permute.xlu0 %743  ;;  %v8299_v12 = vpop.permute.xlu1 %725 }
 0x291   :  { %893 = vrot.lane.b32.xlu1 %v7830_v16, %s7526_s20 }
 0x295   :  { %885 = vrot.lane.b32.xlu1 %v7817_v13, %s7526_s20  ;;  %v8316_v13 = vstv %s9782_s5 }
 0x296   :  { %687 = vrot.lane.b32.xlu0 %v7955_v53, %s7525_s12 }
 0x299   :  { %1075 = vperm.xlu1 %6630, %v1069_v4   ;;  %v8301_v4 = vpop.permute.xlu1 %717 }
 0x29a   :  { %891 = vrot.lane.b32.xlu0 %v7808_v9, %s7526_s20 }
 0x29d   :  { %1085 = vperm.xlu1 %6630, %v1071_v32   ;;  %v8305_v32 = vpop.permute.xlu1 %895 }
 0x29e   :  { %883 = vrot.lane.b32.xlu0 %v7955_v53, %s7526_s20  ;;  %9813 = vst [vmem:[#allocation18_spill] sm:$0xff] %v8305_v32 }
 0x2a1   :  { %1090 = vperm.xlu1 %6630, %v1072_v1   ;;  %v8309_v1 = vpop.permute.xlu1 %697 }
 0x2a2   :  { %1080 = vperm.xlu0 %6631, %v1070_v24   ;;  %v8303_v24 = vpop.permute.xlu0 %723 }
 0x2a6   :  { %v8307_v61 = vpop.permute.xlu0 %715 }
 0x2aa   :  { %v8311_v62 = vpop.permute.xlu0 %897 }
 0x2ab   :  { %9814 = vst [vmem:[#allocation19_spill] sm:$0xff] %v8311_v62 }
 0x2d0   :  { %v214_v3 = vpop.xlane.xlu1 %213  ;;  %v218_v51 = vpop.xlane.xlu0 %217 }
 0x2d1   :  { %v219_v21 = vadd.f32 1e-08, %v214_v3  ;;  %v220_v53 = vadd.f32 1e-08, %v218_v51  ;;  %v874_v51 = vsel %vm436_vm2, %v8120_v15, %v8073_v14  ;;  %v9815_v14 = vmov 0.0  }
 0x2d2   :  { %v847_v15 = vsel %vm407_vm3, %v8138_v18, %v8040_v63  ;;  %v843_v63 = vsel %vm407_vm3, %v8156_v55, %v8146_v27  ;;  %v732_v55 = vsel %vm291_vm7, %v8301_v4, %v8199_v45  ;;  %v9819_v45 = vld [vmem:[#allocation17_spill] sm:$0xff] }
 0x2d3   :  { %7474 = vrsqrt.f32 %v219_v21  ;;  %v6658_v21 = vld [vmem:[%s9784_s7 + $0xa14] ss:$56 sps:$4 sm:$0xff]  }
 0x2d4   :  { %7476 = vrsqrt.f32 %v220_v53  ;;  %v876_v53 = vsel %vm436_vm2, %v7916_v40, %v8033_v49  ;;  %v873_v40 = vsel %vm436_vm2, %v7920_v41, %v8038_v37  ;;  %v871_v49 = vsel %vm436_vm2, %v8140_v23, %v8126_v17  ;;  %v8403_v23 = vpop.permute.xlu1 %887 }
 0x2d5   :  { %v844_v37 = vsel %vm407_vm3, %v8146_v27, %v8054_v8  ;;  %v816_v8 = vsel %vm378_vm4, %v8197_v33, %v8104_v19 }
 0x2e0   :  { %v7475_v9 = vpop.eup %7474 }
 0x2e1   :  { %v7477_v16 = vpop.eup %7476  ;;  %v224_v32 = vmul.f32 %v7475_v9, %v8316_v13 }
 0x2e2   :  { %v225_v26 = vmul.f32 %v7477_v16, %v8316_v13  ;;  %v872_v16 = vsel %vm436_vm2, %v8126_v17, %v7920_v41  ;;  %v846_v41 = vsel %vm407_vm3, %v8148_v54, %v8138_v18  ;;  %v819_v17 = vsel %vm378_vm4, %v8154_v28, %v7933_v47 }
 0x2e3   :  { %v227_v7 = vmul.f32 %v224_v32, %v8179_v2  ;;  %v226_v62 = vmul.f32 %v224_v32, %v8193_v57  ;;  %v791_v47 = vsel %vm349_vm5, %v8215_v56, %v8130_v22  ;;  %v787_v18 = vsel %vm349_vm5, %v8282_v38, %v8225_v30  ;;  %v9817_v57 = vld [vmem:[#allocation11_spill] sm:$0xff]  ;;  %v7490_v56 = vld [vmem:[%s9783_s6 + $0x70] sm:$0xff] }
 0x2e4   :  { %v229_v9 = vmul.f32 %v225_v26, %v8181_v5  ;;  %v228_v2 = vmul.f32 %v225_v26, %v8195_v58  ;;  %v759_v54 = vsel %vm320_vm6, %v8297_v35, %v8295_v52  ;;  %v9818_v58 = vld [vmem:[#allocation16_spill] sm:$0xff]  ;;  %v9824_v32 = vld [vmem:[#allocation7_spill] sm:$0xff] }
 0x2e5   :  { %5965 = vmatprep.mubr.msk.f32.mxu1 %vm177_vm11, %v227_v7  ;;  %5967 = vmatprep.mubr.msk.f32.mxu0 %vm177_vm11, %v227_v7  ;;  %v9822_v35 = vld [vmem:[#allocation8_spill] sm:$0xff] }
 0x2e6   :  { %549 = vmatmul.mubr.f32.vlgmr.msra.gmra.mxu1 %v226_v62  ;;  %626 = vmatmul.mubr.f32.vlgmr.msra.gmra.mxu0 %v226_v62 }
 0x2e7   :  { %918 = vmatpush1.msra.mxu1 %v874_v51  ;;  %995 = vmatpush1.msra.mxu0 %v876_v53  ;;  %v9825_v53 = vld [vmem:[#allocation9_spill] sm:$0xff] }
 0x2e8   :  { %5966 = vmatprep.mubr.msk.f32.mxu1 %vm177_vm11, %v229_v9  ;;  %5968 = vmatprep.mubr.msk.f32.mxu0 %vm177_vm11, %v229_v9  ;;  %v6634_v9 = vld [vmem:[%s9784_s7 + $0x314] ss:$56 sps:$4 sm:$0xff]  }
 0x2e9   :  { %919 = vmatprep.subr.mxu1 %v872_v16  ;;  %996 = vmatprep.subr.mxu0 %v9815_v14 }
 0x2ea   :  { %920 = vmatpush1.msra.mxu1 %v871_v49  ;;  %997 = vmatpush1.msra.mxu0 %v873_v40 }
 0x2eb   :  { %921 = vmatprep.subr.mxu1 %v847_v15  ;;  %998 = vmatprep.subr.mxu0 %v9815_v14 }
 0x2ec   :  { %555 = vmatmul.mubr.f32.gmra.mxu1 %v228_v2  ;;  %631 = vmatmul.mubr.f32.gmra.mxu0 %v228_v2 }
 0x2ed   :  { %922 = vmatpush1.msra.mxu1 %v846_v41  ;;  %999 = vmatpush1.msra.mxu0 %v8044_v43  ;;  %v818_v43 = vsel %vm378_vm4, %v8164_v31, %v8154_v28  ;;  %v696_v28 = vpop.permute.xlu0 %695  ;;  %v690_v31 = vpop.permute.xlu1 %689 }
 0x2ee   :  { %923 = vmatprep.subr.mxu1 %v844_v37  ;;  %1000 = vmatprep.subr.mxu0 %v9815_v14  ;;  %v706_v5 = vsel %vm262_vm8, %v696_v28, %v8309_v1  ;;  %v704_v33 = vsel %vm262_vm8, %v690_v31, %v9818_v58  ;;  %v9826_v37 = vld [vmem:[#allocation14_spill] sm:$0xff] }
 0x2ef   :  { %924 = vmatpush1.msra.mxu1 %v843_v63  ;;  %1001 = vmatpush1.msra.mxu0 %v8061_v11  ;;  %v817_v11 = vsel %vm378_vm4, %v8104_v19, %v8114_v44  ;;  %v788_v19 = vsel %vm349_vm5, %v8225_v30, %v8144_v20  ;;  %v789_v44 = vsel %vm349_vm5, %v8144_v20, %v8142_v48  ;;  %v9816_v20 = vld [vmem:[#allocation10_spill] sm:$0xff]  ;;  %v9820_v30 = vld [vmem:[#allocation19_spill] sm:$0xff] }
 0x2f0   :  { %925 = vmatprep.subr.mxu1 %v819_v17  ;;  %1002 = vmatprep.subr.mxu0 %v9815_v14  ;;  %v760_v48 = vsel %vm320_vm6, %v8295_v52, %v8160_v29  ;;  %v761_v27 = vsel %vm320_vm6, %v8160_v29, %v9816_v20  ;;  %v731_v29 = vsel %vm291_vm7, %v8307_v61, %v8301_v4  ;;  %v9827_v17 = vld [vmem:[#allocation12_spill] sm:$0xff]  ;;  %v6674_v28 = vld [vmem:[%s9784_s7 + $0x8c0] ss:$56 sps:$4 sm:$0xff]  }
 0x2f1   :  { %926 = vmatpush1.msra.mxu1 %v818_v43  ;;  %1003 = vmatpush1.msra.mxu0 %v7941_v50  ;;  %v792_v50 = vsel %vm349_vm5, %v8130_v22, %v8136_v6  ;;  %v764_v22 = vsel %vm320_vm6, %v8152_v46, %v8150_v25  ;;  %v762_v6 = vsel %vm320_vm6, %v8293_v39, %v8287_v42  ;;  %v6638_v20 = vld [vmem:[%s9784_s7 + $0x230] ss:$56 sps:$4 sm:$0xff]  }
 0x2f2   :  { %927 = vmatprep.subr.mxu1 %v816_v8  ;;  %1004 = vmatprep.subr.mxu0 %v9815_v14  ;;  %v735_v25 = vsel %vm291_vm7, %v8299_v12, %v8167_v59  ;;  %v707_v59 = vsel %vm262_vm8, %v8309_v1, %v8227_v60  ;;  %v9821_v60 = vld [vmem:[#allocation18_spill] sm:$0xff]  ;;  %v6632_v8 = vld [vmem:[%s9784_s7 + $0x310] ss:$56 sps:$4 sm:$0xff]  }
 0x2f3   :  { %928 = vmatpush1.msra.mxu1 %v8203_v34  ;;  %1005 = vmatpush1.msra.mxu0 %v817_v11  ;;  %v705_v34 = vsel %vm262_vm8, %v9818_v58, %v9819_v45  ;;  %v904_v3 = vsel %vm465_vm10, %v9821_v60, %v9820_v30  ;;  %v6656_v11 = vld [vmem:[%s9784_s7 + $0xa10] ss:$56 sps:$4 sm:$0xff]   ;;  %v6647_v58 = vld [vmem:[%s9784_s7 + $0xe0] ss:$56 sps:$4 sm:$0xff]   ;;  %v6652_v45 = vld [vmem:[%s9784_s7 + $0x74] ss:$56 sps:$4 sm:$0xff]  }
 0x2f4   :  { %929 = vmatprep.subr.mxu1 %v791_v47  ;;  %1006 = vmatprep.subr.mxu0 %v9815_v14  ;;  %v9828_v47 = vld [vmem:[#allocation13_spill] sm:$0xff] }
 0x2f5   :  { %930 = vmatpush1.msra.mxu1 %v8219_v0  ;;  %1007 = vmatpush1.msra.mxu0 %v792_v50  ;;  %v763_v0 = vsel %vm320_vm6, %v8287_v42, %v8152_v46  ;;  %v734_v46 = vsel %vm291_vm7, %v8303_v24, %v8299_v12  ;;  %v9823_v12 = vld [vmem:[#allocation6_spill] sm:$0xff] }
 0x2f6   :  { %931 = vmatprep.subr.mxu1 %v788_v19  ;;  %1008 = vmatprep.subr.mxu0 %v9815_v14  ;;  %v6664_v19 = vld [vmem:[%s9784_s7 + $0x9a4] ss:$56 sps:$4 sm:$0xff]  }
 0x2f7   :  { %932 = vmatpush1.msra.mxu1 %v787_v18  ;;  %1009 = vmatpush1.msra.mxu0 %v789_v44  ;;  %v9829_v44 = vld [vmem:[#allocation15_spill] sm:$0xff]  ;;  %v6700_v30 = vld [vmem:[%s9784_s7 + $0x704] ss:$56 sps:$4 sm:$0xff]  }
 0x2f8   :  { %933 = vmatprep.subr.mxu1 %v763_v0  ;;  %1010 = vmatprep.subr.mxu0 %v9815_v14  ;;  %v6635_v0 = vld [vmem:[%s9784_s7 + $0x2a0] ss:$56 sps:$4 sm:$0xff]  }
 0x2f9   :  { %934 = vmatpush1.msra.mxu1 %v762_v6  ;;  %1011 = vmatpush1.msra.mxu0 %v764_v22  ;;  %v6662_v22 = vld [vmem:[%s9784_s7 + $0x9a0] ss:$56 sps:$4 sm:$0xff]   ;;  %v6640_v6 = vld [vmem:[%s9784_s7 + $0x234] ss:$56 sps:$4 sm:$0xff]  }
 0x2fa   :  { %935 = vmatprep.subr.mxu1 %v760_v48  ;;  %1012 = vmatprep.subr.mxu0 %v9815_v14  ;;  %v9830_v48 = vmov 0  }
 0x2fb   :  { %936 = vmatpush1.msra.mxu1 %v759_v54  ;;  %1013 = vmatpush1.msra.mxu0 %v761_v27  ;;  %v6668_v27 = vld [vmem:[%s9784_s7 + $0x930] ss:$56 sps:$4 sm:$0xff]   ;;  %v6643_v54 = vld [vmem:[%s9784_s7 + $0x1c4] ss:$56 sps:$4 sm:$0xff]  }
 0x2fc   :  { %937 = vmatprep.subr.mxu1 %v735_v25  ;;  %1014 = vmatprep.subr.mxu0 %v9815_v14  ;;  %v6676_v25 = vld [vmem:[%s9784_s7 + $0x8c4] ss:$56 sps:$4 sm:$0xff]  }
 0x2fd   :  { %938 = vmatpush1.msra.mxu1 %v734_v46  ;;  %1015 = vmatpush1.msra.mxu0 %v8213_v10  ;;  %v890_v10 = vpop.permute.xlu0 %889  ;;  %v6641_v46 = vld [vmem:[%s9784_s7 + $0x1c0] ss:$56 sps:$4 sm:$0xff]  }
 0x2fe   :  { %939 = vmatprep.subr.mxu1 %v732_v55  ;;  %1016 = vmatprep.subr.mxu0 %v9815_v14  ;;  %v901_v38 = vsel %vm465_vm10, %v8403_v23, %v890_v10  ;;  %v6646_v55 = vld [vmem:[%s9784_s7 + $0x154] ss:$56 sps:$4 sm:$0xff]   ;;  %v6650_v10 = vld [vmem:[%s9784_s7 + $0x70] ss:$56 sps:$4 sm:$0xff]  }
 0x2ff   :  { %940 = vmatpush1.msra.mxu1 %v731_v29  ;;  %1017 = vmatpush1.msra.mxu0 %v8223_v36  ;;  %v7491_v36 = vld [vmem:[%s9783_s6 + $0x50] sm:$0xff] }
 0x300   :  { %941 = vmatprep.subr.mxu1 %v707_v59  ;;  %1018 = vmatprep.subr.mxu0 %v9815_v14  ;;  %v6682_v29 = vld [vmem:[%s9784_s7 + $0x854] ss:$56 sps:$4 sm:$0xff]   ;;  %v6680_v59 = vld [vmem:[%s9784_s7 + $0x850] ss:$56 sps:$4 sm:$0xff]  }
 0x301   :  { %942 = vmatpush1.msra.mxu1 %v706_v5  ;;  %1019 = vmatpush1.msra.mxu0 %v9817_v57  ;;  %v6649_v5 = vld [vmem:[%s9784_s7 + $0xe4] ss:$56 sps:$4 sm:$0xff]  }
 0x302   :  { %943 = vmatprep.subr.mxu1 %v704_v33  ;;  %1020 = vmatprep.subr.mxu0 %v9815_v14  ;;  %v6688_v57 = vld [vmem:[%s9784_s7 + $0x7e4] ss:$56 sps:$4 sm:$0xff]   ;;  %v6686_v33 = vld [vmem:[%s9784_s7 + $0x7e0] ss:$56 sps:$4 sm:$0xff]  }
 0x303   :  { %1021 = vmatpush1.msra.mxu0 %v705_v34  ;;  %v6694_v34 = vld [vmem:[%s9784_s7 + $0x774] ss:$56 sps:$4 sm:$0xff]  }
 0x304   :  { %1022 = vmatprep.subr.mxu0 %v9815_v14 }
 0x305   :  { %1023 = vmatpush1.msra.mxu0 %v7490_v56  ;;  %v6692_v56 = vld [vmem:[%s9784_s7 + $0x770] ss:$56 sps:$4 sm:$0xff]  }
 0x306   :  { %1024 = vmatprep.subr.mxu0 %v9815_v14 }
 0x307   :  { %1025 = vmatpush1.msra.mxu0 %v7491_v36  ;;  %v6655_v36 = vld [vmem:[%s9784_s7 + $0x4] ss:$56 sps:$4 sm:$0xff]  }
 0x308   :  { %1054 = vmatprep.subr.mxu0 %v9815_v14 }
 0x309   :  { %1055 = vmatpush2.msra.mxu0 %v904_v3  ;;  %v655_v62 = vpop.xlane.xlu1 %654  ;;  %v659_v61 = vpop.xlane.xlu0 %658  ;;  %v6698_v3 = vld [vmem:[%s9784_s7 + $0x700] ss:$56 sps:$4 sm:$0xff]  }
 0x30a   :  { %1056 = vmatprep.subr.mxu0 %v9815_v14  ;;  %v660_v42 = vadd.f32 1e-08, %v655_v62  ;;  %v661_v7 = vadd.f32 1e-08, %v659_v61  ;;  %v6706_v62 = vld [vmem:[%s9784_s7 + $0x31c] ss:$56 sps:$4 sm:$0xff]  }
 0x30b   :  { %1057 = vmatpush2.msra.mxu0 %v901_v38  ;;  %v6659_v61 = vld [vmem:[%s9784_s7 + $0x690] ss:$56 sps:$4 sm:$0xff]   ;;  %v6667_v38 = vld [vmem:[%s9784_s7 + $0x624] ss:$56 sps:$4 sm:$0xff]  }
 0x30c   :  { %7478 = vrsqrt.f32 %v660_v42  ;;  %3180 = vmatprep.subr.bf16.mxu0 %v6658_v21  ;;  %v6661_v21 = vld [vmem:[%s9784_s7 + $0x694] ss:$56 sps:$4 sm:$0xff]   ;;  %v6665_v42 = vld [vmem:[%s9784_s7 + $0x620] ss:$56 sps:$4 sm:$0xff]  }
 0x30d   :  { %7480 = vrsqrt.f32 %v661_v7  ;;  %v894_v26 = vpop.permute.xlu1 %893  ;;  %v688_v39 = vpop.permute.xlu0 %687  ;;  %v6673_v7 = vld [vmem:[%s9784_s7 + $0x5b4] ss:$56 sps:$4 sm:$0xff]  }
 0x30e   :  { %v703_v52 = vsel %vm262_vm8, %v688_v39, %v690_v31  ;;  %v903_v51 = vsel %vm465_vm10, %v894_v26, %v9821_v60  ;;  %v6644_v31 = vld [vmem:[%s9784_s7 + $0x150] ss:$56 sps:$4 sm:$0xff]   ;;  %v6653_v60 = vld [vmem:[%s9784_s7] ss:$56 sps:$4 sm:$0xff]   ;;  %v6679_v39 = vld [vmem:[%s9784_s7 + $0x544] ss:$56 sps:$4 sm:$0xff]  }
 0x30f   :  { %944 = vmatpush1.msra.mxu1 %v703_v52  ;;  %v6677_v52 = vld [vmem:[%s9784_s7 + $0x540] ss:$56 sps:$4 sm:$0xff]  }
 0x310   :  { %945 = vmatprep.subr.mxu1 %v9822_v35  ;;  %v6685_v35 = vld [vmem:[%s9784_s7 + $0x4d4] ss:$56 sps:$4 sm:$0xff]  }
 0x311   :  { %946 = vmatpush1.msra.mxu1 %v9823_v12  ;;  %v892_v4 = vpop.permute.xlu0 %891  ;;  %v886_v24 = vpop.permute.xlu1 %885  ;;  %v6683_v12 = vld [vmem:[%s9784_s7 + $0x4d0] ss:$56 sps:$4 sm:$0xff]  }
 0x312   :  { %947 = vmatprep.subr.mxu1 %v9824_v32  ;;  %v902_v1 = vsel %vm465_vm10, %v892_v4, %v894_v26  ;;  %v900_v16 = vsel %vm465_vm10, %v886_v24, %v8403_v23  ;;  %v6670_v23 = vld [vmem:[%s9784_s7 + $0x934] ss:$56 sps:$4 sm:$0xff]   ;;  %v6671_v26 = vld [vmem:[%s9784_s7 + $0x5b0] ss:$56 sps:$4 sm:$0xff]   ;;  %v6691_v4 = vld [vmem:[%s9784_s7 + $0x464] ss:$56 sps:$4 sm:$0xff]  }
 0x313   :  { %948 = vmatpush1.msra.mxu1 %v9825_v53  ;;  %v6697_v32 = vld [vmem:[%s9784_s7 + $0x3f4] ss:$56 sps:$4 sm:$0xff]   ;;  %v6703_v53 = vld [vmem:[%s9784_s7 + $0x384] ss:$56 sps:$4 sm:$0xff]  }
 0x314   :  { %977 = vmatprep.subr.mxu1 %v903_v51  ;;  %v6701_v51 = vld [vmem:[%s9784_s7 + $0x380] ss:$56 sps:$4 sm:$0xff]  }
 0x315   :  { %978 = vmatpush2.msra.mxu1 %v902_v1  ;;  %v884_v40 = vpop.permute.xlu0 %883  ;;  %v6695_v1 = vld [vmem:[%s9784_s7 + $0x3f0] ss:$56 sps:$4 sm:$0xff]  }
 0x316   :  { %979 = vmatprep.subr.mxu1 %v900_v16  ;;  %v899_v49 = vsel %vm465_vm10, %v884_v40, %v886_v24  ;;  %v6689_v24 = vld [vmem:[%s9784_s7 + $0x460] ss:$56 sps:$4 sm:$0xff]  }
 0x317   :  { %980 = vmatpush2.msra.mxu1 %v899_v49 }
 0x318   :  { %3127 = vmatprep.subr.bf16.mxu1 %v6634_v9  ;;  %v6733_v9 = vld [vmem:[%s9784_s7 + $0xa1c] ss:$56 sps:$4 sm:$0xff]  }
 0x319   :  { %v7479_v14 = vpop.eup %7478 }
 0x31a   :  { %v7481_v15 = vpop.eup %7480  ;;  %v664_v2 = vmul.f32 %v7479_v14, %v8316_v13 }
 0x31b   :  { %v665_v41 = vmul.f32 %v7481_v15, %v8316_v13  ;;  %v6637_v13 = vld [vmem:[%s9784_s7 + $0x2a4] ss:$56 sps:$4 sm:$0xff]  }
 0x31c   :  { %v666_v63 = vmul.f32 %v664_v2, %v9826_v37  ;;  %v667_v43 = vmul.f32 %v664_v2, %v9827_v17  ;;  %v1076_v2 = vpop.permute.xlu1 %1075 }
 0x31d   :  { %v669_v50 = vmul.f32 %v665_v41, %v9828_v47  ;;  %v668_v18 = vmul.f32 %v665_v41, %v9829_v44  ;;  %v1081_v15 = vpop.permute.xlu0 %1080  ;;  %v6704_v47 = vld [vmem:[%s9784_s7 + $0x318] ss:$56 sps:$4 sm:$0xff]   ;;  %v6709_v44 = vld [vmem:[%s9784_s7 + $0x2ac] ss:$56 sps:$4 sm:$0xff]  }
 0x31e   :  { %5977 = vmatprep.mubr.msk.f32.mxu1 %vm177_vm11, %v667_v43  ;;  %5979 = vmatprep.mubr.msk.f32.mxu0 %vm177_vm11, %v667_v43 }
 0x31f   :  { %982 = vmatmul.mubr.f32.vlgmr.msra.gmra.mxu1 %v666_v63  ;;  %1059 = vmatmul.mubr.f32.vlgmr.msra.gmra.mxu0 %v666_v63 }
 0x320   :  { %5978 = vmatprep.mubr.msk.f32.mxu1 %vm177_vm11, %v669_v50  ;;  %5980 = vmatprep.mubr.msk.f32.mxu0 %vm177_vm11, %v669_v50 }
 0x321   :  { %3128 = vmatpush1.bf16.msra.mxu1 %v6632_v8  ;;  %3181 = vmatpush1.bf16.msra.mxu0 %v6656_v11 }
 0x322   :  { %3129 = vmatprep.subr.bf16.mxu1 %v6637_v13  ;;  %3182 = vmatprep.subr.bf16.mxu0 %v6664_v19 }
 0x323   :  { %988 = vmatmul.mubr.f32.gmra.mxu1 %v668_v18  ;;  %1064 = vmatmul.mubr.f32.gmra.mxu0 %v668_v18 }
 0x324   :  { %3212 = vmatprep.mubr.bf16.mxu0 %v9830_v48 }
 0x325   :  { %3130 = vmatpush1.bf16.msra.mxu1 %v6635_v0  ;;  %3183 = vmatpush1.bf16.msra.mxu0 %v6662_v22  ;;  %v6731_v22 = vld [vmem:[%s9784_s7 + $0xa18] ss:$56 sps:$4 sm:$0xff]  }
 0x326   :  { %3131 = vmatprep.subr.bf16.mxu1 %v6640_v6  ;;  %3184 = vmatprep.subr.bf16.mxu0 %v6670_v23  ;;  %v6707_v23 = vld [vmem:[%s9784_s7 + $0x2a8] ss:$56 sps:$4 sm:$0xff]  }
 0x329   :  { %3132 = vmatpush1.bf16.msra.mxu1 %v6638_v20  ;;  %3185 = vmatpush1.bf16.msra.mxu0 %v6668_v27  ;;  %v6739_v20 = vld [vmem:[%s9784_s7 + $0x9ac] ss:$56 sps:$4 sm:$0xff]   ;;  %v6712_v27 = vld [vmem:[%s9784_s7 + $0x23c] ss:$56 sps:$4 sm:$0xff]  }
 0x32a   :  { %3133 = vmatprep.subr.bf16.mxu1 %v6643_v54  ;;  %3186 = vmatprep.subr.bf16.mxu0 %v6676_v25  ;;  %v6737_v54 = vld [vmem:[%s9784_s7 + $0x9a8] ss:$56 sps:$4 sm:$0xff]   ;;  %v6710_v25 = vld [vmem:[%s9784_s7 + $0x238] ss:$56 sps:$4 sm:$0xff]  }
 0x32d   :  { %3134 = vmatpush1.bf16.msra.mxu1 %v6641_v46  ;;  %3187 = vmatpush1.bf16.msra.mxu0 %v6674_v28  ;;  %v6745_v46 = vld [vmem:[%s9784_s7 + $0x93c] ss:$56 sps:$4 sm:$0xff]   ;;  %v6715_v28 = vld [vmem:[%s9784_s7 + $0x1cc] ss:$56 sps:$4 sm:$0xff]  }
 0x32e   :  { %3135 = vmatprep.subr.bf16.mxu1 %v6646_v55  ;;  %3188 = vmatprep.subr.bf16.mxu0 %v6682_v29  ;;  %v6743_v55 = vld [vmem:[%s9784_s7 + $0x938] ss:$56 sps:$4 sm:$0xff]   ;;  %v6713_v29 = vld [vmem:[%s9784_s7 + $0x1c8] ss:$56 sps:$4 sm:$0xff]  }
 0x331   :  { %3136 = vmatpush1.bf16.msra.mxu1 %v6644_v31  ;;  %3189 = vmatpush1.bf16.msra.mxu0 %v6680_v59  ;;  %v6751_v31 = vld [vmem:[%s9784_s7 + $0x8cc] ss:$56 sps:$4 sm:$0xff]   ;;  %v6718_v59 = vld [vmem:[%s9784_s7 + $0x15c] ss:$56 sps:$4 sm:$0xff]  }
 0x332   :  { %3137 = vmatprep.subr.bf16.mxu1 %v6649_v5  ;;  %3190 = vmatprep.subr.bf16.mxu0 %v6688_v57  ;;  %v6749_v5 = vld [vmem:[%s9784_s7 + $0x8c8] ss:$56 sps:$4 sm:$0xff]   ;;  %v6716_v57 = vld [vmem:[%s9784_s7 + $0x158] ss:$56 sps:$4 sm:$0xff]  }
 0x335   :  { %3138 = vmatpush1.bf16.msra.mxu1 %v6647_v58  ;;  %3191 = vmatpush1.bf16.msra.mxu0 %v6686_v33  ;;  %v6757_v58 = vld [vmem:[%s9784_s7 + $0x85c] ss:$56 sps:$4 sm:$0xff]   ;;  %v6721_v33 = vld [vmem:[%s9784_s7 + $0xec] ss:$56 sps:$4 sm:$0xff]  }
 0x336   :  { %3139 = vmatprep.subr.bf16.mxu1 %v6652_v45  ;;  %3192 = vmatprep.subr.bf16.mxu0 %v6694_v34  ;;  %v6755_v45 = vld [vmem:[%s9784_s7 + $0x858] ss:$56 sps:$4 sm:$0xff]   ;;  %v6719_v34 = vld [vmem:[%s9784_s7 + $0xe8] ss:$56 sps:$4 sm:$0xff]  }
 0x339   :  { %3140 = vmatpush1.bf16.msra.mxu1 %v6650_v10  ;;  %3193 = vmatpush1.bf16.msra.mxu0 %v6692_v56  ;;  %v6763_v10 = vld [vmem:[%s9784_s7 + $0x7ec] ss:$56 sps:$4 sm:$0xff]   ;;  %v6724_v56 = vld [vmem:[%s9784_s7 + $0x7c] ss:$56 sps:$4 sm:$0xff]  }
 0x33a   :  { %3141 = vmatprep.subr.bf16.mxu1 %v6655_v36  ;;  %3194 = vmatprep.subr.bf16.mxu0 %v6700_v30  ;;  %v6761_v36 = vld [vmem:[%s9784_s7 + $0x7e8] ss:$56 sps:$4 sm:$0xff]   ;;  %v6722_v30 = vld [vmem:[%s9784_s7 + $0x78] ss:$56 sps:$4 sm:$0xff]  }
 0x33d   :  { %3142 = vmatpush1.bf16.msra.mxu1 %v6653_v60  ;;  %3195 = vmatpush1.bf16.msra.mxu0 %v6698_v3  ;;  %v6769_v60 = vld [vmem:[%s9784_s7 + $0x77c] ss:$56 sps:$4 sm:$0xff]   ;;  %v6727_v3 = vld [vmem:[%s9784_s7 + $0xc] ss:$56 sps:$4 sm:$0xff]  }
 0x33e   :  { %3143 = vmatprep.subr.bf16.mxu1 %v6661_v21  ;;  %3233 = vmatprep.subr.bf16.mxu0 %v6706_v62  ;;  %v6767_v21 = vld [vmem:[%s9784_s7 + $0x778] ss:$56 sps:$4 sm:$0xff]   ;;  %v6725_v62 = vld [vmem:[%s9784_s7 + $0x8] ss:$56 sps:$4 sm:$0xff]  }
 0x341   :  { %3144 = vmatpush2.bf16.msra.mxu1 %v6659_v61  ;;  %v6775_v61 = vld [vmem:[%s9784_s7 + $0x70c] ss:$56 sps:$4 sm:$0xff]  }
 0x342   :  { %3145 = vmatprep.subr.bf16.mxu1 %v6667_v38  ;;  %v6730_v38 = vld [vmem:[%s9784_s7 + $0x69c] ss:$56 sps:$4 sm:$0xff]  }
 0x345   :  { %3146 = vmatpush2.bf16.msra.mxu1 %v6665_v42  ;;  %v6773_v42 = vld [vmem:[%s9784_s7 + $0x708] ss:$56 sps:$4 sm:$0xff]  }
 0x346   :  { %3147 = vmatprep.subr.bf16.mxu1 %v6673_v7  ;;  %v6728_v7 = vld [vmem:[%s9784_s7 + $0x698] ss:$56 sps:$4 sm:$0xff]  }
 0x349   :  { %3148 = vmatpush2.bf16.msra.mxu1 %v6671_v26  ;;  %v6781_v26 = vld [vmem:[%s9784_s7 + $0x324] ss:$56 sps:$4 sm:$0xff]  }
 0x34a   :  { %3149 = vmatprep.subr.bf16.mxu1 %v6679_v39  ;;  %v6736_v39 = vld [vmem:[%s9784_s7 + $0x62c] ss:$56 sps:$4 sm:$0xff]  }
 0x34d   :  { %3150 = vmatpush2.bf16.msra.mxu1 %v6677_v52  ;;  %v6734_v52 = vld [vmem:[%s9784_s7 + $0x628] ss:$56 sps:$4 sm:$0xff]  }
 0x34e   :  { %3151 = vmatprep.subr.bf16.mxu1 %v6685_v35  ;;  %v6742_v35 = vld [vmem:[%s9784_s7 + $0x5bc] ss:$56 sps:$4 sm:$0xff]  }
 0x351   :  { %3152 = vmatpush2.bf16.msra.mxu1 %v6683_v12  ;;  %v6740_v12 = vld [vmem:[%s9784_s7 + $0x5b8] ss:$56 sps:$4 sm:$0xff]  }
 0x352   :  { %3153 = vmatprep.subr.bf16.mxu1 %v6691_v4  ;;  %v6748_v4 = vld [vmem:[%s9784_s7 + $0x54c] ss:$56 sps:$4 sm:$0xff]  }
 0x355   :  { %3154 = vmatpush2.bf16.msra.mxu1 %v6689_v24  ;;  %v6746_v24 = vld [vmem:[%s9784_s7 + $0x548] ss:$56 sps:$4 sm:$0xff]  }
 0x356   :  { %3155 = vmatprep.subr.bf16.mxu1 %v6697_v32  ;;  %v6754_v32 = vld [vmem:[%s9784_s7 + $0x4dc] ss:$56 sps:$4 sm:$0xff]  }
 0x359   :  { %3156 = vmatpush2.bf16.msra.mxu1 %v6695_v1  ;;  %v1086_v1 = vpop.permute.xlu1 %1085 }
 0x35a   :  { %3157 = vmatprep.subr.bf16.mxu1 %v6703_v53  ;;  %v6752_v53 = vld [vmem:[%s9784_s7 + $0x4d8] ss:$56 sps:$4 sm:$0xff]  }
 0x35d   :  { %3158 = vmatpush2.bf16.msra.mxu1 %v6701_v51 }
 0x35e   :  { %3286 = vmatprep.subr.bf16.mxu1 %v6733_v9 }
 0x3a6   :  { %v550_v16 = vpop.f32.mrf.mxu1  ;;  %v627_v40 = vpop.f32.mrf.mxu0 }
 0x3a7   :  { %v1095_v63 = vadd.f32 %v1076_v2, %v627_v40  ;;  %v1093_v18 = vadd.f32 %v1076_v2, %v550_v16  ;;  %v6760_v16 = vld [vmem:[%s9784_s7 + $0x46c] ss:$56 sps:$4 sm:$0xff]  }
 0x3a8   :  { %v552_v49 = vpop.f32.mrf.mxu1  ;;  %v629_v14 = vpop.f32.mrf.mxu0 }
 0x3a9   :  { %v1094_v50 = vadd.f32 %v1076_v2, %v552_v49  ;;  %v1091_v14 = vpop.permute.xlu1 %1090 }
 0x3ac   :  { %v632_v41 = vpop.f32.mrf.mxu0  ;;  %v556_v37 = vpop.f32.mrf.mxu1 }
 0x3ad   :  { %v1098_v17 = vadd.f32 %v1081_v15, %v632_v41  ;;  %v1096_v43 = vadd.f32 %v1081_v15, %v556_v37  ;;  %v6766_v37 = vld [vmem:[%s9784_s7 + $0x3fc] ss:$56 sps:$4 sm:$0xff]  }
 0x3ae   :  { %v558_v8 = vpop.f32.mrf.mxu1  ;;  %v634_v11 = vpop.f32.mrf.mxu0 }
 0x3af   :  { %v8635_v13 = vpack.c.bf16 %v1098_v17, %v1095_v63  ;;  %v1097_v19 = vadd.f32 %v1081_v15, %v558_v8  ;;  %v8646_v6 = vpack.c.bf16 %v1096_v43, %v1093_v18  ;;  %v6758_v15 = vld [vmem:[%s9784_s7 + $0x468] ss:$56 sps:$4 sm:$0xff]  }
 0x3b1   :  { %v8640_v0 = vpack.c.bf16 %v1097_v19, %v1094_v50  ;;  %3213 = vmatmul.mubr.bf16.vlgmr.msra.gmra.mxu0 %v8635_v13 }
 0x3b2   :  { %3234 = vmatpush1.bf16.msra.mxu0 %v6704_v47  ;;  %3222 = vmatprep.mubr.bf16.mxu0 %v9830_v48 }
 0x3b3   :  { %3159 = vmatprep.mubr.bf16.mxu1 %v8640_v0  ;;  %3235 = vmatprep.subr.bf16.mxu0 %v6709_v44  ;;  %v6764_v44 = vld [vmem:[%s9784_s7 + $0x3f8] ss:$56 sps:$4 sm:$0xff]  }
 0x3b4   :  { %3160 = vmatmul.mubr.bf16.vlgmr.msra.gmra.mxu1 %v8646_v6 }
 0x3b5   :  { %3287 = vmatpush1.bf16.msra.mxu1 %v6731_v22  ;;  %v6772_v22 = vld [vmem:[%s9784_s7 + $0x38c] ss:$56 sps:$4 sm:$0xff]  }
 0x3b6   :  { %3236 = vmatpush1.bf16.msra.mxu0 %v6707_v23  ;;  %3288 = vmatprep.subr.bf16.mxu1 %v6739_v20 }
 0x3b7   :  { %3237 = vmatprep.subr.bf16.mxu0 %v6712_v27  ;;  %v6770_v27 = vld [vmem:[%s9784_s7 + $0x388] ss:$56 sps:$4 sm:$0xff]  }
 0x3b9   :  { %3289 = vmatpush1.bf16.msra.mxu1 %v6737_v54  ;;  %v6778_v54 = vld [vmem:[%s9784_s7 + $0xa24] ss:$56 sps:$4 sm:$0xff]  }
 0x3ba   :  { %3238 = vmatpush1.bf16.msra.mxu0 %v6710_v25  ;;  %3290 = vmatprep.subr.bf16.mxu1 %v6745_v46  ;;  %v6776_v25 = vld [vmem:[%s9784_s7 + $0xa20] ss:$56 sps:$4 sm:$0xff]   ;;  %v6784_v46 = vld [vmem:[%s9784_s7 + $0x9b4] ss:$56 sps:$4 sm:$0xff]  }
 0x3bb   :  { %3239 = vmatprep.subr.bf16.mxu0 %v6715_v28  ;;  %v6779_v28 = vld [vmem:[%s9784_s7 + $0x320] ss:$56 sps:$4 sm:$0xff]  }
 0x3bd   :  { %3291 = vmatpush1.bf16.msra.mxu1 %v6743_v55  ;;  %v6787_v55 = vld [vmem:[%s9784_s7 + $0x2b4] ss:$56 sps:$4 sm:$0xff]  }
 0x3be   :  { %3240 = vmatpush1.bf16.msra.mxu0 %v6713_v29  ;;  %3292 = vmatprep.subr.bf16.mxu1 %v6751_v31  ;;  %v6782_v29 = vld [vmem:[%s9784_s7 + $0x9b0] ss:$56 sps:$4 sm:$0xff]   ;;  %v6790_v31 = vld [vmem:[%s9784_s7 + $0x944] ss:$56 sps:$4 sm:$0xff]  }
 0x3bf   :  { %3241 = vmatprep.subr.bf16.mxu0 %v6718_v59  ;;  %v6785_v59 = vld [vmem:[%s9784_s7 + $0x2b0] ss:$56 sps:$4 sm:$0xff]  }
 0x3c1   :  { %3293 = vmatpush1.bf16.msra.mxu1 %v6749_v5  ;;  %v6793_v5 = vld [vmem:[%s9784_s7 + $0x244] ss:$56 sps:$4 sm:$0xff]  }
 0x3c2   :  { %3242 = vmatpush1.bf16.msra.mxu0 %v6716_v57  ;;  %3294 = vmatprep.subr.bf16.mxu1 %v6757_v58  ;;  %v6788_v57 = vld [vmem:[%s9784_s7 + $0x940] ss:$56 sps:$4 sm:$0xff]   ;;  %v6796_v58 = vld [vmem:[%s9784_s7 + $0x8d4] ss:$56 sps:$4 sm:$0xff]  }
 0x3c3   :  { %3243 = vmatprep.subr.bf16.mxu0 %v6721_v33  ;;  %v6791_v33 = vld [vmem:[%s9784_s7 + $0x240] ss:$56 sps:$4 sm:$0xff]  }
 0x3c5   :  { %3295 = vmatpush1.bf16.msra.mxu1 %v6755_v45  ;;  %v6799_v45 = vld [vmem:[%s9784_s7 + $0x1d4] ss:$56 sps:$4 sm:$0xff]  }
 0x3c6   :  { %3244 = vmatpush1.bf16.msra.mxu0 %v6719_v34  ;;  %3296 = vmatprep.subr.bf16.mxu1 %v6763_v10  ;;  %v6794_v34 = vld [vmem:[%s9784_s7 + $0x8d0] ss:$56 sps:$4 sm:$0xff]   ;;  %v6802_v10 = vld [vmem:[%s9784_s7 + $0x864] ss:$56 sps:$4 sm:$0xff]  }
 0x3c7   :  { %3245 = vmatprep.subr.bf16.mxu0 %v6724_v56  ;;  %v6797_v56 = vld [vmem:[%s9784_s7 + $0x1d0] ss:$56 sps:$4 sm:$0xff]  }
 0x3c9   :  { %3297 = vmatpush1.bf16.msra.mxu1 %v6761_v36  ;;  %v6805_v36 = vld [vmem:[%s9784_s7 + $0x164] ss:$56 sps:$4 sm:$0xff]  }
 0x3ca   :  { %3246 = vmatpush1.bf16.msra.mxu0 %v6722_v30  ;;  %3298 = vmatprep.subr.bf16.mxu1 %v6769_v60  ;;  %v6800_v30 = vld [vmem:[%s9784_s7 + $0x860] ss:$56 sps:$4 sm:$0xff]   ;;  %v6808_v60 = vld [vmem:[%s9784_s7 + $0x7f4] ss:$56 sps:$4 sm:$0xff]  }
 0x3cb   :  { %3247 = vmatprep.subr.bf16.mxu0 %v6727_v3  ;;  %v6803_v3 = vld [vmem:[%s9784_s7 + $0x160] ss:$56 sps:$4 sm:$0xff]  }
 0x3cd   :  { %3299 = vmatpush1.bf16.msra.mxu1 %v6767_v21  ;;  %v6811_v21 = vld [vmem:[%s9784_s7 + $0xf4] ss:$56 sps:$4 sm:$0xff]  }
 0x3ce   :  { %3248 = vmatpush1.bf16.msra.mxu0 %v6725_v62  ;;  %3300 = vmatprep.subr.bf16.mxu1 %v6775_v61  ;;  %v6806_v62 = vld [vmem:[%s9784_s7 + $0x7f0] ss:$56 sps:$4 sm:$0xff]   ;;  %v6814_v61 = vld [vmem:[%s9784_s7 + $0x784] ss:$56 sps:$4 sm:$0xff]  }
 0x3cf   :  { %3249 = vmatprep.subr.bf16.mxu0 %v6730_v38  ;;  %v6809_v38 = vld [vmem:[%s9784_s7 + $0xf0] ss:$56 sps:$4 sm:$0xff]  }
 0x3d1   :  { %3301 = vmatpush1.bf16.msra.mxu1 %v6773_v42  ;;  %v6817_v42 = vld [vmem:[%s9784_s7 + $0x84] ss:$56 sps:$4 sm:$0xff]  }
 0x3d2   :  { %3250 = vmatpush2.bf16.msra.mxu0 %v6728_v7  ;;  %3339 = vmatprep.subr.bf16.mxu1 %v6781_v26  ;;  %v6812_v7 = vld [vmem:[%s9784_s7 + $0x780] ss:$56 sps:$4 sm:$0xff]   ;;  %v6820_v26 = vld [vmem:[%s9784_s7 + $0x714] ss:$56 sps:$4 sm:$0xff]  }
 0x3d3   :  { %3251 = vmatprep.subr.bf16.mxu0 %v6736_v39  ;;  %v6815_v39 = vld [vmem:[%s9784_s7 + $0x80] ss:$56 sps:$4 sm:$0xff]  }
 0x3d6   :  { %3252 = vmatpush2.bf16.msra.mxu0 %v6734_v52  ;;  %v6823_v52 = vld [vmem:[%s9784_s7 + $0x14] ss:$56 sps:$4 sm:$0xff]  }
 0x3d7   :  { %3253 = vmatprep.subr.bf16.mxu0 %v6742_v35  ;;  %v6818_v35 = vld [vmem:[%s9784_s7 + $0x710] ss:$56 sps:$4 sm:$0xff]  }
 0x3da   :  { %3254 = vmatpush2.bf16.msra.mxu0 %v6740_v12  ;;  %v6826_v12 = vld [vmem:[%s9784_s7 + $0x32c] ss:$56 sps:$4 sm:$0xff]  }
 0x3db   :  { %3255 = vmatprep.subr.bf16.mxu0 %v6748_v4  ;;  %v6821_v4 = vld [vmem:[%s9784_s7 + $0x10] ss:$56 sps:$4 sm:$0xff]  }
 0x3de   :  { %3256 = vmatpush2.bf16.msra.mxu0 %v6746_v24  ;;  %v6829_v24 = vld [vmem:[%s9784_s7 + $0x6a4] ss:$56 sps:$4 sm:$0xff]  }
 0x3df   :  { %v983_v51 = vpop.f32.mrf.mxu1  ;;  %v1060_v9 = vpop.f32.mrf.mxu0  ;;  %3257 = vmatprep.subr.bf16.mxu0 %v6754_v32  ;;  %v6824_v32 = vld [vmem:[%s9784_s7 + $0x328] ss:$56 sps:$4 sm:$0xff]  }
 0x3e0   :  { %v1101_v63 = vadd.f32 %v1086_v1, %v1060_v9  ;;  %v1099_v18 = vadd.f32 %v1086_v1, %v983_v51  ;;  %v6835_v51 = vld [vmem:[%s9784_s7 + $0x634] ss:$56 sps:$4 sm:$0xff]   ;;  %v6830_v9 = vld [vmem:[%s9784_s7 + $0x2b8] ss:$56 sps:$4 sm:$0xff]  }
 0x3e1   :  { %v985_v40 = vpop.f32.mrf.mxu1  ;;  %v1062_v49 = vpop.f32.mrf.mxu0 }
 0x3e2   :  { %3258 = vmatpush2.bf16.msra.mxu0 %v6752_v53  ;;  %v1100_v47 = vadd.f32 %v1086_v1, %v985_v40  ;;  %v6832_v1 = vld [vmem:[%s9784_s7 + $0x2bc] ss:$56 sps:$4 sm:$0xff]   ;;  %v6827_v53 = vld [vmem:[%s9784_s7 + $0x6a0] ss:$56 sps:$4 sm:$0xff]   ;;  %v6833_v40 = vld [vmem:[%s9784_s7 + $0x630] ss:$56 sps:$4 sm:$0xff]  }
 0x3e3   :  { %v989_v2 = vpop.f32.mrf.mxu1  ;;  %v1065_v41 = vpop.f32.mrf.mxu0  ;;  %3259 = vmatprep.subr.bf16.mxu0 %v6760_v16  ;;  %v6838_v16 = vld [vmem:[%s9784_s7 + $0x24c] ss:$56 sps:$4 sm:$0xff]  }
 0x3e4   :  { %v1104_v17 = vadd.f32 %v1091_v14, %v1065_v41  ;;  %v1102_v43 = vadd.f32 %v1091_v14, %v989_v2  ;;  %v6841_v49 = vld [vmem:[%s9784_s7 + $0x5c4] ss:$56 sps:$4 sm:$0xff]   ;;  %v6839_v2 = vld [vmem:[%s9784_s7 + $0x5c0] ss:$56 sps:$4 sm:$0xff]   ;;  %v6847_v41 = vld [vmem:[%s9784_s7 + $0x554] ss:$56 sps:$4 sm:$0xff]  }
 0x3e5   :  { %v991_v8 = vpop.f32.mrf.mxu1  ;;  %v1067_v11 = vpop.f32.mrf.mxu0 }
 0x3e6   :  { %v8774_v50 = vpack.c.bf16 %v1104_v17, %v1101_v63  ;;  %3260 = vmatpush2.bf16.msra.mxu0 %v6758_v15  ;;  %v1103_v19 = vadd.f32 %v1091_v14, %v991_v8  ;;  %v8785_v20 = vpack.c.bf16 %v1102_v43, %v1099_v18  ;;  %v6836_v14 = vld [vmem:[%s9784_s7 + $0x248] ss:$56 sps:$4 sm:$0xff]   ;;  %v6844_v15 = vld [vmem:[%s9784_s7 + $0x1dc] ss:$56 sps:$4 sm:$0xff]   ;;  %v6850_v63 = vld [vmem:[%s9784_s7 + $0x16c] ss:$56 sps:$4 sm:$0xff]  }
 0x3e7   :  { %3261 = vmatprep.subr.bf16.mxu0 %v6766_v37  ;;  %v6842_v37 = vld [vmem:[%s9784_s7 + $0x1d8] ss:$56 sps:$4 sm:$0xff]   ;;  %v6853_v43 = vld [vmem:[%s9784_s7 + $0x4e4] ss:$56 sps:$4 sm:$0xff]   ;;  %v6848_v8 = vld [vmem:[%s9784_s7 + $0x168] ss:$56 sps:$4 sm:$0xff]  }
 0x3e8   :  { %v8782_v23 = vpack.c.bf16 %v1103_v19, %v1100_v47  ;;  %3223 = vmatmul.mubr.bf16.gmra.mxu0 %v8774_v50  ;;  %v6845_v17 = vld [vmem:[%s9784_s7 + $0x550] ss:$56 sps:$4 sm:$0xff]   ;;  %v6856_v11 = vld [vmem:[%s9784_s7 + $0xfc] ss:$56 sps:$4 sm:$0xff]   ;;  %v6851_v47 = vld [vmem:[%s9784_s7 + $0x4e0] ss:$56 sps:$4 sm:$0xff]  }
 0x3e9   :  { %3265 = vmatprep.mubr.bf16.mxu0 %v8640_v0  ;;  %v6859_v19 = vld [vmem:[%s9784_s7 + $0x474] ss:$56 sps:$4 sm:$0xff]  }
 0x3ea   :  { %3262 = vmatpush2.bf16.msra.mxu0 %v6764_v44  ;;  %3169 = vmatprep.mubr.bf16.mxu1 %v8782_v23  ;;  %v6854_v44 = vld [vmem:[%s9784_s7 + $0xf8] ss:$56 sps:$4 sm:$0xff]   ;;  %v6862_v18 = vld [vmem:[%s9784_s7 + $0x8c] ss:$56 sps:$4 sm:$0xff]  }
 0x3eb   :  { %3170 = vmatmul.mubr.bf16.gmra.mxu1 %v8785_v20  ;;  %3263 = vmatprep.subr.bf16.mxu0 %v6772_v22  ;;  %v6857_v22 = vld [vmem:[%s9784_s7 + $0x470] ss:$56 sps:$4 sm:$0xff]  }
 0x3ec   :  { %3318 = vmatprep.mubr.bf16.mxu1 %v9830_v48 }
 0x3ee   :  { %3264 = vmatpush2.bf16.msra.mxu0 %v6770_v27  ;;  %v6865_v27 = vld [vmem:[%s9784_s7 + $0x404] ss:$56 sps:$4 sm:$0xff]  }
 0x3ef   :  { %3392 = vmatprep.subr.bf16.mxu0 %v6778_v54  ;;  %v6860_v54 = vld [vmem:[%s9784_s7 + $0x88] ss:$56 sps:$4 sm:$0xff]  }
 0x3f1   :  { %3266 = vmatmul.mubr.bf16.vlgmr.msra.gmra.mxu0 %v8646_v6 }
 0x3f2   :  { %3393 = vmatpush1.bf16.msra.mxu0 %v6776_v25  ;;  %3275 = vmatprep.mubr.bf16.mxu0 %v8782_v23  ;;  %v6868_v25 = vld [vmem:[%s9784_s7 + $0x1c] ss:$56 sps:$4 sm:$0xff]  }
 0x3f3   :  { %3319 = vmatmul.mubr.bf16.vlgmr.msra.gmra.mxu1 %v8635_v13  ;;  %3394 = vmatprep.subr.bf16.mxu0 %v6784_v46  ;;  %v6863_v46 = vld [vmem:[%s9784_s7 + $0x400] ss:$56 sps:$4 sm:$0xff]  }
 0x3f4   :  { %3340 = vmatpush1.bf16.msra.mxu1 %v6779_v28  ;;  %3328 = vmatprep.mubr.bf16.mxu1 %v9830_v48  ;;  %v6871_v28 = vld [vmem:[%s9784_s7 + $0x394] ss:$56 sps:$4 sm:$0xff]  }
 0x3f5   :  { %3341 = vmatprep.subr.bf16.mxu1 %v6787_v55  ;;  %v6866_v55 = vld [vmem:[%s9784_s7 + $0x18] ss:$56 sps:$4 sm:$0xff]  }
 0x3f6   :  { %3395 = vmatpush1.bf16.msra.mxu0 %v6782_v29  ;;  %v6874_v29 = vld [vmem:[%s9784_s7 + $0x6ac] ss:$56 sps:$4 sm:$0xff]  }
 0x3f7   :  { %3396 = vmatprep.subr.bf16.mxu0 %v6790_v31  ;;  %v6869_v31 = vld [vmem:[%s9784_s7 + $0x390] ss:$56 sps:$4 sm:$0xff]  }
 0x3f8   :  { %3342 = vmatpush1.bf16.msra.mxu1 %v6785_v59  ;;  %v6877_v59 = vld [vmem:[%s9784_s7 + $0xa2c] ss:$56 sps:$4 sm:$0xff]  }
 0x3f9   :  { %3276 = vmatmul.mubr.bf16.gmra.mxu0 %v8785_v20  ;;  %3343 = vmatprep.subr.bf16.mxu1 %v6793_v5  ;;  %v6872_v5 = vld [vmem:[%s9784_s7 + $0x6a8] ss:$56 sps:$4 sm:$0xff]  }
 0x3fa   :  { %3397 = vmatpush1.bf16.msra.mxu0 %v6788_v57  ;;  %3424 = vmatprep.mubr.bf16.mxu0 %v9830_v48  ;;  %v6880_v57 = vld [vmem:[%s9784_s7 + $0x63c] ss:$56 sps:$4 sm:$0xff]  }
 0x3fb   :  { %3329 = vmatmul.mubr.bf16.gmra.mxu1 %v8774_v50  ;;  %3398 = vmatprep.subr.bf16.mxu0 %v6796_v58  ;;  %v6875_v58 = vld [vmem:[%s9784_s7 + $0xa28] ss:$56 sps:$4 sm:$0xff]  }
 0x3fc   :  { %3344 = vmatpush1.bf16.msra.mxu1 %v6791_v33  ;;  %3371 = vmatprep.mubr.bf16.mxu1 %v8640_v0  ;;  %v6883_v33 = vld [vmem:[%s9784_s7 + $0x9bc] ss:$56 sps:$4 sm:$0xff]  }
 0x3fd   :  { %3345 = vmatprep.subr.bf16.mxu1 %v6799_v45  ;;  %v6878_v45 = vld [vmem:[%s9784_s7 + $0x638] ss:$56 sps:$4 sm:$0xff]  }
 0x3fe   :  { %3399 = vmatpush1.bf16.msra.mxu0 %v6794_v34  ;;  %v6886_v34 = vld [vmem:[%s9784_s7 + $0x5cc] ss:$56 sps:$4 sm:$0xff]  }
 0x3ff   :  { %3400 = vmatprep.subr.bf16.mxu0 %v6802_v10  ;;  %v6881_v10 = vld [vmem:[%s9784_s7 + $0x9b8] ss:$56 sps:$4 sm:$0xff]  }
 0x400   :  { %3346 = vmatpush1.bf16.msra.mxu1 %v6797_v56  ;;  %v6889_v56 = vld [vmem:[%s9784_s7 + $0x94c] ss:$56 sps:$4 sm:$0xff]  }
 0x401   :  { %3347 = vmatprep.subr.bf16.mxu1 %v6805_v36  ;;  %v6884_v36 = vld [vmem:[%s9784_s7 + $0x5c8] ss:$56 sps:$4 sm:$0xff]  }
 0x402   :  { %3401 = vmatpush1.bf16.msra.mxu0 %v6800_v30  ;;  %v6892_v30 = vld [vmem:[%s9784_s7 + $0x55c] ss:$56 sps:$4 sm:$0xff]  }
 0x403   :  { %3402 = vmatprep.subr.bf16.mxu0 %v6808_v60  ;;  %v6887_v60 = vld [vmem:[%s9784_s7 + $0x948] ss:$56 sps:$4 sm:$0xff]  }
 0x404   :  { %3348 = vmatpush1.bf16.msra.mxu1 %v6803_v3  ;;  %v6895_v3 = vld [vmem:[%s9784_s7 + $0x8dc] ss:$56 sps:$4 sm:$0xff]  }
 0x405   :  { %3349 = vmatprep.subr.bf16.mxu1 %v6811_v21  ;;  %v6890_v21 = vld [vmem:[%s9784_s7 + $0x558] ss:$56 sps:$4 sm:$0xff]  }
 0x406   :  { %3403 = vmatpush1.bf16.msra.mxu0 %v6806_v62  ;;  %v6898_v62 = vld [vmem:[%s9784_s7 + $0x4ec] ss:$56 sps:$4 sm:$0xff]  }
 0x407   :  { %3404 = vmatprep.subr.bf16.mxu0 %v6814_v61  ;;  %v6893_v61 = vld [vmem:[%s9784_s7 + $0x8d8] ss:$56 sps:$4 sm:$0xff]  }
 0x408   :  { %3350 = vmatpush1.bf16.msra.mxu1 %v6809_v38  ;;  %v6901_v38 = vld [vmem:[%s9784_s7 + $0x86c] ss:$56 sps:$4 sm:$0xff]  }
 0x409   :  { %3351 = vmatprep.subr.bf16.mxu1 %v6817_v42  ;;  %v6896_v42 = vld [vmem:[%s9784_s7 + $0x4e8] ss:$56 sps:$4 sm:$0xff]  }
 0x40a   :  { %3405 = vmatpush1.bf16.msra.mxu0 %v6812_v7  ;;  %v6904_v7 = vld [vmem:[%s9784_s7 + $0x47c] ss:$56 sps:$4 sm:$0xff]  }
 0x40b   :  { %3406 = vmatprep.subr.bf16.mxu0 %v6820_v26  ;;  %v6899_v26 = vld [vmem:[%s9784_s7 + $0x868] ss:$56 sps:$4 sm:$0xff]  }
 0x40c   :  { %3352 = vmatpush1.bf16.msra.mxu1 %v6815_v39  ;;  %v6907_v39 = vld [vmem:[%s9784_s7 + $0x7fc] ss:$56 sps:$4 sm:$0xff]  }
 0x40d   :  { %3353 = vmatprep.subr.bf16.mxu1 %v6823_v52  ;;  %v6902_v52 = vld [vmem:[%s9784_s7 + $0x478] ss:$56 sps:$4 sm:$0xff]  }
 0x40e   :  { %3407 = vmatpush1.bf16.msra.mxu0 %v6818_v35  ;;  %v6910_v35 = vld [vmem:[%s9784_s7 + $0x40c] ss:$56 sps:$4 sm:$0xff]  }
 0x40f   :  { %3445 = vmatprep.subr.bf16.mxu0 %v6826_v12  ;;  %v6905_v12 = vld [vmem:[%s9784_s7 + $0x7f8] ss:$56 sps:$4 sm:$0xff]  }
 0x410   :  { %3354 = vmatpush1.bf16.msra.mxu1 %v6821_v4  ;;  %v6913_v4 = vld [vmem:[%s9784_s7 + $0x78c] ss:$56 sps:$4 sm:$0xff]  }
 0x411   :  { %3425 = vmatmul.mubr.bf16.vlgmr.msra.gmra.mxu0 %v8635_v13  ;;  %3355 = vmatprep.subr.bf16.mxu1 %v6829_v24  ;;  %v6908_v24 = vld [vmem:[%s9784_s7 + $0x408] ss:$56 sps:$4 sm:$0xff]  }
 0x412   :  { %3446 = vmatpush1.bf16.msra.mxu0 %v6824_v32  ;;  %3434 = vmatprep.mubr.bf16.mxu0 %v9830_v48  ;;  %v6916_v32 = vld [vmem:[%s9784_s7 + $0x39c] ss:$56 sps:$4 sm:$0xff]  }
 0x413   :  { %3447 = vmatprep.subr.bf16.mxu0 %v6832_v1  ;;  %v6911_v1 = vld [vmem:[%s9784_s7 + $0x788] ss:$56 sps:$4 sm:$0xff]  }
 0x414   :  { %3356 = vmatpush2.bf16.msra.mxu1 %v6827_v53  ;;  %v6919_v53 = vld [vmem:[%s9784_s7 + $0x71c] ss:$56 sps:$4 sm:$0xff]  }
 0x415   :  { %3357 = vmatprep.subr.bf16.mxu1 %v6835_v51  ;;  %v6914_v51 = vld [vmem:[%s9784_s7 + $0x398] ss:$56 sps:$4 sm:$0xff]  }
 0x416   :  { %3448 = vmatpush1.bf16.msra.mxu0 %v6830_v9  ;;  %v6922_v9 = vld [vmem:[%s9784_s7 + $0xa34] ss:$56 sps:$4 sm:$0xff]  }
 0x417   :  { %3449 = vmatprep.subr.bf16.mxu0 %v6838_v16  ;;  %v6917_v16 = vld [vmem:[%s9784_s7 + $0x718] ss:$56 sps:$4 sm:$0xff]  }
 0x418   :  { %3358 = vmatpush2.bf16.msra.mxu1 %v6833_v40  ;;  %v6925_v40 = vld [vmem:[%s9784_s7 + $0x334] ss:$56 sps:$4 sm:$0xff]  }
 0x419   :  { %3435 = vmatmul.mubr.bf16.gmra.mxu0 %v8774_v50  ;;  %3359 = vmatprep.subr.bf16.mxu1 %v6841_v49  ;;  %v6920_v49 = vld [vmem:[%s9784_s7 + $0xa30] ss:$56 sps:$4 sm:$0xff]  }
 0x41a   :  { %3450 = vmatpush1.bf16.msra.mxu0 %v6836_v14  ;;  %3477 = vmatprep.mubr.bf16.mxu0 %v8640_v0  ;;  %v6928_v14 = vld [vmem:[%s9784_s7 + $0x9c4] ss:$56 sps:$4 sm:$0xff]  }
 0x41b   :  { %3451 = vmatprep.subr.bf16.mxu0 %v6844_v15  ;;  %v6923_v15 = vld [vmem:[%s9784_s7 + $0x330] ss:$56 sps:$4 sm:$0xff]  }
 0x41c   :  { %3360 = vmatpush2.bf16.msra.mxu1 %v6839_v2  ;;  %v6931_v2 = vld [vmem:[%s9784_s7 + $0x2c4] ss:$56 sps:$4 sm:$0xff]  }
 0x41d   :  { %3361 = vmatprep.subr.bf16.mxu1 %v6847_v41  ;;  %v6926_v41 = vld [vmem:[%s9784_s7 + $0x9c0] ss:$56 sps:$4 sm:$0xff]  }
 0x41e   :  { %3452 = vmatpush1.bf16.msra.mxu0 %v6842_v37  ;;  %v6934_v37 = vld [vmem:[%s9784_s7 + $0x954] ss:$56 sps:$4 sm:$0xff]  }
 0x41f   :  { %3453 = vmatprep.subr.bf16.mxu0 %v6850_v63  ;;  %v6929_v63 = vld [vmem:[%s9784_s7 + $0x2c0] ss:$56 sps:$4 sm:$0xff]  }
 0x420   :  { %3362 = vmatpush2.bf16.msra.mxu1 %v6845_v17  ;;  %v6937_v17 = vld [vmem:[%s9784_s7 + $0x254] ss:$56 sps:$4 sm:$0xff]  }
 0x421   :  { %3363 = vmatprep.subr.bf16.mxu1 %v6853_v43  ;;  %v6932_v43 = vld [vmem:[%s9784_s7 + $0x950] ss:$56 sps:$4 sm:$0xff]  }
 0x422   :  { %3454 = vmatpush1.bf16.msra.mxu0 %v6848_v8  ;;  %v6940_v8 = vld [vmem:[%s9784_s7 + $0x8e4] ss:$56 sps:$4 sm:$0xff]  }
 0x423   :  { %3455 = vmatprep.subr.bf16.mxu0 %v6856_v11  ;;  %v6935_v11 = vld [vmem:[%s9784_s7 + $0x250] ss:$56 sps:$4 sm:$0xff]  }
 0x424   :  { %3364 = vmatpush2.bf16.msra.mxu1 %v6851_v47  ;;  %v6943_v47 = vld [vmem:[%s9784_s7 + $0x1e4] ss:$56 sps:$4 sm:$0xff]  }
 0x425   :  { %3365 = vmatprep.subr.bf16.mxu1 %v6859_v19  ;;  %v6938_v19 = vld [vmem:[%s9784_s7 + $0x8e0] ss:$56 sps:$4 sm:$0xff]  }
 0x426   :  { %3456 = vmatpush1.bf16.msra.mxu0 %v6854_v44  ;;  %v6946_v44 = vld [vmem:[%s9784_s7 + $0x874] ss:$56 sps:$4 sm:$0xff]  }
 0x427   :  { %3457 = vmatprep.subr.bf16.mxu0 %v6862_v18  ;;  %v6941_v18 = vld [vmem:[%s9784_s7 + $0x1e0] ss:$56 sps:$4 sm:$0xff]  }
 0x428   :  { %3366 = vmatpush2.bf16.msra.mxu1 %v6857_v22  ;;  %v6949_v22 = vld [vmem:[%s9784_s7 + $0x174] ss:$56 sps:$4 sm:$0xff]  }
 0x429   :  { %3367 = vmatprep.subr.bf16.mxu1 %v6865_v27  ;;  %v6944_v27 = vld [vmem:[%s9784_s7 + $0x870] ss:$56 sps:$4 sm:$0xff]  }
 0x42a   :  { %3458 = vmatpush1.bf16.msra.mxu0 %v6860_v54  ;;  %v6952_v54 = vld [vmem:[%s9784_s7 + $0x804] ss:$56 sps:$4 sm:$0xff]  }
 0x42b   :  { %3459 = vmatprep.subr.bf16.mxu0 %v6868_v25  ;;  %v6947_v25 = vld [vmem:[%s9784_s7 + $0x170] ss:$56 sps:$4 sm:$0xff]  }
 0x42c   :  { %3368 = vmatpush2.bf16.msra.mxu1 %v6863_v46  ;;  %v6955_v46 = vld [vmem:[%s9784_s7 + $0x104] ss:$56 sps:$4 sm:$0xff]  }
 0x42d   :  { %3369 = vmatprep.subr.bf16.mxu1 %v6871_v28  ;;  %v6950_v28 = vld [vmem:[%s9784_s7 + $0x800] ss:$56 sps:$4 sm:$0xff]  }
 0x42e   :  { %3460 = vmatpush1.bf16.msra.mxu0 %v6866_v55  ;;  %v6958_v55 = vld [vmem:[%s9784_s7 + $0x794] ss:$56 sps:$4 sm:$0xff]  }
 0x42f   :  { %3461 = vmatprep.subr.bf16.mxu0 %v6874_v29  ;;  %v6953_v29 = vld [vmem:[%s9784_s7 + $0x100] ss:$56 sps:$4 sm:$0xff]  }
 0x430   :  { %3370 = vmatpush2.bf16.msra.mxu1 %v6869_v31  ;;  %v6961_v31 = vld [vmem:[%s9784_s7 + $0x94] ss:$56 sps:$4 sm:$0xff]  }
 0x431   :  { %3498 = vmatprep.subr.bf16.mxu1 %v6877_v59  ;;  %v6956_v59 = vld [vmem:[%s9784_s7 + $0x790] ss:$56 sps:$4 sm:$0xff]  }
 0x432   :  { %3462 = vmatpush2.bf16.msra.mxu0 %v6872_v5  ;;  %v6964_v5 = vld [vmem:[%s9784_s7 + $0x724] ss:$56 sps:$4 sm:$0xff]  }
 0x433   :  { %3372 = vmatmul.mubr.bf16.vlgmr.msra.gmra.mxu1 %v8646_v6  ;;  %3463 = vmatprep.subr.bf16.mxu0 %v6880_v57  ;;  %v6959_v57 = vld [vmem:[%s9784_s7 + $0x90] ss:$56 sps:$4 sm:$0xff]  }
 0x434   :  { %3381 = vmatprep.mubr.bf16.mxu1 %v8782_v23  ;;  %3499 = vmatpush1.bf16.msra.mxu1 %v6875_v58  ;;  %v6967_v58 = vld [vmem:[%s9784_s7 + $0x24] ss:$56 sps:$4 sm:$0xff]  }
 0x435   :  { %3500 = vmatprep.subr.bf16.mxu1 %v6883_v33  ;;  %v6962_v33 = vld [vmem:[%s9784_s7 + $0x720] ss:$56 sps:$4 sm:$0xff]  }
 0x436   :  { %3464 = vmatpush2.bf16.msra.mxu0 %v6878_v45  ;;  %v6970_v45 = vld [vmem:[%s9784_s7 + $0x33c] ss:$56 sps:$4 sm:$0xff]  }
 0x437   :  { %3465 = vmatprep.subr.bf16.mxu0 %v6886_v34  ;;  %v6965_v34 = vld [vmem:[%s9784_s7 + $0x20] ss:$56 sps:$4 sm:$0xff]  }
 0x438   :  { %3501 = vmatpush1.bf16.msra.mxu1 %v6881_v10  ;;  %v6973_v10 = vld [vmem:[%s9784_s7 + $0x6b4] ss:$56 sps:$4 sm:$0xff]  }
 0x439   :  { %3502 = vmatprep.subr.bf16.mxu1 %v6889_v56  ;;  %v6968_v56 = vld [vmem:[%s9784_s7 + $0x338] ss:$56 sps:$4 sm:$0xff]  }
 0x43a   :  { %3466 = vmatpush2.bf16.msra.mxu0 %v6884_v36  ;;  %v6976_v36 = vld [vmem:[%s9784_s7 + $0x2cc] ss:$56 sps:$4 sm:$0xff]  }
 0x43b   :  { %3382 = vmatmul.mubr.bf16.gmra.mxu1 %v8785_v20  ;;  %3467 = vmatprep.subr.bf16.mxu0 %v6892_v30  ;;  %v6971_v30 = vld [vmem:[%s9784_s7 + $0x6b0] ss:$56 sps:$4 sm:$0xff]  }
 0x43c   :  { %3503 = vmatpush1.bf16.msra.mxu1 %v6887_v60  ;;  %3530 = vmatprep.mubr.bf16.mxu1 %v9830_v48  ;;  %v6979_v60 = vld [vmem:[%s9784_s7 + $0x644] ss:$56 sps:$4 sm:$0xff]  }
 0x43d   :  { %3504 = vmatprep.subr.bf16.mxu1 %v6895_v3  ;;  %v6974_v3 = vld [vmem:[%s9784_s7 + $0x2c8] ss:$56 sps:$4 sm:$0xff]  }
 0x43e   :  { %3468 = vmatpush2.bf16.msra.mxu0 %v6890_v21  ;;  %v6982_v21 = vld [vmem:[%s9784_s7 + $0x25c] ss:$56 sps:$4 sm:$0xff]  }
 0x43f   :  { %3469 = vmatprep.subr.bf16.mxu0 %v6898_v62  ;;  %v6977_v62 = vld [vmem:[%s9784_s7 + $0x640] ss:$56 sps:$4 sm:$0xff]  }
 0x440   :  { %3505 = vmatpush1.bf16.msra.mxu1 %v6893_v61  ;;  %v6985_v61 = vld [vmem:[%s9784_s7 + $0x5d4] ss:$56 sps:$4 sm:$0xff]  }
 0x441   :  { %3506 = vmatprep.subr.bf16.mxu1 %v6901_v38  ;;  %v6980_v38 = vld [vmem:[%s9784_s7 + $0x258] ss:$56 sps:$4 sm:$0xff]  }
 0x442   :  { %3470 = vmatpush2.bf16.msra.mxu0 %v6896_v42  ;;  %v6988_v42 = vld [vmem:[%s9784_s7 + $0x1ec] ss:$56 sps:$4 sm:$0xff]  }
 0x443   :  { %3471 = vmatprep.subr.bf16.mxu0 %v6904_v7  ;;  %v6983_v7 = vld [vmem:[%s9784_s7 + $0x5d0] ss:$56 sps:$4 sm:$0xff]  }
 0x444   :  { %3507 = vmatpush1.bf16.msra.mxu1 %v6899_v26  ;;  %v6991_v26 = vld [vmem:[%s9784_s7 + $0x564] ss:$56 sps:$4 sm:$0xff]  }
 0x445   :  { %3508 = vmatprep.subr.bf16.mxu1 %v6907_v39  ;;  %v6986_v39 = vld [vmem:[%s9784_s7 + $0x1e8] ss:$56 sps:$4 sm:$0xff]  }
 0x446   :  { %3472 = vmatpush2.bf16.msra.mxu0 %v6902_v52  ;;  %v6994_v52 = vld [vmem:[%s9784_s7 + $0x17c] ss:$56 sps:$4 sm:$0xff]  }
 0x447   :  { %3473 = vmatprep.subr.bf16.mxu0 %v6910_v35  ;;  %v6989_v35 = vld [vmem:[%s9784_s7 + $0x560] ss:$56 sps:$4 sm:$0xff]  }
 0x448   :  { %3509 = vmatpush1.bf16.msra.mxu1 %v6905_v12  ;;  %v6997_v12 = vld [vmem:[%s9784_s7 + $0x4f4] ss:$56 sps:$4 sm:$0xff]  }
 0x449   :  { %3510 = vmatprep.subr.bf16.mxu1 %v6913_v4  ;;  %v6992_v4 = vld [vmem:[%s9784_s7 + $0x178] ss:$56 sps:$4 sm:$0xff]  }
 0x44a   :  { %3474 = vmatpush2.bf16.msra.mxu0 %v6908_v24  ;;  %v7000_v24 = vld [vmem:[%s9784_s7 + $0x10c] ss:$56 sps:$4 sm:$0xff]  }
 0x44b   :  { %3475 = vmatprep.subr.bf16.mxu0 %v6916_v32  ;;  %v6995_v32 = vld [vmem:[%s9784_s7 + $0x4f0] ss:$56 sps:$4 sm:$0xff]  }
 0x44c   :  { %3511 = vmatpush1.bf16.msra.mxu1 %v6911_v1  ;;  %v7003_v1 = vld [vmem:[%s9784_s7 + $0x484] ss:$56 sps:$4 sm:$0xff]  }
 0x44d   :  { %3512 = vmatprep.subr.bf16.mxu1 %v6919_v53  ;;  %v6998_v53 = vld [vmem:[%s9784_s7 + $0x108] ss:$56 sps:$4 sm:$0xff]  }
 0x44e   :  { %3476 = vmatpush2.bf16.msra.mxu0 %v6914_v51  ;;  %v7006_v51 = vld [vmem:[%s9784_s7 + $0x9c] ss:$56 sps:$4 sm:$0xff]  }
 0x44f   :  { %3604 = vmatprep.subr.bf16.mxu0 %v6922_v9  ;;  %v7001_v9 = vld [vmem:[%s9784_s7 + $0x480] ss:$56 sps:$4 sm:$0xff]  }
 0x450   :  { %3513 = vmatpush1.bf16.msra.mxu1 %v6917_v16  ;;  %v7009_v16 = vld [vmem:[%s9784_s7 + $0x414] ss:$56 sps:$4 sm:$0xff]  }
 0x451   :  { %3478 = vmatmul.mubr.bf16.vlgmr.msra.gmra.mxu0 %v8646_v6  ;;  %3551 = vmatprep.subr.bf16.mxu1 %v6925_v40  ;;  %v7004_v40 = vld [vmem:[%s9784_s7 + $0x98] ss:$56 sps:$4 sm:$0xff]  }
 0x452   :  { %3487 = vmatprep.mubr.bf16.mxu0 %v8782_v23  ;;  %3605 = vmatpush1.bf16.msra.mxu0 %v6920_v49  ;;  %v7012_v49 = vld [vmem:[%s9784_s7 + $0x2c] ss:$56 sps:$4 sm:$0xff]  }
 0x453   :  { %3531 = vmatmul.mubr.bf16.vlgmr.msra.gmra.mxu1 %v8635_v13  ;;  %3606 = vmatprep.subr.bf16.mxu0 %v6928_v14  ;;  %v7007_v14 = vld [vmem:[%s9784_s7 + $0x410] ss:$56 sps:$4 sm:$0xff]  }
 0x454   :  { %3552 = vmatpush1.bf16.msra.mxu1 %v6923_v15  ;;  %3540 = vmatprep.mubr.bf16.mxu1 %v9830_v48  ;;  %v7015_v15 = vld [vmem:[%s9784_s7 + $0x3a4] ss:$56 sps:$4 sm:$0xff]  }
 0x455   :  { %3553 = vmatprep.subr.bf16.mxu1 %v6931_v2  ;;  %v7010_v2 = vld [vmem:[%s9784_s7 + $0x28] ss:$56 sps:$4 sm:$0xff]  }
 0x456   :  { %3607 = vmatpush1.bf16.msra.mxu0 %v6926_v41  ;;  %v7018_v41 = vld [vmem:[%s9784_s7 + $0x6bc] ss:$56 sps:$4 sm:$0xff]  }
 0x457   :  { %3608 = vmatprep.subr.bf16.mxu0 %v6934_v37  ;;  %v7013_v37 = vld [vmem:[%s9784_s7 + $0x3a0] ss:$56 sps:$4 sm:$0xff]  }
 0x458   :  { %3554 = vmatpush1.bf16.msra.mxu1 %v6929_v63  ;;  %v7021_v63 = vld [vmem:[%s9784_s7 + $0xa3c] ss:$56 sps:$4 sm:$0xff]  }
 0x459   :  { %3488 = vmatmul.mubr.bf16.gmra.mxu0 %v8785_v20  ;;  %3555 = vmatprep.subr.bf16.mxu1 %v6937_v17  ;;  %v7016_v17 = vld [vmem:[%s9784_s7 + $0x6b8] ss:$56 sps:$4 sm:$0xff]  }
 0x45a   :  { %3609 = vmatpush1.bf16.msra.mxu0 %v6932_v43  ;;  %3636 = vmatprep.mubr.bf16.mxu0 %v9830_v48  ;;  %v7024_v43 = vld [vmem:[%s9784_s7 + $0x64c] ss:$56 sps:$4 sm:$0xff]  }
 0x45b   :  { %3541 = vmatmul.mubr.bf16.gmra.mxu1 %v8774_v50  ;;  %3610 = vmatprep.subr.bf16.mxu0 %v6940_v8  ;;  %v7019_v8 = vld [vmem:[%s9784_s7 + $0xa38] ss:$56 sps:$4 sm:$0xff]  }
 0x45c   :  { %3556 = vmatpush1.bf16.msra.mxu1 %v6935_v11  ;;  %3583 = vmatprep.mubr.bf16.mxu1 %v8640_v0  ;;  %v7027_v11 = vld [vmem:[%s9784_s7 + $0x9cc] ss:$56 sps:$4 sm:$0xff]  }
 0x45d   :  { %3557 = vmatprep.subr.bf16.mxu1 %v6943_v47  ;;  %v7022_v47 = vld [vmem:[%s9784_s7 + $0x648] ss:$56 sps:$4 sm:$0xff]  }
 0x45e   :  { %3611 = vmatpush1.bf16.msra.mxu0 %v6938_v19  ;;  %v7030_v19 = vld [vmem:[%s9784_s7 + $0x5dc] ss:$56 sps:$4 sm:$0xff]  }
 0x45f   :  { %3612 = vmatprep.subr.bf16.mxu0 %v6946_v44  ;;  %v7025_v44 = vld [vmem:[%s9784_s7 + $0x9c8] ss:$56 sps:$4 sm:$0xff]  }
 0x460   :  { %3558 = vmatpush1.bf16.msra.mxu1 %v6941_v18  ;;  %v7033_v18 = vld [vmem:[%s9784_s7 + $0x95c] ss:$56 sps:$4 sm:$0xff]  }
 0x461   :  { %3559 = vmatprep.subr.bf16.mxu1 %v6949_v22  ;;  %v7028_v22 = vld [vmem:[%s9784_s7 + $0x5d8] ss:$56 sps:$4 sm:$0xff]  }
 0x462   :  { %3613 = vmatpush1.bf16.msra.mxu0 %v6944_v27  ;;  %v7036_v27 = vld [vmem:[%s9784_s7 + $0x56c] ss:$56 sps:$4 sm:$0xff]  }
 0x463   :  { %3614 = vmatprep.subr.bf16.mxu0 %v6952_v54  ;;  %v7031_v54 = vld [vmem:[%s9784_s7 + $0x958] ss:$56 sps:$4 sm:$0xff]  }
 0x464   :  { %3560 = vmatpush1.bf16.msra.mxu1 %v6947_v25  ;;  %v7039_v25 = vld [vmem:[%s9784_s7 + $0x8ec] ss:$56 sps:$4 sm:$0xff]  }
 0x465   :  { %3561 = vmatprep.subr.bf16.mxu1 %v6955_v46  ;;  %v7034_v46 = vld [vmem:[%s9784_s7 + $0x568] ss:$56 sps:$4 sm:$0xff]  }
 0x466   :  { %3615 = vmatpush1.bf16.msra.mxu0 %v6950_v28  ;;  %v7042_v28 = vld [vmem:[%s9784_s7 + $0x4fc] ss:$56 sps:$4 sm:$0xff]  }
 0x467   :  { %3616 = vmatprep.subr.bf16.mxu0 %v6958_v55  ;;  %v7037_v55 = vld [vmem:[%s9784_s7 + $0x8e8] ss:$56 sps:$4 sm:$0xff]  }
 0x468   :  { %3562 = vmatpush1.bf16.msra.mxu1 %v6953_v29  ;;  %v7045_v29 = vld [vmem:[%s9784_s7 + $0x87c] ss:$56 sps:$4 sm:$0xff]  }
 0x469   :  { %3563 = vmatprep.subr.bf16.mxu1 %v6961_v31  ;;  %v7040_v31 = vld [vmem:[%s9784_s7 + $0x4f8] ss:$56 sps:$4 sm:$0xff]  }
 0x46a   :  { %3617 = vmatpush1.bf16.msra.mxu0 %v6956_v59  ;;  %v7048_v59 = vld [vmem:[%s9784_s7 + $0x48c] ss:$56 sps:$4 sm:$0xff]  }
 0x46b   :  { %3618 = vmatprep.subr.bf16.mxu0 %v6964_v5  ;;  %v7043_v5 = vld [vmem:[%s9784_s7 + $0x878] ss:$56 sps:$4 sm:$0xff]  }
 0x46c   :  { %3564 = vmatpush1.bf16.msra.mxu1 %v6959_v57  ;;  %v7051_v57 = vld [vmem:[%s9784_s7 + $0x80c] ss:$56 sps:$4 sm:$0xff]  }
 0x46d   :  { %3565 = vmatprep.subr.bf16.mxu1 %v6967_v58  ;;  %v7046_v58 = vld [vmem:[%s9784_s7 + $0x488] ss:$56 sps:$4 sm:$0xff]  }
 0x46e   :  { %3619 = vmatpush1.bf16.msra.mxu0 %v6962_v33  ;;  %v7054_v33 = vld [vmem:[%s9784_s7 + $0x41c] ss:$56 sps:$4 sm:$0xff]  }
 0x46f   :  { %3657 = vmatprep.subr.bf16.mxu0 %v6970_v45  ;;  %v7049_v45 = vld [vmem:[%s9784_s7 + $0x808] ss:$56 sps:$4 sm:$0xff]  }
 0x470   :  { %3566 = vmatpush1.bf16.msra.mxu1 %v6965_v34  ;;  %v7057_v34 = vld [vmem:[%s9784_s7 + $0x79c] ss:$56 sps:$4 sm:$0xff]  }
 0x471   :  { %3637 = vmatmul.mubr.bf16.vlgmr.msra.gmra.mxu0 %v8635_v13  ;;  %3567 = vmatprep.subr.bf16.mxu1 %v6973_v10  ;;  %v7052_v10 = vld [vmem:[%s9784_s7 + $0x418] ss:$56 sps:$4 sm:$0xff]  }
 0x472   :  { %3658 = vmatpush1.bf16.msra.mxu0 %v6968_v56  ;;  %3646 = vmatprep.mubr.bf16.mxu0 %v9830_v48  ;;  %v7060_v56 = vld [vmem:[%s9784_s7 + $0x3ac] ss:$56 sps:$4 sm:$0xff]  }
 0x473   :  { %3659 = vmatprep.subr.bf16.mxu0 %v6976_v36  ;;  %v7055_v36 = vld [vmem:[%s9784_s7 + $0x798] ss:$56 sps:$4 sm:$0xff]  }
 0x474   :  { %3568 = vmatpush2.bf16.msra.mxu1 %v6971_v30  ;;  %v7063_v30 = vld [vmem:[%s9784_s7 + $0x72c] ss:$56 sps:$4 sm:$0xff]  }
 0x475   :  { %3569 = vmatprep.subr.bf16.mxu1 %v6979_v60  ;;  %v7058_v60 = vld [vmem:[%s9784_s7 + $0x3a8] ss:$56 sps:$4 sm:$0xff]  }
 0x476   :  { %3660 = vmatpush1.bf16.msra.mxu0 %v6974_v3  ;;  %v7066_v3 = vld [vmem:[%s9784_s7 + $0xa44] ss:$56 sps:$4 sm:$0xff]  }
 0x477   :  { %3661 = vmatprep.subr.bf16.mxu0 %v6982_v21  ;;  %v7061_v21 = vld [vmem:[%s9784_s7 + $0x728] ss:$56 sps:$4 sm:$0xff]  }
 0x478   :  { %3570 = vmatpush2.bf16.msra.mxu1 %v6977_v62  ;;  %v7069_v62 = vld [vmem:[%s9784_s7 + $0x344] ss:$56 sps:$4 sm:$0xff]  }
 0x479   :  { %3647 = vmatmul.mubr.bf16.gmra.mxu0 %v8774_v50  ;;  %3571 = vmatprep.subr.bf16.mxu1 %v6985_v61  ;;  %v7064_v61 = vld [vmem:[%s9784_s7 + $0xa40] ss:$56 sps:$4 sm:$0xff]  }
 0x47a   :  { %3662 = vmatpush1.bf16.msra.mxu0 %v6980_v38  ;;  %3689 = vmatprep.mubr.bf16.mxu0 %v8640_v0  ;;  %v7072_v38 = vld [vmem:[%s9784_s7 + $0x9d4] ss:$56 sps:$4 sm:$0xff]  }
 0x47b   :  { %3663 = vmatprep.subr.bf16.mxu0 %v6988_v42  ;;  %v7067_v42 = vld [vmem:[%s9784_s7 + $0x340] ss:$56 sps:$4 sm:$0xff]  }
 0x47c   :  { %3572 = vmatpush2.bf16.msra.mxu1 %v6983_v7  ;;  %v7075_v7 = vld [vmem:[%s9784_s7 + $0x2d4] ss:$56 sps:$4 sm:$0xff]  }
 0x47d   :  { %3573 = vmatprep.subr.bf16.mxu1 %v6991_v26  ;;  %v7070_v26 = vld [vmem:[%s9784_s7 + $0x9d0] ss:$56 sps:$4 sm:$0xff]  }
 0x47e   :  { %3664 = vmatpush1.bf16.msra.mxu0 %v6986_v39  ;;  %v7078_v39 = vld [vmem:[%s9784_s7 + $0x964] ss:$56 sps:$4 sm:$0xff]  }
 0x47f   :  { %3665 = vmatprep.subr.bf16.mxu0 %v6994_v52  ;;  %v7073_v52 = vld [vmem:[%s9784_s7 + $0x2d0] ss:$56 sps:$4 sm:$0xff]  }
 0x480   :  { %3574 = vmatpush2.bf16.msra.mxu1 %v6989_v35  ;;  %v7081_v35 = vld [vmem:[%s9784_s7 + $0x264] ss:$56 sps:$4 sm:$0xff]  }
 0x481   :  { %3575 = vmatprep.subr.bf16.mxu1 %v6997_v12  ;;  %v9433_v12 = vpop.f32.mrf.mxu1 }
 0x482   :  { %3666 = vmatpush1.bf16.msra.mxu0 %v6992_v4  ;;  %v7076_v4 = vld [vmem:[%s9784_s7 + $0x960] ss:$56 sps:$4 sm:$0xff]  }
 0x483   :  { %3667 = vmatprep.subr.bf16.mxu0 %v7000_v24  ;;  %v7084_v24 = vld [vmem:[%s9784_s7 + $0x8f4] ss:$56 sps:$4 sm:$0xff]  }
 0x484   :  { %3576 = vmatpush2.bf16.msra.mxu1 %v6995_v32  ;;  %v9441_v32 = vpop.f32.mrf.mxu0 }
 0x485   :  { %3577 = vmatprep.subr.bf16.mxu1 %v7003_v1  ;;  %v7079_v1 = vld [vmem:[%s9784_s7 + $0x260] ss:$56 sps:$4 sm:$0xff]  }
 0x486   :  { %3668 = vmatpush1.bf16.msra.mxu0 %v6998_v53  ;;  %v7087_v53 = vld [vmem:[%s9784_s7 + $0x1f4] ss:$56 sps:$4 sm:$0xff]  }
 0x487   :  { %3669 = vmatprep.subr.bf16.mxu0 %v7006_v51  ;;  %v3163_v51 = vpop.f32.mrf.mxu1 }
 0x488   :  { %3578 = vmatpush2.bf16.msra.mxu1 %v7001_v9  ;;  %v7082_v9 = vld [vmem:[%s9784_s7 + $0x8f0] ss:$56 sps:$4 sm:$0xff]  }
 0x489   :  { %3579 = vmatprep.subr.bf16.mxu1 %v7009_v16  ;;  %v7090_v16 = vld [vmem:[%s9784_s7 + $0x884] ss:$56 sps:$4 sm:$0xff]  }
 0x48a   :  { %3670 = vmatpush1.bf16.msra.mxu0 %v7004_v40  ;;  %v3216_v40 = vpop.f32.mrf.mxu0 }
 0x48b   :  { %3671 = vmatprep.subr.bf16.mxu0 %v7012_v49  ;;  %v7085_v49 = vld [vmem:[%s9784_s7 + $0x1f0] ss:$56 sps:$4 sm:$0xff]  }
 0x48c   :  { %3580 = vmatpush2.bf16.msra.mxu1 %v7007_v14  ;;  %v7093_v14 = vld [vmem:[%s9784_s7 + $0x184] ss:$56 sps:$4 sm:$0xff]  }
 0x48d   :  { %3581 = vmatprep.subr.bf16.mxu1 %v7015_v15  ;;  %v9465_v15 = vpop.f32.mrf.mxu1 }
 0x48e   :  { %3672 = vmatpush1.bf16.msra.mxu0 %v7010_v2  ;;  %v7088_v2 = vld [vmem:[%s9784_s7 + $0x880] ss:$56 sps:$4 sm:$0xff]  }
 0x48f   :  { %3673 = vmatprep.subr.bf16.mxu0 %v7018_v41  ;;  %v9473_v41 = vpop.f32.mrf.mxu0 }
 0x490   :  { %3582 = vmatpush2.bf16.msra.mxu1 %v7013_v37  ;;  %v7091_v37 = vld [vmem:[%s9784_s7 + $0x180] ss:$56 sps:$4 sm:$0xff]  }
 0x491   :  { %3710 = vmatprep.subr.bf16.mxu1 %v7021_v63  ;;  %v7099_v63 = vld [vmem:[%s9784_s7 + $0x114] ss:$56 sps:$4 sm:$0xff]  }
 0x492   :  { %3674 = vmatpush2.bf16.msra.mxu0 %v7016_v17  ;;  %v3167_v17 = vpop.f32.mrf.mxu1 }
 0x493   :  { %3584 = vmatmul.mubr.bf16.vlgmr.msra.gmra.mxu1 %v8646_v6  ;;  %3675 = vmatprep.subr.bf16.mxu0 %v7024_v43  ;;  %v7094_v43 = vld [vmem:[%s9784_s7 + $0x810] ss:$56 sps:$4 sm:$0xff]  }
 0x494   :  { %3593 = vmatprep.mubr.bf16.mxu1 %v8782_v23  ;;  %3711 = vmatpush1.bf16.msra.mxu1 %v7019_v8  ;;  %v7102_v8 = vld [vmem:[%s9784_s7 + $0x7a4] ss:$56 sps:$4 sm:$0xff]  }
 0x495   :  { %3712 = vmatprep.subr.bf16.mxu1 %v7027_v11  ;;  %v3220_v11 = vpop.f32.mrf.mxu0 }
 0x496   :  { %3676 = vmatpush2.bf16.msra.mxu0 %v7022_v47  ;;  %v7097_v47 = vld [vmem:[%s9784_s7 + $0x110] ss:$56 sps:$4 sm:$0xff]  }
 0x497   :  { %3677 = vmatprep.subr.bf16.mxu0 %v7030_v19  ;;  %v3221_v19 = vadd.f32 %v3220_v11, %v3167_v17  ;;  %v7147_v17 = vld [vmem:[%s9784_s7 + $0x494] ss:$56 sps:$4 sm:$0xff]  }
 0x498   :  { %3713 = vmatpush1.bf16.msra.mxu1 %v7025_v44  ;;  %v7105_v44 = vld [vmem:[%s9784_s7 + $0xa4] ss:$56 sps:$4 sm:$0xff]  }
 0x499   :  { %3714 = vmatprep.subr.bf16.mxu1 %v7033_v18  ;;  %v7100_v18 = vld [vmem:[%s9784_s7 + $0x7a0] ss:$56 sps:$4 sm:$0xff]   ;;  %vm3884_vm1 = vcmp.ge.f32.partialorder %v3221_v19, 0.0  ;;  %v7150_v11 = vld [vmem:[#allocation3 + $0x14] ss:$8 sps:$4 sm:$0xff]  }
 0x49a   :  { %3678 = vmatpush2.bf16.msra.mxu0 %v7028_v22  ;;  %v3217_v22 = vadd.f32 %v3216_v40, %v3163_v51 }
 0x49b   :  { %3594 = vmatmul.mubr.bf16.gmra.mxu1 %v8785_v20  ;;  %3679 = vmatprep.subr.bf16.mxu0 %v7036_v27  ;;  %v7108_v27 = vld [vmem:[%s9784_s7 + $0x734] ss:$56 sps:$4 sm:$0xff]  }
 0x49c   :  { %3715 = vmatpush1.bf16.msra.mxu1 %v7031_v54  ;;  %3742 = vmatprep.mubr.bf16.mxu1 %v9830_v48  ;;  %vm3870_vm2 = vcmp.ge.f32.partialorder %v3217_v22, 0.0 }
 0x49d   :  { %3716 = vmatprep.subr.bf16.mxu1 %v7039_v25  ;;  %v7103_v25 = vld [vmem:[%s9784_s7 + $0xa0] ss:$56 sps:$4 sm:$0xff]  }
 0x49e   :  { %3680 = vmatpush2.bf16.msra.mxu0 %v7034_v46  ;;  %v3940_v46 = vmul.f32 0.2, %v3221_v19 }
 0x49f   :  { %3681 = vmatprep.subr.bf16.mxu0 %v7042_v28  ;;  %v7111_v28 = vld [vmem:[%s9784_s7 + $0x34] ss:$56 sps:$4 sm:$0xff]  }
 0x4a0   :  { %3717 = vmatpush1.bf16.msra.mxu1 %v7037_v55 }
 0x4a1   :  { %3718 = vmatprep.subr.bf16.mxu1 %v7045_v29  ;;  %v7106_v29 = vld [vmem:[%s9784_s7 + $0x730] ss:$56 sps:$4 sm:$0xff]  }
 0x4a2   :  { %3682 = vmatpush2.bf16.msra.mxu0 %v7040_v31  ;;  %v3926_v31 = vmul.f32 0.2, %v3217_v22 }
 0x4a3   :  { %3683 = vmatprep.subr.bf16.mxu0 %v7048_v59  ;;  %v7114_v59 = vld [vmem:[#allocation3 + $0x74] ss:$8 sps:$4 sm:$0xff]  }
 0x4a4   :  { %3719 = vmatpush1.bf16.msra.mxu1 %v7043_v5 }
 0x4a5   :  { %3720 = vmatprep.subr.bf16.mxu1 %v7051_v57  ;;  %v7109_v57 = vld [vmem:[%s9784_s7 + $0x30] ss:$56 sps:$4 sm:$0xff]  }
 0x4a6   :  { %3684 = vmatpush2.bf16.msra.mxu0 %v7046_v58  ;;  %v3996_v58 = vsel %vm3884_vm1, %v3221_v19, %v3940_v46  ;;  %v7145_v19 = vld [vmem:[%s9784_s7 + $0x490] ss:$56 sps:$4 sm:$0xff]  }
 0x4a7   :  { %3685 = vmatprep.subr.bf16.mxu0 %v7054_v33  ;;  %v7117_v33 = vld [vmem:[%s9784_s7 + $0x6c4] ss:$56 sps:$4 sm:$0xff]  }
 0x4a8   :  { %3721 = vmatpush1.bf16.msra.mxu1 %v7049_v45  ;;  %v9507_v55 = vpop.f32.mrf.mxu0 }
 0x4a9   :  { %3722 = vmatprep.subr.bf16.mxu1 %v7057_v34  ;;  %v7112_v34 = vld [vmem:[#allocation3 + $0x70] ss:$8 sps:$4 sm:$0xff]  }
 0x4aa   :  { %3686 = vmatpush2.bf16.msra.mxu0 %v7052_v10  ;;  %v9520_v45 = vpop.f32.mrf.mxu0  ;;  %v3982_v10 = vsel %vm3870_vm2, %v3217_v22, %v3926_v31  ;;  %v7148_v22 = vld [vmem:[#allocation3 + $0x10] ss:$8 sps:$4 sm:$0xff]   ;;  %v7159_v31 = vld [vmem:[%s9784_s7 + $0x3b4] ss:$56 sps:$4 sm:$0xff]  }
 0x4ab   :  { %3687 = vmatprep.subr.bf16.mxu0 %v7060_v56  ;;  %v9499_v54 = vpop.f32.mrf.mxu1  ;;  %v7120_v56 = vld [vmem:[#allocation3 + $0x64] ss:$8 sps:$4 sm:$0xff]  }
 0x4ac   :  { %3723 = vmatpush1.bf16.msra.mxu1 %v7055_v36  ;;  %v4052_v36 = vmul.f32 1.4142135, %v3996_v58 }
 0x4ad   :  { %3724 = vmatprep.subr.bf16.mxu1 %v7063_v30  ;;  %v9512_v5 = vpop.f32.mrf.mxu1 }
 0x4ae   :  { %3688 = vmatpush2.bf16.msra.mxu0 %v7058_v60  ;;  %v7115_v60 = vld [vmem:[%s9784_s7 + $0x6c0] ss:$56 sps:$4 sm:$0xff]  }
 0x4af   :  { %3816 = vmatprep.subr.bf16.mxu0 %v7066_v3  ;;  %v9522_v30 = vpop.f32.mrf.mxu1  ;;  %v7123_v3 = vld [vmem:[%s9784_s7 + $0x654] ss:$56 sps:$4 sm:$0xff]  }
 0x4b0   :  { %3725 = vmatpush1.bf16.msra.mxu1 %v7061_v21  ;;  %v4038_v21 = vmul.f32 1.4142135, %v3982_v10  ;;  %v7157_v10 = vld [vmem:[%s9784_s7 + $0x3b0] ss:$56 sps:$4 sm:$0xff]  }
 0x4b1   :  { %3690 = vmatmul.mubr.bf16.vlgmr.msra.gmra.mxu0 %v8646_v6  ;;  %3763 = vmatprep.subr.bf16.mxu1 %v7069_v62  ;;  %v9531_v62 = vpop.f32.mrf.mxu0 }
 0x4b2   :  { %3699 = vmatprep.mubr.bf16.mxu0 %v8782_v23  ;;  %3817 = vmatpush1.bf16.msra.mxu0 %v7064_v61  ;;  %v7118_v61 = vld [vmem:[#allocation3 + $0x60] ss:$8 sps:$4 sm:$0xff]  }
 0x4b3   :  { %3743 = vmatmul.mubr.bf16.vlgmr.msra.gmra.mxu1 %v8635_v13  ;;  %3818 = vmatprep.subr.bf16.mxu0 %v7072_v38  ;;  %v7126_v38 = vld [vmem:[#allocation3 + $0x54] ss:$8 sps:$4 sm:$0xff]  }
 0x4b4   :  { %3764 = vmatpush1.bf16.msra.mxu1 %v7067_v42  ;;  %3752 = vmatprep.mubr.bf16.mxu1 %v9830_v48  ;;  %v6332_v42 = vclamps-f32 %v4052_v36, 256.0  ;;  %v7165_v36 = vld [vmem:[#allocation3 + $0x174] ss:$8 sps:$4 sm:$0xff]  }
 0x4b5   :  { %3765 = vmatprep.subr.bf16.mxu1 %v7075_v7  ;;  %v9534_v7 = vpop.f32.mrf.mxu1 }
 0x4b6   :  { %3819 = vmatpush1.bf16.msra.mxu0 %v7070_v26  ;;  %v7129_v26 = vld [vmem:[%s9784_s7 + $0x5e4] ss:$56 sps:$4 sm:$0xff]  }
 0x4b7   :  { %3820 = vmatprep.subr.bf16.mxu0 %v7078_v39  ;;  %v6318_v39 = vclamps-f32 %v4038_v21, 256.0 }
 0x4b8   :  { %3766 = vmatpush1.bf16.msra.mxu1 %v7073_v52  ;;  %v9542_v52 = vpop.f32.mrf.mxu0 }
 0x4b9   :  { %3700 = vmatmul.mubr.bf16.gmra.mxu0 %v8785_v20  ;;  %3767 = vmatprep.subr.bf16.mxu1 %v7081_v35  ;;  %v7132_v35 = vld [vmem:[#allocation3 + $0x44] ss:$8 sps:$4 sm:$0xff]  }
 0x4ba   :  { %3821 = vmatpush1.bf16.msra.mxu0 %v7076_v4  ;;  %3848 = vmatprep.mubr.bf16.mxu0 %v9830_v48  ;;  %v9544_v4 = vpop.f32.mrf.mxu1  ;;  %v9553_v51 = vpop.f32.mrf.mxu0 }
 0x4bb   :  { %3753 = vmatmul.mubr.bf16.gmra.mxu1 %v8774_v50  ;;  %3822 = vmatprep.subr.bf16.mxu0 %v7084_v24  ;;  %v4206_v24 = vpack.c.bf16 %v6332_v42, %v6318_v39  ;;  %v7163_v42 = vld [vmem:[#allocation3 + $0x170] ss:$8 sps:$4 sm:$0xff]  }
 0x4bc   :  { %3768 = vmatpush1.bf16.msra.mxu1 %v7079_v1  ;;  %3795 = vmatprep.mubr.bf16.mxu1 %v8640_v0  ;;  %v7096_v0 = vld [vmem:[%s9784_s7 + $0x814] ss:$56 sps:$4 sm:$0xff]   ;;  %v7127_v1 = vld [vmem:[%s9784_s7 + $0x5e0] ss:$56 sps:$4 sm:$0xff]   ;;  %v3322_v40 = vpop.f32.mrf.mxu1 }
 0x4bd   :  { %3769 = vmatprep.subr.bf16.mxu1 %v7087_v53  ;;  %v7135_v53 = vld [vmem:[%s9784_s7 + $0x574] ss:$56 sps:$4 sm:$0xff]  }
 0x4be   :  { %3823 = vmatpush1.bf16.msra.mxu0 %v7082_v9  ;;  %v7130_v9 = vld [vmem:[#allocation3 + $0x40] ss:$8 sps:$4 sm:$0xff]  }
 0x4bf   :  { %3824 = vmatprep.subr.bf16.mxu0 %v7090_v16  ;;  %v7138_v16 = vld [vmem:[#allocation3 + $0x34] ss:$8 sps:$4 sm:$0xff]  }
 0x4c0   :  { %3770 = vmatpush1.bf16.msra.mxu1 %v7085_v49  ;;  %v7133_v49 = vld [vmem:[%s9784_s7 + $0x570] ss:$56 sps:$4 sm:$0xff]  }
 0x4c1   :  { %3771 = vmatprep.subr.bf16.mxu1 %v7093_v14  ;;  %v3269_v14 = vpop.f32.mrf.mxu0 }
 0x4c2   :  { %3825 = vmatpush1.bf16.msra.mxu0 %v7088_v2  ;;  %v7136_v2 = vld [vmem:[#allocation3 + $0x30] ss:$8 sps:$4 sm:$0xff]  }
 0x4c3   :  { %3826 = vmatprep.subr.bf16.mxu0 %v7096_v0  ;;  %v7144_v0 = vld [vmem:[#allocation3 + $0x24] ss:$8 sps:$4 sm:$0xff]  }
 0x4c4   :  { %3772 = vmatpush1.bf16.msra.mxu1 %v7091_v37  ;;  %v9561_v37 = vpop.f32.mrf.mxu1 }
 0x4c5   :  { %3773 = vmatprep.subr.bf16.mxu1 %v7099_v63  ;;  %v7139_v63 = vld [vmem:[%s9784_s7 + $0x500] ss:$56 sps:$4 sm:$0xff]  }
 0x4c6   :  { %3827 = vmatpush1.bf16.msra.mxu0 %v7094_v43  ;;  %v9569_v43 = vpop.f32.mrf.mxu0 }
 0x4c7   :  { %3828 = vmatprep.subr.bf16.mxu0 %v7102_v8  ;;  %v7142_v8 = vld [vmem:[#allocation3 + $0x20] ss:$8 sps:$4 sm:$0xff]  }
 0x4c8   :  { %3774 = vmatpush1.bf16.msra.mxu1 %v7097_v47  ;;  %v3326_v47 = vpop.f32.mrf.mxu1 }
 0x4c9   :  { %3775 = vmatprep.subr.bf16.mxu1 %v7105_v44  ;;  %v7153_v44 = vld [vmem:[%s9784_s7 + $0x424] ss:$56 sps:$4 sm:$0xff]  }
 0x4ca   :  { %3829 = vmatpush1.bf16.msra.mxu0 %v7100_v18  ;;  %v3273_v18 = vpop.f32.mrf.mxu0  ;;  %v9577_v46 = vpop.f32.mrf.mxu1 }
 0x4cb   :  { %3830 = vmatprep.subr.bf16.mxu0 %v7108_v27  ;;  %v3327_v27 = vadd.f32 %v3326_v47, %v3273_v18  ;;  %v3215_v47 = vadd.f32 %v9441_v32, %v9433_v12  ;;  %v7184_v12 = vld [vmem:[#allocation3 + $0xb0] ss:$8 sps:$4 sm:$0xff]  }
 0x4cc   :  { %3776 = vmatpush1.bf16.msra.mxu1 %v7103_v25  ;;  %v7156_v25 = vld [vmem:[#allocation3 + $0x4] ss:$8 sps:$4 sm:$0xff]  }
 0x4cd   :  { %3777 = vmatprep.subr.bf16.mxu1 %v7111_v28  ;;  %v7151_v28 = vld [vmem:[%s9784_s7 + $0x420] ss:$56 sps:$4 sm:$0xff]   ;;  %v3942_v58 = vmul.f32 0.2, %v3327_v27  ;;  %vm3886_vm3 = vcmp.ge.f32.partialorder %v3327_v27, 0.0  ;;  %vm3869_vm5 = vcmp.ge.f32.partialorder %v3215_v47, 0.0 }
 0x4ce   :  { %3831 = vmatpush1.bf16.msra.mxu0 %v7106_v29  ;;  %v3323_v29 = vadd.f32 %v3322_v40, %v3269_v14  ;;  %v7172_v14 = vld [vmem:[#allocation3 + $0xd0] ss:$8 sps:$4 sm:$0xff]   ;;  %v3925_v32 = vmul.f32 0.2, %v3215_v47 }
 0x4cf   :  { %5577 = vmatprep.subr.bf16.mxu0 %v7114_v59  ;;  %v9585_v59 = vpop.f32.mrf.mxu0  ;;  %v3998_v21 = vsel %vm3886_vm3, %v3327_v27, %v3942_v58  ;;  %v3231_v27 = vadd.f32 %v9542_v52, %v9534_v7  ;;  %v7195_v52 = vld [vmem:[#allocation3 + $0x124] ss:$8 sps:$4 sm:$0xff]   ;;  %v7190_v58 = vld [vmem:[#allocation3 + $0xa0] ss:$8 sps:$4 sm:$0xff]  }
 0x4d0   :  { %3778 = vmatpush1.bf16.msra.mxu1 %v7109_v57  ;;  %v7154_v57 = vld [vmem:[#allocation3] ss:$8 sps:$4 sm:$0xff]   ;;  %vm3872_vm4 = vcmp.ge.f32.partialorder %v3323_v29, 0.0  ;;  %v4054_v39 = vmul.f32 1.4142135, %v3998_v21 }
 0x4d1   :  { %3849 = vmatmul.mubr.bf16.vlgmr.msra.gmra.mxu0 %v8635_v13  ;;  %3779 = vmatprep.subr.bf16.mxu1 %v7117_v33  ;;  %v7121_v13 = vld [vmem:[%s9784_s7 + $0x650] ss:$56 sps:$4 sm:$0xff]   ;;  %v7162_v33 = vld [vmem:[#allocation3 + $0xf4] ss:$8 sps:$4 sm:$0xff]   ;;  %v3968_v7 = vmul.f32 0.2, %v3231_v27 }
 0x4d2   :  { %5578 = vmatpush1.bf16.msra.mxu0 %v7112_v34  ;;  %3858 = vmatprep.mubr.bf16.mxu0 %v9830_v48  ;;  %v7124_v48 = vld [vmem:[#allocation3 + $0x50] ss:$8 sps:$4 sm:$0xff]   ;;  %v9587_v34 = vpop.f32.mrf.mxu1  ;;  %v6334_v40 = vclamps-f32 %v4054_v39, 256.0  ;;  %vm3912_vm7 = vcmp.ge.f32.partialorder %v3231_v27, 0.0 }
 0x4d3   :  { %5579 = vmatprep.subr.bf16.mxu0 %v7120_v56  ;;  %v3928_v56 = vmul.f32 0.2, %v3323_v29  ;;  %v4024_v21 = vsel %vm3912_vm7, %v3231_v27, %v3968_v7  ;;  %v7196_v39 = vld [vmem:[#allocation3 + $0x90] ss:$8 sps:$4 sm:$0xff]  }
 0x4d4   :  { %3780 = vmatpush2.bf16.msra.mxu1 %v7115_v60  ;;  %v9592_v60 = vpop.f32.mrf.mxu0 }
 0x4d5   :  { %3781 = vmatprep.subr.bf16.mxu1 %v7123_v3  ;;  %v7160_v3 = vld [vmem:[#allocation3 + $0xf0] ss:$8 sps:$4 sm:$0xff]  }
 0x4d6   :  { %5580 = vmatpush1.bf16.msra.mxu0 %v7118_v61  ;;  %v7168_v61 = vld [vmem:[#allocation3 + $0xe4] ss:$8 sps:$4 sm:$0xff]  }
 0x4d7   :  { %5581 = vmatprep.subr.bf16.mxu0 %v7126_v38  ;;  %v9594_v38 = vpop.f32.mrf.mxu1 }
 0x4d8   :  { %3782 = vmatpush2.bf16.msra.mxu1 %v7121_v13  ;;  %v3984_v13 = vsel %vm3872_vm4, %v3323_v29, %v3928_v56  ;;  %v7192_v29 = vld [vmem:[#allocation3 + $0xa4] ss:$8 sps:$4 sm:$0xff]   ;;  %v3229_v56 = vadd.f32 %v9531_v62, %v9522_v30  ;;  %v4080_v62 = vmul.f32 1.4142135, %v4024_v21 }
 0x4d9   :  { %3859 = vmatmul.mubr.bf16.gmra.mxu0 %v8774_v50  ;;  %3783 = vmatprep.subr.bf16.mxu1 %v7129_v26  ;;  %v7141_v50 = vld [vmem:[%s9784_s7 + $0x504] ss:$56 sps:$4 sm:$0xff]  }
 0x4da   :  { %5582 = vmatpush1.bf16.msra.mxu0 %v7124_v48  ;;  %5609 = vmatprep.mubr.bf16.mxu0 %v4206_v24  ;;  %v7171_v26 = vld [vmem:[#allocation3 + $0x164] ss:$8 sps:$4 sm:$0xff]   ;;  %v9596_v48 = vpop.f32.mrf.mxu0  ;;  %v7174_v24 = vld [vmem:[#allocation3 + $0xd4] ss:$8 sps:$4 sm:$0xff]   ;;  %v3967_v30 = vmul.f32 0.2, %v3229_v56 }
 0x4db   :  { %5583 = vmatprep.subr.bf16.mxu0 %v7132_v35  ;;  %v7166_v35 = vld [vmem:[#allocation3 + $0xe0] ss:$8 sps:$4 sm:$0xff]   ;;  %vm3911_vm9 = vcmp.ge.f32.partialorder %v3229_v56, 0.0 }
 0x4dc   :  { %3784 = vmatpush2.bf16.msra.mxu1 %v7127_v1  ;;  %v4040_v1 = vmul.f32 1.4142135, %v3984_v13 }
 0x4dd   :  { %3785 = vmatprep.subr.bf16.mxu1 %v7135_v53  ;;  %v9599_v53 = vpop.f32.mrf.mxu1 }
 0x4de   :  { %5584 = vmatpush1.bf16.msra.mxu0 %v7130_v9  ;;  %v7169_v9 = vld [vmem:[#allocation3 + $0x160] ss:$8 sps:$4 sm:$0xff]  }
 0x4df   :  { %5585 = vmatprep.subr.bf16.mxu0 %v7138_v16  ;;  %v7177_v16 = vld [vmem:[#allocation3 + $0x154] ss:$8 sps:$4 sm:$0xff]  }
 0x4e0   :  { %3786 = vmatpush2.bf16.msra.mxu1 %v7133_v49  ;;  %v9602_v49 = vpop.f32.mrf.mxu0 }
 0x4e1   :  { %3787 = vmatprep.subr.bf16.mxu1 %v7141_v50 }
 0x4e2   :  { %5586 = vmatpush1.bf16.msra.mxu0 %v7136_v2  ;;  %v6320_v2 = vclamps-f32 %v4040_v1, 256.0 }
 0x4e3   :  { %5587 = vmatprep.subr.bf16.mxu0 %v7144_v0  ;;  %v9606_v0 = vpop.f32.mrf.mxu0 }
 0x4e4   :  { %3788 = vmatpush2.bf16.msra.mxu1 %v7139_v63  ;;  %v7175_v63 = vld [vmem:[#allocation3 + $0x150] ss:$8 sps:$4 sm:$0xff]  }
 0x4e5   :  { %3789 = vmatprep.subr.bf16.mxu1 %v7147_v17  ;;  %v3428_v18 = vpop.f32.mrf.mxu0 }
 0x4e6   :  { %5588 = vmatpush1.bf16.msra.mxu0 %v7142_v8  ;;  %v7178_v8 = vld [vmem:[#allocation3 + $0xc0] ss:$8 sps:$4 sm:$0xff]  }
 0x4e7   :  { %5589 = vmatprep.subr.bf16.mxu0 %v7150_v11  ;;  %v4208_v11 = vpack.c.bf16 %v6334_v40, %v6320_v2  ;;  %v7202_v40 = vld [vmem:[#allocation3 + $0x80] ss:$8 sps:$4 sm:$0xff]  }
 0x4e8   :  { %3790 = vmatpush2.bf16.msra.mxu1 %v7145_v19  ;;  %v7186_v19 = vld [vmem:[#allocation3 + $0xb4] ss:$8 sps:$4 sm:$0xff]  }
 0x4e9   :  { %3791 = vmatprep.subr.bf16.mxu1 %v7153_v44  ;;  %v3219_v44 = vadd.f32 %v9473_v41, %v9465_v15  ;;  %v9619_v41 = vpop.f32.mrf.mxu0 }
 0x4ea   :  { %5590 = vmatpush1.bf16.msra.mxu0 %v7148_v22  ;;  %v7181_v22 = vld [vmem:[#allocation3 + $0x140] ss:$8 sps:$4 sm:$0xff]  }
 0x4eb   :  { %5591 = vmatprep.subr.bf16.mxu0 %v7156_v25  ;;  %v7189_v25 = vld [vmem:[#allocation3 + $0x134] ss:$8 sps:$4 sm:$0xff]   ;;  %v3939_v15 = vmul.f32 0.2, %v3219_v44  ;;  %vm3883_vm6 = vcmp.ge.f32.partialorder %v3219_v44, 0.0 }
 0x4ec   :  { %3792 = vmatpush2.bf16.msra.mxu1 %v7151_v28 }
 0x4ed   :  { %3793 = vmatprep.subr.bf16.mxu1 %v7159_v31  ;;  %v7187_v31 = vld [vmem:[#allocation3 + $0x130] ss:$8 sps:$4 sm:$0xff]  }
 0x4ee   :  { %5592 = vmatpush1.bf16.msra.mxu0 %v7154_v57 }
 0x4ef   :  { %5593 = vmatprep.subr.bf16.mxu0 %v7162_v33  ;;  %v3981_v33 = vsel %vm3869_vm5, %v3215_v47, %v3925_v32  ;;  %v7208_v32 = vld [vmem:[#allocation3 + $0x270] ss:$8 sps:$4 sm:$0xff]  }
 0x4f0   :  { %3794 = vmatpush2.bf16.msra.mxu1 %v7157_v10  ;;  %v4037_v13 = vmul.f32 1.4142135, %v3981_v33 }
 0x4f1   :  { %5630 = vmatprep.subr.bf16.mxu1 %v7165_v36  ;;  %v3432_v36 = vpop.f32.mrf.mxu0 }
 0x4f2   :  { %5594 = vmatpush2.bf16.msra.mxu0 %v7160_v3  ;;  %v7193_v3 = vld [vmem:[#allocation3 + $0x120] ss:$8 sps:$4 sm:$0xff]  }
 0x4f3   :  { %3796 = vmatmul.mubr.bf16.vlgmr.msra.gmra.mxu1 %v8646_v6  ;;  %5595 = vmatprep.subr.bf16.mxu0 %v7168_v61  ;;  %v9604_v50 = vpop.f32.mrf.mxu1  ;;  %v7180_v6 = vld [vmem:[#allocation3 + $0xc4] ss:$8 sps:$4 sm:$0xff]   ;;  %v9627_v47 = vpop.f32.mrf.mxu0 }
 0x4f4   :  { %3805 = vmatprep.mubr.bf16.mxu1 %v8782_v23  ;;  %5631 = vmatpush1.bf16.msra.mxu1 %v7163_v42  ;;  %v7183_v23 = vld [vmem:[#allocation3 + $0x144] ss:$8 sps:$4 sm:$0xff]   ;;  %v7201_v42 = vld [vmem:[#allocation3 + $0x114] ss:$8 sps:$4 sm:$0xff]  }
 0x4f5   :  { %5632 = vmatprep.subr.bf16.mxu1 %v7171_v26  ;;  %v3375_v17 = vpop.f32.mrf.mxu1  ;;  %v3225_v26 = vadd.f32 %v9507_v55, %v9499_v54  ;;  %v9631_v7 = vpop.f32.mrf.mxu0 }
 0x4f6   :  { %5596 = vmatpush2.bf16.msra.mxu0 %v7166_v35  ;;  %v3429_v1 = vadd.f32 %v3428_v18, %v3375_v17  ;;  %v7210_v17 = vld [vmem:[#allocation3 + $0x274] ss:$8 sps:$4 sm:$0xff]  }
 0x4f7   :  { %5597 = vmatprep.subr.bf16.mxu0 %v7174_v24  ;;  %v9615_v28 = vpop.f32.mrf.mxu1  ;;  %v3953_v2 = vmul.f32 0.2, %v3225_v26  ;;  %vm3897_vm11 = vcmp.ge.f32.partialorder %v3225_v26, 0.0  ;;  %v9635_v21 = vpop.f32.mrf.mxu0 }
 0x4f8   :  { %5633 = vmatpush1.bf16.msra.mxu1 %v7169_v9  ;;  %v7199_v9 = vld [vmem:[#allocation3 + $0x110] ss:$8 sps:$4 sm:$0xff]   ;;  %vm3874_vm12 = vcmp.ge.f32.partialorder %v3429_v1, 0.0 }
 0x4f9   :  { %5634 = vmatprep.subr.bf16.mxu1 %v7177_v16  ;;  %v3379_v57 = vpop.f32.mrf.mxu1  ;;  %v7204_v16 = vld [vmem:[#allocation3 + $0x84] ss:$8 sps:$4 sm:$0xff]   ;;  %v4009_v27 = vsel %vm3897_vm11, %v3225_v26, %v3953_v2  ;;  %v7225_v26 = vld [vmem:[#allocation3 + $0x1d4] ss:$8 sps:$4 sm:$0xff]   ;;  %v7226_v2 = vld [vmem:[#allocation3 + $0x240] ss:$8 sps:$4 sm:$0xff]  }
 0x4fa   :  { %5598 = vmatpush2.bf16.msra.mxu0 %v7172_v14  ;;  %v3433_v61 = vadd.f32 %v3432_v36, %v3379_v57  ;;  %v4065_v33 = vmul.f32 1.4142135, %v4009_v27 }
 0x4fb   :  { %3806 = vmatmul.mubr.bf16.gmra.mxu1 %v8785_v20  ;;  %5599 = vmatprep.subr.bf16.mxu0 %v7180_v6  ;;  %v3227_v20 = vadd.f32 %v9520_v45, %v9512_v5  ;;  %v7198_v5 = vld [vmem:[#allocation3 + $0x94] ss:$8 sps:$4 sm:$0xff]   ;;  %v3995_v45 = vsel %vm3883_vm6, %v3219_v44, %v3939_v15  ;;  %v7207_v6 = vld [vmem:[#allocation3 + $0x104] ss:$8 sps:$4 sm:$0xff]   ;;  %v9625_v54 = vpop.f32.mrf.mxu1  ;;  %v6317_v44 = vclamps-f32 %v4037_v13, 256.0 }
 0x4fc   :  { %5635 = vmatpush1.bf16.msra.mxu1 %v7175_v63  ;;  %5662 = vmatprep.mubr.bf16.mxu1 %v4208_v11  ;;  %v4051_v35 = vmul.f32 1.4142135, %v3995_v45  ;;  %v3944_v14 = vmul.f32 0.2, %v3433_v61  ;;  %vm3888_vm10 = vcmp.ge.f32.partialorder %v3433_v61, 0.0  ;;  %v6360_v11 = vclamps-f32 %v4080_v62, 256.0 }
 0x4fd   :  { %5636 = vmatprep.subr.bf16.mxu1 %v7183_v23  ;;  %v3954_v10 = vmul.f32 0.2, %v3227_v20  ;;  %vm3898_vm8 = vcmp.ge.f32.partialorder %v3227_v20, 0.0  ;;  %v3930_v23 = vmul.f32 0.2, %v3429_v1  ;;  %v6345_v13 = vclamps-f32 %v4065_v33, 256.0 }
 0x4fe   :  { %5600 = vmatpush2.bf16.msra.mxu0 %v7178_v8  ;;  %v6331_v55 = vclamps-f32 %v4051_v35, 256.0  ;;  %v4023_v8 = vsel %vm3911_vm9, %v3229_v56, %v3967_v30  ;;  %v4000_v18 = vsel %vm3888_vm10, %v3433_v61, %v3944_v14  ;;  %v7214_v56 = vld [vmem:[#allocation3 + $0x260] ss:$8 sps:$4 sm:$0xff]   ;;  %v7231_v14 = vld [vmem:[#allocation3 + $0x1c4] ss:$8 sps:$4 sm:$0xff]  }
 0x4ff   :  { %5601 = vmatprep.subr.bf16.mxu0 %v7186_v19  ;;  %v4010_v24 = vsel %vm3898_vm8, %v3227_v20, %v3954_v10  ;;  %v7205_v19 = vld [vmem:[#allocation3 + $0x100] ss:$8 sps:$4 sm:$0xff]   ;;  %v3986_v15 = vsel %vm3874_vm12, %v3429_v1, %v3930_v23  ;;  %v7219_v10 = vld [vmem:[#allocation3 + $0x1e4] ss:$8 sps:$4 sm:$0xff]  }
 0x500   :  { %5637 = vmatpush1.bf16.msra.mxu1 %v7181_v22  ;;  %v4066_v63 = vmul.f32 1.4142135, %v4010_v24  ;;  %v7213_v22 = vld [vmem:[#allocation3 + $0x1f4] ss:$8 sps:$4 sm:$0xff]   ;;  %v4205_v20 = vpack.c.bf16 %v6331_v55, %v6317_v44  ;;  %v7220_v24 = vld [vmem:[#allocation3 + $0x250] ss:$8 sps:$4 sm:$0xff]   ;;  %v3337_v44 = vadd.f32 %v9599_v53, %v9602_v49 }
 0x501   :  { %5638 = vmatprep.subr.bf16.mxu1 %v7189_v25  ;;  %v7229_v23 = vld [vmem:[#allocation3 + $0x1c0] ss:$8 sps:$4 sm:$0xff]   ;;  %v7246_v49 = vld [vmem:[#allocation3 + $0x214] ss:$8 sps:$4 sm:$0xff]  }
 0x502   :  { %5602 = vmatpush2.bf16.msra.mxu0 %v7184_v12  ;;  %v6346_v25 = vclamps-f32 %v4066_v63, 256.0  ;;  %v9629_v12 = vpop.f32.mrf.mxu1  ;;  %v7234_v63 = vld [vmem:[#allocation3 + $0x234] ss:$8 sps:$4 sm:$0xff]   ;;  %v3970_v53 = vmul.f32 0.2, %v3337_v44  ;;  %vm3914_vm14 = vcmp.ge.f32.partialorder %v3337_v44, 0.0 }
 0x503   :  { %5603 = vmatprep.subr.bf16.mxu0 %v7192_v29  ;;  %v4079_v29 = vmul.f32 1.4142135, %v4023_v8  ;;  %v3325_v8 = vadd.f32 %v9561_v37, %v9569_v43  ;;  %v7243_v37 = vld [vmem:[#allocation3 + $0x1a4] ss:$8 sps:$4 sm:$0xff]  }
 0x504   :  { %5639 = vmatpush1.bf16.msra.mxu1 %v7187_v31  ;;  %v7216_v31 = vld [vmem:[#allocation3 + $0x264] ss:$8 sps:$4 sm:$0xff]   ;;  %v4220_v57 = vpack.c.bf16 %v6360_v11, %v6346_v25  ;;  %v9633_v45 = vpop.f32.mrf.mxu1  ;;  %v7235_v25 = vld [vmem:[#allocation3 + $0x1b0] ss:$8 sps:$4 sm:$0xff]   ;;  %v4026_v33 = vsel %vm3914_vm14, %v3337_v44, %v3970_v53  ;;  %v7262_v53 = vld [vmem:[#allocation3 + $0x2e0] ss:$8 sps:$4 sm:$0xff]  }
 0x505   :  { %5640 = vmatprep.subr.bf16.mxu1 %v7195_v52  ;;  %v4056_v52 = vmul.f32 1.4142135, %v4000_v18  ;;  %v6359_v36 = vclamps-f32 %v4079_v29, 256.0  ;;  %v7240_v18 = vld [vmem:[#allocation3 + $0x224] ss:$8 sps:$4 sm:$0xff]   ;;  %vm3885_vm13 = vcmp.ge.f32.partialorder %v3325_v8, 0.0 }
 0x506   :  { %5604 = vmatpush2.bf16.msra.mxu0 %v7190_v58  ;;  %v7211_v58 = vld [vmem:[#allocation3 + $0x1f0] ss:$8 sps:$4 sm:$0xff]   ;;  %v9637_v35 = vpop.f32.mrf.mxu1  ;;  %v3941_v43 = vmul.f32 0.2, %v3325_v8  ;;  %v7238_v29 = vld [vmem:[#allocation3 + $0x220] ss:$8 sps:$4 sm:$0xff]  }
 0x507   :  { %5605 = vmatprep.subr.bf16.mxu0 %v7198_v5  ;;  %v4042_v5 = vmul.f32 1.4142135, %v3986_v15  ;;  %v6336_v61 = vclamps-f32 %v4056_v52, 256.0  ;;  %v4219_v1 = vpack.c.bf16 %v6359_v36, %v6345_v13  ;;  %v3335_v52 = vadd.f32 %v9594_v38, %v9596_v48 }
 0x508   :  { %5641 = vmatpush1.bf16.msra.mxu1 %v7193_v3  ;;  %v7222_v3 = vld [vmem:[#allocation3 + $0x254] ss:$8 sps:$4 sm:$0xff]   ;;  %v3331_v36 = vadd.f32 %v9577_v46, %v9585_v59  ;;  %v4082_v48 = vmul.f32 1.4142135, %v4026_v33 }
 0x509   :  { %5642 = vmatprep.subr.bf16.mxu1 %v7201_v42  ;;  %v7217_v42 = vld [vmem:[#allocation3 + $0x1e0] ss:$8 sps:$4 sm:$0xff]   ;;  %v3969_v38 = vmul.f32 0.2, %v3335_v52  ;;  %vm3913_vm1 = vcmp.ge.f32.partialorder %v3335_v52, 0.0 }
 0x50a   :  { %5606 = vmatpush2.bf16.msra.mxu0 %v7196_v39  ;;  %v6322_v39 = vclamps-f32 %v4042_v5, 256.0  ;;  %v7252_v5 = vld [vmem:[#allocation3 + $0x204] ss:$8 sps:$4 sm:$0xff]   ;;  %vm3899_vm3 = vcmp.ge.f32.partialorder %v3331_v36, 0.0 }
 0x50b   :  { %5607 = vmatprep.subr.bf16.mxu0 %v7204_v16  ;;  %v9639_v16 = vpop.f32.mrf.mxu0 }
 0x50c   :  { %5643 = vmatpush1.bf16.msra.mxu1 %v7199_v9  ;;  %v7228_v9 = vld [vmem:[#allocation3 + $0x244] ss:$8 sps:$4 sm:$0xff]   ;;  %v4210_v62 = vpack.c.bf16 %v6336_v61, %v6322_v39 }
 0x50d   :  { %5644 = vmatprep.subr.bf16.mxu1 %v7207_v6  ;;  %v7255_v39 = vld [vmem:[#allocation3 + $0x184] ss:$8 sps:$4 sm:$0xff]  }
 0x50e   :  { %5608 = vmatpush2.bf16.msra.mxu0 %v7202_v40  ;;  %v7223_v40 = vld [vmem:[#allocation3 + $0x1d0] ss:$8 sps:$4 sm:$0xff]  }
 0x50f   :  { %5683 = vmatprep.subr.bf16.mxu0 %v7210_v17  ;;  %v7237_v17 = vld [vmem:[#allocation3 + $0x1b4] ss:$8 sps:$4 sm:$0xff]  }
 0x510   :  { %5645 = vmatpush1.bf16.msra.mxu1 %v7205_v19  ;;  %v7232_v19 = vld [vmem:[#allocation3 + $0x230] ss:$8 sps:$4 sm:$0xff]  }
 0x511   :  { %5610 = vmatmul.mubr.bf16.vlgmr.msra.gmra.mxu0 %v4205_v20  ;;  %5646 = vmatprep.subr.bf16.mxu1 %v7213_v22  ;;  %v9643_v6 = vpop.f32.mrf.mxu0  ;;  %v3321_v22 = vadd.f32 %v9544_v4, %v9553_v51  ;;  %v7241_v51 = vld [vmem:[#allocation3 + $0x1a0] ss:$8 sps:$4 sm:$0xff]  }
 0x512   :  { %5619 = vmatprep.mubr.bf16.mxu0 %v4220_v57  ;;  %5684 = vmatpush1.bf16.msra.mxu0 %v7208_v32  ;;  %v3333_v32 = vadd.f32 %v9587_v34, %v9592_v60  ;;  %v7249_v34 = vld [vmem:[#allocation3 + $0x194] ss:$8 sps:$4 sm:$0xff]   ;;  %v3997_v60 = vsel %vm3885_vm13, %v3325_v8, %v3941_v43 }
 0x513   :  { %5685 = vmatprep.subr.bf16.mxu0 %v7216_v31  ;;  %v9641_v30 = vpop.f32.mrf.mxu1  ;;  %v3481_v11 = vpop.f32.mrf.mxu0  ;;  %v3927_v15 = vmul.f32 0.2, %v3321_v22  ;;  %vm3871_vm15 = vcmp.ge.f32.partialorder %v3321_v22, 0.0  ;;  %v4053_v61 = vmul.f32 1.4142135, %v3997_v60 }
 0x514   :  { %5647 = vmatpush2.bf16.msra.mxu1 %v7211_v58  ;;  %v3956_v31 = vmul.f32 0.2, %v3333_v32  ;;  %vm3900_vm0 = vcmp.ge.f32.partialorder %v3333_v32, 0.0  ;;  %v7244_v58 = vld [vmem:[#allocation3 + $0x210] ss:$8 sps:$4 sm:$0xff]  }
 0x515   :  { %5648 = vmatprep.subr.bf16.mxu1 %v7219_v10  ;;  %v3534_v55 = vpop.f32.mrf.mxu1  ;;  %v9655_v20 = vpop.f32.mrf.mxu0  ;;  %v6333_v46 = vclamps-f32 %v4053_v61, 256.0  ;;  %v7282_v61 = vld [vmem:[#allocation3 + $0x2b4] ss:$8 sps:$4 sm:$0xff]  }
 0x516   :  { %5686 = vmatpush1.bf16.msra.mxu0 %v7214_v56  ;;  %v3983_v56 = vsel %vm3871_vm15, %v3321_v22, %v3927_v15  ;;  %v3535_v13 = vadd.f32 %v3534_v55, %v3481_v11  ;;  %v6362_v55 = vclamps-f32 %v4082_v48, 256.0  ;;  %v7264_v11 = vld [vmem:[#allocation3 + $0x2e4] ss:$8 sps:$4 sm:$0xff]   ;;  %v7270_v15 = vld [vmem:[#allocation3 + $0x2d4] ss:$8 sps:$4 sm:$0xff]  }
 0x517   :  { %5687 = vmatprep.subr.bf16.mxu0 %v7222_v3  ;;  %v9651_v27 = vpop.f32.mrf.mxu1  ;;  %v3485_v57 = vpop.f32.mrf.mxu0  ;;  %v7247_v3 = vld [vmem:[#allocation3 + $0x190] ss:$8 sps:$4 sm:$0xff]  }
 0x518   :  { %5649 = vmatpush2.bf16.msra.mxu1 %v7217_v42  ;;  %v4012_v42 = vsel %vm3900_vm0, %v3333_v32, %v3956_v31  ;;  %v3932_v59 = vmul.f32 0.2, %v3535_v13  ;;  %vm3876_vm4 = vcmp.ge.f32.partialorder %v3535_v13, 0.0  ;;  %v7280_v48 = vld [vmem:[#allocation3 + $0x2b0] ss:$8 sps:$4 sm:$0xff]  }
 0x519   :  { %5620 = vmatmul.mubr.bf16.gmra.mxu0 %v4219_v1  ;;  %5650 = vmatprep.subr.bf16.mxu1 %v7225_v26  ;;  %v3538_v4 = vpop.f32.mrf.mxu1  ;;  %v7250_v26 = vld [vmem:[#allocation3 + $0x200] ss:$8 sps:$4 sm:$0xff]   ;;  %v7258_v1 = vld [vmem:[#allocation3 + $0x2f4] ss:$8 sps:$4 sm:$0xff]  }
 0x51a   :  { %5688 = vmatpush1.bf16.msra.mxu0 %v7220_v24  ;;  %5715 = vmatprep.mubr.bf16.mxu0 %v4210_v62  ;;  %v3539_v10 = vadd.f32 %v3538_v4, %v3485_v57  ;;  %v7253_v24 = vld [vmem:[#allocation3 + $0x180] ss:$8 sps:$4 sm:$0xff]   ;;  %v3988_v32 = vsel %vm3876_vm4, %v3535_v13, %v3932_v59 }
 0x51b   :  { %5689 = vmatprep.subr.bf16.mxu0 %v7228_v9  ;;  %v4039_v9 = vmul.f32 1.4142135, %v3983_v56  ;;  %v4044_v4 = vmul.f32 1.4142135, %v3988_v32  ;;  %v7279_v56 = vld [vmem:[#allocation3 + $0x344] ss:$8 sps:$4 sm:$0xff]  }
 0x51c   :  { %5651 = vmatpush2.bf16.msra.mxu1 %v7223_v40  ;;  %v3946_v62 = vmul.f32 0.2, %v3539_v10  ;;  %v3955_v40 = vmul.f32 0.2, %v3331_v36  ;;  %vm3890_vm2 = vcmp.ge.f32.partialorder %v3539_v10, 0.0 }
 0x51d   :  { %5652 = vmatprep.subr.bf16.mxu1 %v7231_v14  ;;  %v4068_v14 = vmul.f32 1.4142135, %v4012_v42  ;;  %v6324_v33 = vclamps-f32 %v4044_v4, 256.0  ;;  %v3431_v42 = vadd.f32 %v9619_v41, %v9615_v28  ;;  %v7277_v13 = vld [vmem:[#allocation3 + $0x340] ss:$8 sps:$4 sm:$0xff]  }
 0x51e   :  { %5690 = vmatpush1.bf16.msra.mxu0 %v7226_v2  ;;  %v7261_v2 = vld [vmem:[#allocation3 + $0x374] ss:$8 sps:$4 sm:$0xff]   ;;  %v4002_v8 = vsel %vm3890_vm2, %v3539_v10, %v3946_v62  ;;  %v7271_v10 = vld [vmem:[#allocation3 + $0x350] ss:$8 sps:$4 sm:$0xff]   ;;  %v7288_v28 = vld [vmem:[#allocation3 + $0x2a4] ss:$8 sps:$4 sm:$0xff]  }
 0x51f   :  { %5691 = vmatprep.subr.bf16.mxu0 %v7234_v63  ;;  %v4025_v63 = vsel %vm3913_vm1, %v3335_v52, %v3969_v38  ;;  %v6348_v44 = vclamps-f32 %v4068_v14, 256.0  ;;  %v4058_v43 = vmul.f32 1.4142135, %v4002_v8  ;;  %v7268_v52 = vld [vmem:[#allocation3 + $0x2d0] ss:$8 sps:$4 sm:$0xff]   ;;  %v3427_v38 = vadd.f32 %v9606_v0, %v9604_v50 }
 0x520   :  { %5653 = vmatpush2.bf16.msra.mxu1 %v7229_v23  ;;  %v7256_v23 = vld [vmem:[#allocation3 + $0x2f0] ss:$8 sps:$4 sm:$0xff]   ;;  %v3943_v41 = vmul.f32 0.2, %v3431_v42  ;;  %vm3887_vm5 = vcmp.ge.f32.partialorder %v3431_v42, 0.0  ;;  %v3441_v14 = vadd.f32 %v9635_v21, %v9633_v45 }
 0x521   :  { %5654 = vmatprep.subr.bf16.mxu1 %v7237_v17  ;;  %v6319_v17 = vclamps-f32 %v4039_v9, 256.0  ;;  %v6338_v60 = vclamps-f32 %v4058_v43, 256.0  ;;  %v7283_v9 = vld [vmem:[#allocation3 + $0x330] ss:$8 sps:$4 sm:$0xff]   ;;  %v7286_v50 = vld [vmem:[#allocation3 + $0x2a0] ss:$8 sps:$4 sm:$0xff]  }
 0x522   :  { %5692 = vmatpush1.bf16.msra.mxu0 %v7232_v19  ;;  %v4011_v19 = vsel %vm3899_vm3, %v3331_v36, %v3955_v40  ;;  %v7274_v36 = vld [vmem:[#allocation3 + $0x2c0] ss:$8 sps:$4 sm:$0xff]   ;;  %vm3873_vm7 = vcmp.ge.f32.partialorder %v3427_v38, 0.0  ;;  %v3971_v45 = vmul.f32 0.2, %v3441_v14  ;;  %vm3915_vm9 = vcmp.ge.f32.partialorder %v3441_v14, 0.0 }
 0x523   :  { %5693 = vmatprep.subr.bf16.mxu0 %v7240_v18  ;;  %v7259_v18 = vld [vmem:[#allocation3 + $0x370] ss:$8 sps:$4 sm:$0xff]   ;;  %v4207_v22 = vpack.c.bf16 %v6333_v46, %v6319_v17  ;;  %v7289_v46 = vld [vmem:[#allocation3 + $0x320] ss:$8 sps:$4 sm:$0xff]   ;;  %v7303_v32 = vld [vmem:[#allocation3 + $0x304] ss:$8 sps:$4 sm:$0xff]  }
 0x524   :  { %5655 = vmatpush2.bf16.msra.mxu1 %v7235_v25  ;;  %v4081_v25 = vmul.f32 1.4142135, %v4025_v63  ;;  %v7297_v63 = vld [vmem:[#allocation3 + $0x314] ss:$8 sps:$4 sm:$0xff]   ;;  %v7292_v17 = vld [vmem:[#allocation3 + $0x290] ss:$8 sps:$4 sm:$0xff]  }
 0x525   :  { %5656 = vmatprep.subr.bf16.mxu1 %v7243_v37  ;;  %v7267_v37 = vld [vmem:[#allocation3 + $0x364] ss:$8 sps:$4 sm:$0xff]   ;;  %v7301_v4 = vld [vmem:[#allocation3 + $0x300] ss:$8 sps:$4 sm:$0xff]  }
 0x526   :  { %5694 = vmatpush1.bf16.msra.mxu0 %v7238_v29  ;;  %v4222_v29 = vpack.c.bf16 %v6362_v55, %v6348_v44  ;;  %v6361_v31 = vclamps-f32 %v4081_v25, 256.0  ;;  %v7300_v44 = vld [vmem:[#allocation3 + $0x284] ss:$8 sps:$4 sm:$0xff]  }
 0x527   :  { %5695 = vmatprep.subr.bf16.mxu0 %v7246_v49  ;;  %v4067_v49 = vmul.f32 1.4142135, %v4011_v19 }
 0x528   :  { %5657 = vmatpush2.bf16.msra.mxu1 %v7241_v51  ;;  %v7265_v51 = vld [vmem:[#allocation3 + $0x360] ss:$8 sps:$4 sm:$0xff]  }
 0x529   :  { %5658 = vmatprep.subr.bf16.mxu1 %v7249_v34  ;;  %v7273_v34 = vld [vmem:[#allocation3 + $0x354] ss:$8 sps:$4 sm:$0xff]   ;;  %v6347_v57 = vclamps-f32 %v4067_v49, 256.0  ;;  %v4027_v49 = vsel %vm3915_vm9, %v3441_v14, %v3971_v45  ;;  %v7319_v14 = vld [vmem:[#allocation3 + $0x3d0] ss:$8 sps:$4 sm:$0xff]  }
 0x52a   :  { %5696 = vmatpush1.bf16.msra.mxu0 %v7244_v58  ;;  %v7276_v58 = vld [vmem:[#allocation3 + $0x2c4] ss:$8 sps:$4 sm:$0xff]  }
 0x52b   :  { %5697 = vmatprep.subr.bf16.mxu0 %v7252_v5  ;;  %v4221_v5 = vpack.c.bf16 %v6361_v31, %v6347_v57 }
 0x52c   :  { %5659 = vmatpush2.bf16.msra.mxu1 %v7247_v3  ;;  %v4212_v3 = vpack.c.bf16 %v6338_v60, %v6324_v33  ;;  %v7309_v60 = vld [vmem:[#allocation3 + $0x3f4] ss:$8 sps:$4 sm:$0xff]  }
 0x52d   :  { %5660 = vmatprep.subr.bf16.mxu1 %v7255_v39  ;;  %v7285_v39 = vld [vmem:[#allocation3 + $0x334] ss:$8 sps:$4 sm:$0xff]  }
 0x52e   :  { %5698 = vmatpush1.bf16.msra.mxu0 %v7250_v26  ;;  %v3443_v26 = vadd.f32 %v9639_v16, %v9637_v35  ;;  %v7291_v35 = vld [vmem:[#allocation3 + $0x324] ss:$8 sps:$4 sm:$0xff]   ;;  %v3929_v16 = vmul.f32 0.2, %v3427_v38 }
 0x52f   :  { %5699 = vmatprep.subr.bf16.mxu0 %v7258_v1  ;;  %v9669_v1 = vpop.f32.mrf.mxu0 }
 0x530   :  { %5661 = vmatpush2.bf16.msra.mxu1 %v7253_v24  ;;  %v3439_v24 = vadd.f32 %v9631_v7, %v9629_v12  ;;  %v3972_v62 = vmul.f32 0.2, %v3443_v26  ;;  %vm3916_vm6 = vcmp.ge.f32.partialorder %v3443_v26, 0.0  ;;  %v7294_v12 = vld [vmem:[#allocation3 + $0x294] ss:$8 sps:$4 sm:$0xff]   ;;  %v3999_v7 = vsel %vm3887_vm5, %v3431_v42, %v3943_v41 }
 0x531   :  { %5736 = vmatprep.subr.bf16.mxu1 %v7261_v2  ;;  %v9671_v40 = vpop.f32.mrf.mxu0  ;;  %v9675_v2 = vpop.f32.mrf.mxu1  ;;  %v3985_v55 = vsel %vm3873_vm7, %v3427_v38, %v3929_v16  ;;  %v4055_v8 = vmul.f32 1.4142135, %v3999_v7  ;;  %v7316_v16 = vld [vmem:[#allocation3 + $0x450] ss:$8 sps:$4 sm:$0xff]  }
 0x532   :  { %5700 = vmatpush2.bf16.msra.mxu0 %v7256_v23  ;;  %v3958_v0 = vmul.f32 0.2, %v3439_v24  ;;  %vm3902_vm8 = vcmp.ge.f32.partialorder %v3439_v24, 0.0  ;;  %v4028_v59 = vsel %vm3916_vm6, %v3443_v26, %v3972_v62  ;;  %v3437_v23 = vadd.f32 %v9627_v47, %v9625_v54  ;;  %v7298_v47 = vld [vmem:[#allocation3 + $0x280] ss:$8 sps:$4 sm:$0xff]  }
 0x533   :  { %5663 = vmatmul.mubr.bf16.vlgmr.msra.gmra.mxu1 %v4207_v22  ;;  %5701 = vmatprep.subr.bf16.mxu0 %v7264_v11  ;;  %v9679_v19 = vpop.f32.mrf.mxu0  ;;  %v4084_v21 = vmul.f32 1.4142135, %v4028_v59  ;;  %v4041_v22 = vmul.f32 1.4142135, %v3985_v55  ;;  %v9681_v25 = vpop.f32.mrf.mxu1  ;;  %v6335_v43 = vclamps-f32 %v4055_v8, 256.0 }
 0x534   :  { %5672 = vmatprep.mubr.bf16.mxu1 %v4222_v29  ;;  %5737 = vmatpush1.bf16.msra.mxu1 %v7259_v18  ;;  %v4014_v11 = vsel %vm3902_vm8, %v3439_v24, %v3958_v0  ;;  %v7295_v18 = vld [vmem:[#allocation3 + $0x310] ss:$8 sps:$4 sm:$0xff]   ;;  %vm3901_vm10 = vcmp.ge.f32.partialorder %v3437_v23, 0.0  ;;  %v7310_v26 = vld [vmem:[#allocation3 + $0x460] ss:$8 sps:$4 sm:$0xff]  }
 0x535   :  { %5738 = vmatprep.subr.bf16.mxu1 %v7267_v37  ;;  %v3957_v37 = vmul.f32 0.2, %v3437_v23  ;;  %v4070_v54 = vmul.f32 1.4142135, %v4014_v11  ;;  %v9683_v29 = vpop.f32.mrf.mxu0  ;;  %v9685_v31 = vpop.f32.mrf.mxu1  ;;  %v7313_v24 = vld [vmem:[#allocation3 + $0x3e0] ss:$8 sps:$4 sm:$0xff]  }
 0x536   :  { %5702 = vmatpush2.bf16.msra.mxu0 %v7262_v53  ;;  %v7306_v53 = vld [vmem:[#allocation3 + $0x474] ss:$8 sps:$4 sm:$0xff]  }
 0x537   :  { %5703 = vmatprep.subr.bf16.mxu0 %v7270_v15  ;;  %v6364_v15 = vclamps-f32 %v4084_v21, 256.0  ;;  %v6350_v57 = vclamps-f32 %v4070_v54, 256.0  ;;  %v7321_v62 = vld [vmem:[#allocation3 + $0x3d4] ss:$8 sps:$4 sm:$0xff]  }
 0x538   :  { %5739 = vmatpush1.bf16.msra.mxu1 %v7265_v51  ;;  %v6321_v51 = vclamps-f32 %v4041_v22, 256.0  ;;  %v7330_v8 = vld [vmem:[#allocation3 + $0x434] ss:$8 sps:$4 sm:$0xff]  }
 0x539   :  { %5740 = vmatprep.subr.bf16.mxu1 %v7273_v34  ;;  %v9687_v34 = vpop.f32.mrf.mxu0  ;;  %v7333_v21 = vld [vmem:[#allocation3 + $0x3b4] ss:$8 sps:$4 sm:$0xff]  }
 0x53a   :  { %5704 = vmatpush2.bf16.msra.mxu0 %v7268_v52  ;;  %v4013_v52 = vsel %vm3901_vm10, %v3437_v23, %v3957_v37  ;;  %v4209_v33 = vpack.c.bf16 %v6335_v43, %v6321_v51  ;;  %v3533_v43 = vadd.f32 %v9641_v30, %v9643_v6  ;;  %v7334_v51 = vld [vmem:[#allocation3 + $0x420] ss:$8 sps:$4 sm:$0xff]  }
 0x53b   :  { %5673 = vmatmul.mubr.bf16.gmra.mxu1 %v4221_v5  ;;  %5705 = vmatprep.subr.bf16.mxu0 %v7276_v58  ;;  %v7304_v58 = vld [vmem:[#allocation3 + $0x470] ss:$8 sps:$4 sm:$0xff]   ;;  %v7312_v5 = vld [vmem:[#allocation3 + $0x464] ss:$8 sps:$4 sm:$0xff]   ;;  %v3640_v42 = vpop.f32.mrf.mxu0  ;;  %v7337_v6 = vld [vmem:[#allocation3 + $0x3a0] ss:$8 sps:$4 sm:$0xff]  }
 0x53c   :  { %5741 = vmatpush1.bf16.msra.mxu1 %v7271_v10  ;;  %5768 = vmatprep.mubr.bf16.mxu1 %v4212_v3  ;;  %v4083_v10 = vmul.f32 1.4142135, %v4027_v49  ;;  %v4069_v3 = vmul.f32 1.4142135, %v4013_v52  ;;  %v3545_v49 = vadd.f32 %v9681_v25, %v9671_v40  ;;  %v3931_v30 = vmul.f32 0.2, %v3533_v43 }
 0x53d   :  { %5742 = vmatprep.subr.bf16.mxu1 %v7279_v56  ;;  %v4224_v56 = vpack.c.bf16 %v6364_v15, %v6350_v57  ;;  %v9691_v41 = vpop.f32.mrf.mxu0  ;;  %v7342_v57 = vld [vmem:[#allocation3 + $0x414] ss:$8 sps:$4 sm:$0xff]   ;;  %vm3875_vm15 = vcmp.ge.f32.partialorder %v3533_v43, 0.0 }
 0x53e   :  { %5706 = vmatpush2.bf16.msra.mxu0 %v7274_v36  ;;  %v7307_v36 = vld [vmem:[#allocation3 + $0x3f0] ss:$8 sps:$4 sm:$0xff]   ;;  %v3960_v40 = vmul.f32 0.2, %v3545_v49  ;;  %vm3904_vm0 = vcmp.ge.f32.partialorder %v3545_v49, 0.0 }
 0x53f   :  { %5707 = vmatprep.subr.bf16.mxu0 %v7282_v61  ;;  %v3548_v61 = vpop.f32.mrf.mxu1 }
 0x540   :  { %5743 = vmatpush1.bf16.msra.mxu1 %v7277_v13  ;;  %v7315_v13 = vld [vmem:[#allocation3 + $0x3e4] ss:$8 sps:$4 sm:$0xff]   ;;  %v3549_v37 = vadd.f32 %v3548_v61, %v9683_v29  ;;  %v3987_v61 = vsel %vm3875_vm15, %v3533_v43, %v3931_v30 }
 0x541   :  { %5744 = vmatprep.subr.bf16.mxu1 %v7285_v39  ;;  %v6363_v39 = vclamps-f32 %v4083_v10, 256.0  ;;  %v3547_v10 = vadd.f32 %v9685_v31, %v9679_v19  ;;  %v7372_v30 = vld [vmem:[#allocation3 + $0x4c4] ss:$8 sps:$4 sm:$0xff]  }
 0x542   :  { %5708 = vmatpush2.bf16.msra.mxu0 %v7280_v48  ;;  %v7318_v48 = vld [vmem:[#allocation3 + $0x454] ss:$8 sps:$4 sm:$0xff]   ;;  %v3974_v29 = vmul.f32 0.2, %v3549_v37  ;;  %vm3918_vm14 = vcmp.ge.f32.partialorder %v3549_v37, 0.0 }
 0x543   :  { %5709 = vmatprep.subr.bf16.mxu0 %v7288_v28  ;;  %v6349_v28 = vclamps-f32 %v4069_v3, 256.0  ;;  %v7348_v3 = vld [vmem:[#allocation3 + $0x404] ss:$8 sps:$4 sm:$0xff]   ;;  %v3973_v19 = vmul.f32 0.2, %v3547_v10  ;;  %vm3917_vm1 = vcmp.ge.f32.partialorder %v3547_v10, 0.0 }
 0x544   :  { %5745 = vmatpush1.bf16.msra.mxu1 %v7283_v9 }
 0x545   :  { %5746 = vmatprep.subr.bf16.mxu1 %v7291_v35  ;;  %v4223_v0 = vpack.c.bf16 %v6363_v39, %v6349_v28  ;;  %v4016_v39 = vsel %vm3904_vm0, %v3545_v49, %v3960_v40  ;;  %v7346_v28 = vld [vmem:[#allocation3 + $0x400] ss:$8 sps:$4 sm:$0xff]   ;;  %v7367_v40 = vld [vmem:[#allocation3 + $0x550] ss:$8 sps:$4 sm:$0xff]  }
 0x546   :  { %5710 = vmatpush2.bf16.msra.mxu0 %v7286_v50  ;;  %v7361_v49 = vld [vmem:[#allocation3 + $0x560] ss:$8 sps:$4 sm:$0xff]  }
 0x547   :  { %5711 = vmatprep.subr.bf16.mxu0 %v7294_v12  ;;  %v7324_v12 = vld [vmem:[#allocation3 + $0x444] ss:$8 sps:$4 sm:$0xff]  }
 0x548   :  { %5747 = vmatpush1.bf16.msra.mxu1 %v7289_v46  ;;  %v3644_v46 = vpop.f32.mrf.mxu0 }
 0x549   :  { %5748 = vmatprep.subr.bf16.mxu1 %v7297_v63  ;;  %v7327_v63 = vld [vmem:[#allocation3 + $0x3c4] ss:$8 sps:$4 sm:$0xff]  }
 0x54a   :  { %5712 = vmatpush2.bf16.msra.mxu0 %v7292_v17  ;;  %v7322_v17 = vld [vmem:[#allocation3 + $0x440] ss:$8 sps:$4 sm:$0xff]  }
 0x54b   :  { %5713 = vmatprep.subr.bf16.mxu0 %v7300_v44  ;;  %v7325_v44 = vld [vmem:[#allocation3 + $0x3c0] ss:$8 sps:$4 sm:$0xff]  }
 0x54c   :  { %5749 = vmatpush1.bf16.msra.mxu1 %v7295_v18  ;;  %v3537_v18 = vadd.f32 %v9651_v27, %v9655_v20  ;;  %v7339_v27 = vld [vmem:[#allocation3 + $0x3a4] ss:$8 sps:$4 sm:$0xff]  }
 0x54d   :  { %5750 = vmatprep.subr.bf16.mxu1 %v7303_v32  ;;  %v7328_v32 = vld [vmem:[#allocation3 + $0x430] ss:$8 sps:$4 sm:$0xff]  }
 0x54e   :  { %5714 = vmatpush2.bf16.msra.mxu0 %v7298_v47  ;;  %v7336_v47 = vld [vmem:[#allocation3 + $0x424] ss:$8 sps:$4 sm:$0xff]   ;;  %v3945_v20 = vmul.f32 0.2, %v3537_v18  ;;  %vm3889_vm13 = vcmp.ge.f32.partialorder %v3537_v18, 0.0 }
 0x54f   :  { %5789 = vmatprep.subr.bf16.mxu0 %v7306_v53  ;;  %v7331_v53 = vld [vmem:[#allocation3 + $0x3b0] ss:$8 sps:$4 sm:$0xff]  }
 0x550   :  { %5751 = vmatpush1.bf16.msra.mxu1 %v7301_v4 }
 0x551   :  { %5716 = vmatmul.mubr.bf16.vlgmr.msra.gmra.mxu0 %v4209_v33  ;;  %5752 = vmatprep.subr.bf16.mxu1 %v7309_v60  ;;  %v9702_v60 = vpop.f32.mrf.mxu0  ;;  %v4001_v33 = vsel %vm3889_vm13, %v3537_v18, %v3945_v20  ;;  %v7369_v20 = vld [vmem:[#allocation3 + $0x554] ss:$8 sps:$4 sm:$0xff]  }
 0x552   :  { %5725 = vmatprep.mubr.bf16.mxu0 %v4224_v56  ;;  %5790 = vmatpush1.bf16.msra.mxu0 %v7304_v58  ;;  %v7345_v58 = vld [vmem:[#allocation3 + $0x394] ss:$8 sps:$4 sm:$0xff]   ;;  %v4030_v56 = vsel %vm3918_vm14, %v3549_v37, %v3974_v29  ;;  %v7358_v37 = vld [vmem:[#allocation3 + $0x4e0] ss:$8 sps:$4 sm:$0xff]   ;;  %v7364_v29 = vld [vmem:[#allocation3 + $0x4d0] ss:$8 sps:$4 sm:$0xff]  }
 0x553   :  { %v9689_v38 = vpop.f32.mrf.mxu1  ;;  %5791 = vmatprep.subr.bf16.mxu0 %v7312_v5  ;;  %v7340_v5 = vld [vmem:[#allocation3 + $0x410] ss:$8 sps:$4 sm:$0xff]   ;;  %v4086_v31 = vmul.f32 1.4142135, %v4030_v56 }
 0x554   :  { %5753 = vmatpush2.bf16.msra.mxu1 %v7307_v36  ;;  %v9709_v36 = vpop.f32.mrf.mxu0 }
 0x555   :  { %v3587_v9 = vpop.f32.mrf.mxu1  ;;  %5754 = vmatprep.subr.bf16.mxu1 %v7315_v13  ;;  %v7343_v13 = vld [vmem:[#allocation3 + $0x390] ss:$8 sps:$4 sm:$0xff]  }
 0x556   :  { %v3641_v35 = vadd.f32 %v3640_v42, %v3587_v9  ;;  %5792 = vmatpush1.bf16.msra.mxu0 %v7310_v26  ;;  %v3543_v42 = vadd.f32 %v9675_v2, %v9669_v1  ;;  %v4057_v26 = vmul.f32 1.4142135, %v4001_v33  ;;  %v4043_v9 = vmul.f32 1.4142135, %v3987_v61  ;;  %v7349_v2 = vld [vmem:[#allocation3 + $0x380] ss:$8 sps:$4 sm:$0xff]  }
 0x557   :  { %v9693_v50 = vpop.f32.mrf.mxu1  ;;  %5793 = vmatprep.subr.bf16.mxu0 %v7318_v48  ;;  %v4072_v1 = vmul.f32 1.4142135, %v4016_v39  ;;  %v7370_v61 = vld [vmem:[#allocation3 + $0x4c0] ss:$8 sps:$4 sm:$0xff]  }
 0x558   :  { %vm3878_vm11 = vcmp.ge.f32.partialorder %v3641_v35, 0.0  ;;  %v3934_v7 = vmul.f32 0.2, %v3641_v35  ;;  %5755 = vmatpush2.bf16.msra.mxu1 %v7313_v24  ;;  %v7351_v24 = vld [vmem:[#allocation3 + $0x384] ss:$8 sps:$4 sm:$0xff]   ;;  %vm3903_vm2 = vcmp.ge.f32.partialorder %v3543_v42, 0.0 }
 0x559   :  { %5726 = vmatmul.mubr.bf16.gmra.mxu0 %v4223_v0  ;;  %v3591_v59 = vpop.f32.mrf.mxu1  ;;  %5756 = vmatprep.subr.bf16.mxu1 %v7321_v62  ;;  %v9715_v62 = vpop.f32.mrf.mxu0  ;;  %v6337_v0 = vclamps-f32 %v4057_v26, 256.0  ;;  %v7373_v39 = vld [vmem:[#allocation3 + $0x540] ss:$8 sps:$4 sm:$0xff]  }
 0x55a   :  { %v3990_v55 = vsel %vm3878_vm11, %v3641_v35, %v3934_v7  ;;  %v3645_v23 = vadd.f32 %v3644_v46, %v3591_v59  ;;  %5794 = vmatpush1.bf16.msra.mxu0 %v7316_v16  ;;  %v7354_v35 = vld [vmem:[#allocation3 + $0x4f4] ss:$8 sps:$4 sm:$0xff]   ;;  %v3959_v16 = vmul.f32 0.2, %v3543_v42  ;;  %v6366_v46 = vclamps-f32 %v4086_v31, 256.0 }
 0x55b   :  { %5795 = vmatprep.subr.bf16.mxu0 %v7324_v12  ;;  %v4046_v45 = vmul.f32 1.4142135, %v3990_v55  ;;  %v9704_v25 = vpop.f32.mrf.mxu1  ;;  %v7357_v7 = vld [vmem:[#allocation3 + $0x574] ss:$8 sps:$4 sm:$0xff]   ;;  %v7352_v59 = vld [vmem:[#allocation3 + $0x4f0] ss:$8 sps:$4 sm:$0xff]   ;;  %v3654_v55 = vpop.f32.mrf.mxu0 }
 0x55c   :  { %vm3892_vm12 = vcmp.ge.f32.partialorder %v3645_v23, 0.0  ;;  %v3948_v11 = vmul.f32 0.2, %v3645_v23  ;;  %5757 = vmatpush2.bf16.msra.mxu1 %v7319_v14  ;;  %v4029_v14 = vsel %vm3917_vm1, %v3547_v10, %v3973_v19  ;;  %v7381_v31 = vld [vmem:[#allocation3 + $0x534] ss:$8 sps:$4 sm:$0xff]  }
 0x55d   :  { %5758 = vmatprep.subr.bf16.mxu1 %v7327_v63  ;;  %v6326_v15 = vclamps-f32 %v4046_v45, 256.0  ;;  %v9713_v48 = vpop.f32.mrf.mxu1  ;;  %v6323_v63 = vclamps-f32 %v4043_v9, 256.0  ;;  %v4085_v45 = vmul.f32 1.4142135, %v4029_v14 }
 0x55e   :  { %v4004_v22 = vsel %vm3892_vm12, %v3645_v23, %v3948_v11  ;;  %5796 = vmatpush1.bf16.msra.mxu0 %v7322_v17  ;;  %v7360_v23 = vld [vmem:[#allocation3 + $0x4e4] ss:$8 sps:$4 sm:$0xff]   ;;  %v4015_v17 = vsel %vm3903_vm2, %v3543_v42, %v3959_v16  ;;  %v7355_v11 = vld [vmem:[#allocation3 + $0x570] ss:$8 sps:$4 sm:$0xff]   ;;  %v7378_v42 = vld [vmem:[#allocation3 + $0x4b4] ss:$8 sps:$4 sm:$0xff]   ;;  %v3651_v16 = vadd.f32 %v9709_v36, %v9713_v48 }
 0x55f   :  { %v4060_v54 = vmul.f32 1.4142135, %v4004_v22  ;;  %5797 = vmatprep.subr.bf16.mxu0 %v7330_v8  ;;  %v9717_v12 = vpop.f32.mrf.mxu1  ;;  %v6352_v8 = vclamps-f32 %v4072_v1, 256.0  ;;  %v7363_v22 = vld [vmem:[#allocation3 + $0x564] ss:$8 sps:$4 sm:$0xff]  }
 0x560   :  { %5759 = vmatpush2.bf16.msra.mxu1 %v7325_v44  ;;  %v4211_v44 = vpack.c.bf16 %v6337_v0, %v6323_v63  ;;  %v7387_v0 = vld [vmem:[#allocation3 + $0x524] ss:$8 sps:$4 sm:$0xff]   ;;  %v7390_v48 = vld [vmem:[#allocation3 + $0x494] ss:$8 sps:$4 sm:$0xff]   ;;  %vm3906_vm8 = vcmp.ge.f32.partialorder %v3651_v16, 0.0 }
 0x561   :  { %v6340_v4 = vclamps-f32 %v4060_v54, 256.0  ;;  %5760 = vmatprep.subr.bf16.mxu1 %v7333_v21  ;;  %v3601_v21 = vpop.f32.mrf.mxu1  ;;  %v4071_v54 = vmul.f32 1.4142135, %v4015_v17 }
 0x562   :  { %5798 = vmatpush1.bf16.msra.mxu0 %v7328_v32  ;;  %v4226_v32 = vpack.c.bf16 %v6366_v46, %v6352_v8  ;;  %v7393_v8 = vld [vmem:[#allocation3 + $0x514] ss:$8 sps:$4 sm:$0xff]  }
 0x563   :  { %5799 = vmatprep.subr.bf16.mxu0 %v7336_v47  ;;  %v4214_v52 = vpack.c.bf16 %v6340_v4, %v6326_v15  ;;  %v6365_v15 = vclamps-f32 %v4085_v45, 256.0  ;;  %v7388_v45 = vld [vmem:[#allocation3 + $0x490] ss:$8 sps:$4 sm:$0xff]  }
 0x564   :  { %5761 = vmatpush2.bf16.msra.mxu1 %v7331_v53  ;;  %v7366_v53 = vld [vmem:[#allocation3 + $0x4d4] ss:$8 sps:$4 sm:$0xff]  }
 0x565   :  { %5821 = vmatprep.mubr.bf16.mxu0 %v4214_v52  ;;  %5762 = vmatprep.subr.bf16.mxu1 %v7339_v27  ;;  %v6351_v52 = vclamps-f32 %v4071_v54, 256.0 }
 0x566   :  { %5800 = vmatpush1.bf16.msra.mxu0 %v7334_v51 }
 0x567   :  { %5801 = vmatprep.subr.bf16.mxu0 %v7342_v57  ;;  %v4225_v10 = vpack.c.bf16 %v6365_v15, %v6351_v52  ;;  %v7394_v15 = vld [vmem:[#allocation3 + $0x480] ss:$8 sps:$4 sm:$0xff]   ;;  %v7405_v52 = vld [vmem:[#allocation3 + $0x5f4] ss:$8 sps:$4 sm:$0xff]  }
 0x568   :  { %5763 = vmatpush2.bf16.msra.mxu1 %v7337_v6 }
 0x569   :  { %5764 = vmatprep.subr.bf16.mxu1 %v7345_v58 }
 0x56a   :  { %5802 = vmatpush1.bf16.msra.mxu0 %v7340_v5  ;;  %v7375_v5 = vld [vmem:[#allocation3 + $0x544] ss:$8 sps:$4 sm:$0xff]  }
 0x56b   :  { %5803 = vmatprep.subr.bf16.mxu0 %v7348_v3 }
 0x56c   :  { %5765 = vmatpush2.bf16.msra.mxu1 %v7343_v13  ;;  %v3643_v13 = vadd.f32 %v9691_v41, %v9693_v50  ;;  %v7384_v41 = vld [vmem:[#allocation3 + $0x4a4] ss:$8 sps:$4 sm:$0xff]  }
 0x56d   :  { %5766 = vmatprep.subr.bf16.mxu1 %v7351_v24  ;;  %v3655_v24 = vadd.f32 %v3654_v55, %v3601_v21  ;;  %v3653_v55 = vadd.f32 %v9715_v62, %v9717_v12  ;;  %v7391_v62 = vld [vmem:[#allocation3 + $0x510] ss:$8 sps:$4 sm:$0xff]  }
 0x56e   :  { %5804 = vmatpush1.bf16.msra.mxu0 %v7346_v28  ;;  %v3639_v28 = vadd.f32 %v9687_v34, %v9689_v38  ;;  %v3947_v50 = vmul.f32 0.2, %v3643_v13  ;;  %vm3891_vm5 = vcmp.ge.f32.partialorder %v3643_v13, 0.0  ;;  %v7382_v34 = vld [vmem:[#allocation3 + $0x4a0] ss:$8 sps:$4 sm:$0xff]  }
 0x56f   :  { %5805 = vmatprep.subr.bf16.mxu0 %v7354_v35  ;;  %v7376_v35 = vld [vmem:[#allocation3 + $0x4b0] ss:$8 sps:$4 sm:$0xff]   ;;  %vm3920_vm6 = vcmp.ge.f32.partialorder %v3655_v24, 0.0  ;;  %v3962_v38 = vmul.f32 0.2, %v3651_v16  ;;  %vm3919_vm9 = vcmp.ge.f32.partialorder %v3653_v55, 0.0 }
 0x570   :  { %5767 = vmatpush2.bf16.msra.mxu1 %v7349_v2  ;;  %v7379_v2 = vld [vmem:[#allocation3 + $0x530] ss:$8 sps:$4 sm:$0xff]   ;;  %vm3877_vm7 = vcmp.ge.f32.partialorder %v3639_v28, 0.0  ;;  %v4003_v63 = vsel %vm3891_vm5, %v3643_v13, %v3947_v50 }
 0x571   :  { %v9719_v18 = vpop.f32.mrf.mxu0  ;;  %5842 = vmatprep.subr.bf16.mxu1 %v7357_v7  ;;  %v3976_v7 = vmul.f32 0.2, %v3655_v24  ;;  %v4059_v21 = vmul.f32 1.4142135, %v4003_v63  ;;  %v7424_v63 = vld [vmem:[#allocation3 + $0x630] ss:$8 sps:$4 sm:$0xff]  }
 0x572   :  { %5806 = vmatpush2.bf16.msra.mxu0 %v7352_v59  ;;  %v3933_v59 = vmul.f32 0.2, %v3639_v28 }
 0x573   :  { %v3693_v47 = vpop.f32.mrf.mxu0  ;;  %v9721_v43 = vpop.f32.mrf.mxu1  ;;  %5769 = vmatmul.mubr.bf16.vlgmr.msra.gmra.mxu1 %v4211_v44  ;;  %5807 = vmatprep.subr.bf16.mxu0 %v7360_v23  ;;  %v7385_v23 = vld [vmem:[#allocation3 + $0x520] ss:$8 sps:$4 sm:$0xff]   ;;  %v4032_v17 = vsel %vm3920_vm6, %v3655_v24, %v3976_v7  ;;  %v3649_v44 = vadd.f32 %v9702_v60, %v9704_v25  ;;  %v7402_v60 = vld [vmem:[#allocation3 + $0x674] ss:$8 sps:$4 sm:$0xff]  }
 0x574   :  { %5778 = vmatprep.mubr.bf16.mxu1 %v4226_v32  ;;  %5843 = vmatpush1.bf16.msra.mxu1 %v7355_v11  ;;  %v3989_v11 = vsel %vm3877_vm7, %v3639_v28, %v3933_v59  ;;  %v7396_v32 = vld [vmem:[#allocation3 + $0x484] ss:$8 sps:$4 sm:$0xff]   ;;  %v4088_v54 = vmul.f32 1.4142135, %v4032_v17  ;;  %v7414_v24 = vld [vmem:[#allocation3 + $0x654] ss:$8 sps:$4 sm:$0xff]   ;;  %v3745_v17 = vadd.f32 %v9721_v43, %v9719_v18 }
 0x575   :  { %v9723_v4 = vpop.f32.mrf.mxu0  ;;  %v3746_v27 = vpop.f32.mrf.mxu1  ;;  %5844 = vmatprep.subr.bf16.mxu1 %v7363_v22  ;;  %v4018_v22 = vsel %vm3906_vm8, %v3651_v16, %v3962_v38  ;;  %v4045_v12 = vmul.f32 1.4142135, %v3989_v11  ;;  %vm3905_vm10 = vcmp.ge.f32.partialorder %v3649_v44, 0.0  ;;  %v7412_v16 = vld [vmem:[#allocation3 + $0x650] ss:$8 sps:$4 sm:$0xff]  }
 0x576   :  { %v3747_v51 = vadd.f32 %v3746_v27, %v3693_v47  ;;  %5808 = vmatpush2.bf16.msra.mxu0 %v7358_v37  ;;  %v3975_v37 = vmul.f32 0.2, %v3653_v55  ;;  %v7399_v47 = vld [vmem:[#allocation3 + $0x504] ss:$8 sps:$4 sm:$0xff]   ;;  %v6339_v27 = vclamps-f32 %v4059_v21, 256.0  ;;  %vm3879_vm13 = vcmp.ge.f32.partialorder %v3745_v17, 0.0 }
 0x577   :  { %v9725_v57 = vpop.f32.mrf.mxu1  ;;  %5809 = vmatprep.subr.bf16.mxu0 %v7366_v53  ;;  %v3697_v58 = vpop.f32.mrf.mxu0  ;;  %v3961_v53 = vmul.f32 0.2, %v3649_v44  ;;  %v7429_v38 = vld [vmem:[#allocation3 + $0x5b4] ss:$8 sps:$4 sm:$0xff]   ;;  %v7430_v21 = vld [vmem:[#allocation3 + $0x620] ss:$8 sps:$4 sm:$0xff]  }
 0x578   :  { %vm3880_vm3 = vcmp.ge.f32.partialorder %v3747_v51, 0.0  ;;  %v3936_v6 = vmul.f32 0.2, %v3747_v51  ;;  %5845 = vmatpush1.bf16.msra.mxu1 %v7361_v49  ;;  %v4074_v49 = vmul.f32 1.4142135, %v4018_v22  ;;  %v4031_v25 = vsel %vm3919_vm9, %v3653_v55, %v3975_v37 }
 0x579   :  { %v3750_v33 = vpop.f32.mrf.mxu1  ;;  %5846 = vmatprep.subr.bf16.mxu1 %v7369_v20  ;;  %v6368_v20 = vclamps-f32 %v4088_v54, 256.0  ;;  %v9739_v13 = vpop.f32.mrf.mxu0  ;;  %v7441_v18 = vld [vmem:[#allocation3 + $0x594] ss:$8 sps:$4 sm:$0xff]  }
 0x57a   :  { %v3992_v56 = vsel %vm3880_vm3, %v3747_v51, %v3936_v6  ;;  %v3751_v3 = vadd.f32 %v3750_v33, %v3697_v58  ;;  %5810 = vmatpush2.bf16.msra.mxu0 %v7364_v29  ;;  %v7397_v51 = vld [vmem:[#allocation3 + $0x500] ss:$8 sps:$4 sm:$0xff]   ;;  %v6325_v29 = vclamps-f32 %v4045_v12, 256.0  ;;  %v6354_v6 = vclamps-f32 %v4074_v49, 256.0  ;;  %v7436_v12 = vld [vmem:[#allocation3 + $0x610] ss:$8 sps:$4 sm:$0xff]  }
 0x57b   :  { %5779 = vmatmul.mubr.bf16.gmra.mxu1 %v4225_v10  ;;  %5811 = vmatprep.subr.bf16.mxu0 %v7372_v30  ;;  %v4048_v19 = vmul.f32 1.4142135, %v3992_v56  ;;  %v4017_v30 = vsel %vm3905_vm10, %v3649_v44, %v3961_v53  ;;  %v4087_v33 = vmul.f32 1.4142135, %v4031_v25  ;;  %v7408_v10 = vld [vmem:[#allocation3 + $0x664] ss:$8 sps:$4 sm:$0xff]  }
 0x57c   :  { %vm3894_vm4 = vcmp.ge.f32.partialorder %v3751_v3, 0.0  ;;  %v3950_v26 = vmul.f32 0.2, %v3751_v3  ;;  %5847 = vmatpush1.bf16.msra.mxu1 %v7367_v40  ;;  %v7400_v40 = vld [vmem:[#allocation3 + $0x670] ss:$8 sps:$4 sm:$0xff]   ;;  %v4213_v58 = vpack.c.bf16 %v6339_v27, %v6325_v29  ;;  %v4228_v56 = vpack.c.bf16 %v6368_v20, %v6354_v6 }
 0x57d   :  { %5848 = vmatprep.subr.bf16.mxu1 %v7375_v5  ;;  %v6328_v14 = vclamps-f32 %v4048_v19, 256.0  ;;  %v9737_v5 = vpop.f32.mrf.mxu1  ;;  %v7435_v44 = vld [vmem:[#allocation3 + $0x5a4] ss:$8 sps:$4 sm:$0xff]   ;;  %v7439_v27 = vld [vmem:[#allocation3 + $0x590] ss:$8 sps:$4 sm:$0xff]  }
 0x57e   :  { %v4006_v9 = vsel %vm3894_vm4, %v3751_v3, %v3950_v26  ;;  %5812 = vmatpush2.bf16.msra.mxu0 %v7370_v61  ;;  %v7403_v3 = vld [vmem:[#allocation3 + $0x5f0] ss:$8 sps:$4 sm:$0xff]   ;;  %v4073_v61 = vmul.f32 1.4142135, %v4017_v30  ;;  %v7406_v26 = vld [vmem:[#allocation3 + $0x660] ss:$8 sps:$4 sm:$0xff]  }
 0x57f   :  { %v4062_v1 = vmul.f32 1.4142135, %v4006_v9  ;;  %5813 = vmatprep.subr.bf16.mxu0 %v7378_v42  ;;  %v7411_v42 = vld [vmem:[#allocation3 + $0x5e4] ss:$8 sps:$4 sm:$0xff]   ;;  %v3756_v19 = vpop.f32.mrf.mxu1  ;;  %v7417_v9 = vld [vmem:[#allocation3 + $0x5d4] ss:$8 sps:$4 sm:$0xff]  }
 0x580   :  { %5849 = vmatpush1.bf16.msra.mxu1 %v7373_v39  ;;  %v6367_v39 = vclamps-f32 %v4087_v33, 256.0  ;;  %v6353_v28 = vclamps-f32 %v4073_v61, 256.0  ;;  %v7444_v53 = vld [vmem:[#allocation3 + $0x604] ss:$8 sps:$4 sm:$0xff]   ;;  %v7442_v30 = vld [vmem:[#allocation3 + $0x600] ss:$8 sps:$4 sm:$0xff]  }
 0x581   :  { %v6342_v46 = vclamps-f32 %v4062_v1, 256.0  ;;  %5850 = vmatprep.subr.bf16.mxu1 %v7381_v31  ;;  %v7409_v31 = vld [vmem:[#allocation3 + $0x5e0] ss:$8 sps:$4 sm:$0xff]   ;;  %v3758_v50 = vpop.f32.mrf.mxu1 }
 0x582   :  { %5814 = vmatpush2.bf16.msra.mxu0 %v7376_v35  ;;  %v3703_v35 = vpop.f32.mrf.mxu0  ;;  %v4227_v1 = vpack.c.bf16 %v6367_v39, %v6353_v28 }
 0x583   :  { %5815 = vmatprep.subr.bf16.mxu0 %v7384_v41  ;;  %v4216_v36 = vpack.c.bf16 %v6342_v46, %v6328_v14  ;;  %v7420_v41 = vld [vmem:[#allocation3 + $0x644] ss:$8 sps:$4 sm:$0xff]   ;;  %v7418_v14 = vld [vmem:[#allocation3 + $0x640] ss:$8 sps:$4 sm:$0xff]   ;;  %v7426_v46 = vld [vmem:[#allocation3 + $0x634] ss:$8 sps:$4 sm:$0xff]   ;;  %v3760_v59 = vpop.f32.mrf.mxu1  ;;  %v3757_v11 = vadd.f32 %v3756_v19, %v3703_v35 }
 0x584   :  { %5851 = vmatpush1.bf16.msra.mxu1 %v7379_v2  ;;  %v7415_v2 = vld [vmem:[#allocation3 + $0x5d0] ss:$8 sps:$4 sm:$0xff]   ;;  %v3705_v7 = vpop.f32.mrf.mxu0  ;;  %v7451_v35 = vld [vmem:[#allocation3 + $0x6e0] ss:$8 sps:$4 sm:$0xff]  }
 0x585   :  { %5874 = vmatprep.mubr.bf16.mxu1 %v4216_v36  ;;  %5852 = vmatprep.subr.bf16.mxu1 %v7387_v0  ;;  %v7423_v0 = vld [vmem:[#allocation3 + $0x5c4] ss:$8 sps:$4 sm:$0xff]   ;;  %v3749_v36 = vadd.f32 %v9725_v57, %v9723_v4  ;;  %v7438_v4 = vld [vmem:[#allocation3 + $0x614] ss:$8 sps:$4 sm:$0xff]   ;;  %v3935_v57 = vmul.f32 0.2, %v3745_v17 }
 0x586   :  { %5816 = vmatpush2.bf16.msra.mxu0 %v7382_v34  ;;  %v7421_v34 = vld [vmem:[#allocation3 + $0x5c0] ss:$8 sps:$4 sm:$0xff]   ;;  %v3964_v37 = vmul.f32 0.2, %v3757_v11  ;;  %vm3908_vm14 = vcmp.ge.f32.partialorder %v3757_v11, 0.0 }
 0x587   :  { %5817 = vmatprep.subr.bf16.mxu0 %v7390_v48  ;;  %v3707_v48 = vpop.f32.mrf.mxu0  ;;  %vm3893_vm11 = vcmp.ge.f32.partialorder %v3749_v36, 0.0  ;;  %v3991_v49 = vsel %vm3879_vm13, %v3745_v17, %v3935_v57  ;;  %v7457_v17 = vld [vmem:[#allocation3 + $0x6c0] ss:$8 sps:$4 sm:$0xff]  }
 0x588   :  { %5853 = vmatpush1.bf16.msra.mxu1 %v7385_v23  ;;  %v3761_v55 = vadd.f32 %v3760_v59, %v3707_v48  ;;  %v7432_v23 = vld [vmem:[#allocation3 + $0x624] ss:$8 sps:$4 sm:$0xff]   ;;  %v4020_v25 = vsel %vm3908_vm14, %v3757_v11, %v3964_v37  ;;  %v4047_v6 = vmul.f32 1.4142135, %v3991_v49  ;;  %v7460_v37 = vld [vmem:[#allocation3 + $0x6b0] ss:$8 sps:$4 sm:$0xff]  }
 0x589   :  { %5854 = vmatprep.subr.bf16.mxu1 %v7393_v8  ;;  %v7427_v8 = vld [vmem:[#allocation3 + $0x5b0] ss:$8 sps:$4 sm:$0xff]   ;;  %v4076_v33 = vmul.f32 1.4142135, %v4020_v25 }
 0x58a   :  { %5818 = vmatpush2.bf16.msra.mxu0 %v7388_v45  ;;  %v3949_v45 = vmul.f32 0.2, %v3749_v36  ;;  %v3978_v22 = vmul.f32 0.2, %v3761_v55  ;;  %vm3922_vm12 = vcmp.ge.f32.partialorder %v3761_v55, 0.0 }
 0x58b   :  { %5819 = vmatprep.subr.bf16.mxu0 %v7396_v32  ;;  %v7433_v32 = vld [vmem:[#allocation3 + $0x5a0] ss:$8 sps:$4 sm:$0xff]  }
 0x58c   :  { %5855 = vmatpush1.bf16.msra.mxu1 %v7391_v62  ;;  %v4005_v43 = vsel %vm3893_vm11, %v3749_v36, %v3949_v45  ;;  %v3759_v62 = vadd.f32 %v3758_v50, %v3705_v7 }
 0x58d   :  { %5856 = vmatprep.subr.bf16.mxu1 %v7399_v47  ;;  %v4034_v47 = vsel %vm3922_vm12, %v3761_v55, %v3978_v22 }
 0x58e   :  { %5820 = vmatpush2.bf16.msra.mxu0 %v7394_v15  ;;  %v3755_v15 = vadd.f32 %v9737_v5, %v9739_v13  ;;  %v3977_v29 = vmul.f32 0.2, %v3759_v62  ;;  %vm3921_vm15 = vcmp.ge.f32.partialorder %v3759_v62, 0.0  ;;  %v6327_v13 = vclamps-f32 %v4047_v6, 256.0 }
 0x58f   :  { %5895 = vmatprep.subr.bf16.mxu0 %v7402_v60  ;;  %v4061_v60 = vmul.f32 1.4142135, %v4005_v43 }
 0x590   :  { %5857 = vmatpush1.bf16.msra.mxu1 %v7397_v51  ;;  %v7447_v51 = vld [vmem:[#allocation3 + $0x584] ss:$8 sps:$4 sm:$0xff]   ;;  %vm3907_vm0 = vcmp.ge.f32.partialorder %v3755_v15, 0.0 }
 0x591   :  { %5822 = vmatmul.mubr.bf16.vlgmr.msra.gmra.mxu0 %v4213_v58  ;;  %5858 = vmatprep.subr.bf16.mxu1 %v7405_v52  ;;  %v9745_v54 = vpop.f32.mrf.mxu0  ;;  %v4090_v52 = vmul.f32 1.4142135, %v4034_v47  ;;  %v3963_v58 = vmul.f32 0.2, %v3755_v15  ;;  %v6341_v5 = vclamps-f32 %v4061_v60, 256.0 }
 0x592   :  { %5831 = vmatprep.mubr.bf16.mxu0 %v4228_v56  ;;  %5896 = vmatpush1.bf16.msra.mxu0 %v7400_v40  ;;  %v7450_v40 = vld [vmem:[#allocation3 + $0x6f4] ss:$8 sps:$4 sm:$0xff]   ;;  %v7465_v47 = vld [vmem:[#allocation3 + $0x6a4] ss:$8 sps:$4 sm:$0xff]  }
 0x593   :  { %5897 = vmatprep.subr.bf16.mxu0 %v7408_v10  ;;  %v3852_v20 = vpop.f32.mrf.mxu0  ;;  %v7445_v10 = vld [vmem:[#allocation3 + $0x580] ss:$8 sps:$4 sm:$0xff]   ;;  %v6370_v61 = vclamps-f32 %v4090_v52, 256.0  ;;  %v4019_v39 = vsel %vm3907_vm0, %v3755_v15, %v3963_v58  ;;  %v4215_v19 = vpack.c.bf16 %v6341_v5, %v6327_v13  ;;  %v7468_v52 = vld [vmem:[#allocation3 + $0x694] ss:$8 sps:$4 sm:$0xff]  }
 0x594   :  { %5859 = vmatpush2.bf16.msra.mxu1 %v7403_v3  ;;  %v4033_v3 = vsel %vm3921_vm15, %v3759_v62, %v3977_v29 }
 0x595   :  { %5860 = vmatprep.subr.bf16.mxu1 %v7411_v42  ;;  %v3854_v56 = vpop.f32.mrf.mxu0  ;;  %v7448_v42 = vld [vmem:[#allocation3 + $0x6f0] ss:$8 sps:$4 sm:$0xff]  }
 0x596   :  { %5898 = vmatpush1.bf16.msra.mxu0 %v7406_v26  ;;  %v7453_v26 = vld [vmem:[#allocation3 + $0x6e4] ss:$8 sps:$4 sm:$0xff]  }
 0x597   :  { %5899 = vmatprep.subr.bf16.mxu0 %v7414_v24  ;;  %v6356_v24 = vclamps-f32 %v4076_v33, 256.0  ;;  %v3856_v28 = vpop.f32.mrf.mxu0 }
 0x598   :  { %5861 = vmatpush2.bf16.msra.mxu1 %v7409_v31  ;;  %v4089_v31 = vmul.f32 1.4142135, %v4033_v3  ;;  %v7471_v3 = vld [vmem:[#allocation3 + $0x684] ss:$8 sps:$4 sm:$0xff]  }
 0x599   :  { %5832 = vmatmul.mubr.bf16.gmra.mxu0 %v4227_v1  ;;  %5862 = vmatprep.subr.bf16.mxu1 %v7417_v9  ;;  %v4230_v9 = vpack.c.bf16 %v6370_v61, %v6356_v24  ;;  %v7469_v24 = vld [vmem:[#allocation3 + $0x680] ss:$8 sps:$4 sm:$0xff]  }
 0x59a   :  { %5900 = vmatpush1.bf16.msra.mxu0 %v7412_v16  ;;  %v4075_v16 = vmul.f32 1.4142135, %v4019_v39  ;;  %v6369_v50 = vclamps-f32 %v4089_v31, 256.0 }
 0x59b   :  { %5901 = vmatprep.subr.bf16.mxu0 %v7420_v41  ;;  %v7456_v41 = vld [vmem:[#allocation3 + $0x6d4] ss:$8 sps:$4 sm:$0xff]  }
 0x59c   :  { %5863 = vmatpush2.bf16.msra.mxu1 %v7415_v2  ;;  %v3860_v2 = vpop.f32.mrf.mxu0 }
 0x59d   :  { %5864 = vmatprep.subr.bf16.mxu1 %v7423_v0 }
 0x59e   :  { %5902 = vmatpush1.bf16.msra.mxu0 %v7418_v14  ;;  %v7454_v14 = vld [vmem:[#allocation3 + $0x6d0] ss:$8 sps:$4 sm:$0xff]   ;;  %v3862_v36 = vpop.f32.mrf.mxu0 }
 0x59f   :  { %5903 = vmatprep.subr.bf16.mxu0 %v7426_v46  ;;  %v6355_v46 = vclamps-f32 %v4075_v16, 256.0 }
 0x5a0   :  { %5865 = vmatpush2.bf16.msra.mxu1 %v7421_v34  ;;  %v7459_v34 = vld [vmem:[#allocation3 + $0x6c4] ss:$8 sps:$4 sm:$0xff]  }
 0x5a1   :  { %5866 = vmatprep.subr.bf16.mxu1 %v7429_v38 }
 0x5a2   :  { %5904 = vmatpush1.bf16.msra.mxu0 %v7424_v63  ;;  %v4229_v63 = vpack.c.bf16 %v6369_v50, %v6355_v46 }
 0x5a3   :  { %5905 = vmatprep.subr.bf16.mxu0 %v7432_v23 }
 0x5a4   :  { %5867 = vmatpush2.bf16.msra.mxu1 %v7427_v8 }
 0x5a5   :  { %5868 = vmatprep.subr.bf16.mxu1 %v7435_v44  ;;  %v7462_v44 = vld [vmem:[#allocation3 + $0x6b4] ss:$8 sps:$4 sm:$0xff]  }
 0x5a6   :  { %5906 = vmatpush1.bf16.msra.mxu0 %v7430_v21  ;;  %v3864_v21 = vpop.f32.mrf.mxu0 }
 0x5a7   :  { %5907 = vmatprep.subr.bf16.mxu0 %v7438_v4 }
 0x5a8   :  { %5869 = vmatpush2.bf16.msra.mxu1 %v7433_v32 }
 0x5a9   :  { %5870 = vmatprep.subr.bf16.mxu1 %v7441_v18 }
 0x5aa   :  { %5908 = vmatpush1.bf16.msra.mxu0 %v7436_v12 }
 0x5ab   :  { %5909 = vmatprep.subr.bf16.mxu0 %v7444_v53  ;;  %v3866_v53 = vpop.f32.mrf.mxu0 }
 0x5ac   :  { %5871 = vmatpush2.bf16.msra.mxu1 %v7439_v27 }
 0x5ad   :  { %5872 = vmatprep.subr.bf16.mxu1 %v7447_v51 }
 0x5ae   :  { %5910 = vmatpush1.bf16.msra.mxu0 %v7442_v30 }
 0x5af   :  { %5911 = vmatprep.subr.bf16.mxu0 %v7450_v40 }
 0x5b0   :  { %5873 = vmatpush2.bf16.msra.mxu1 %v7445_v10  ;;  %v7466_v10 = vld [vmem:[#allocation3 + $0x690] ss:$8 sps:$4 sm:$0xff]  }
 0x5b2   :  { %5912 = vmatpush2.bf16.msra.mxu0 %v7448_v42 }
 0x5b3   :  { %v3797_v1 = vpop.f32.mrf.mxu1  ;;  %5875 = vmatmul.mubr.bf16.vlgmr.msra.gmra.mxu1 %v4215_v19  ;;  %5913 = vmatprep.subr.bf16.mxu0 %v7453_v26 }
 0x5b4   :  { %5884 = vmatprep.mubr.bf16.mxu1 %v4230_v9  ;;  %v3851_v57 = vadd.f32 %v9745_v54, %v3797_v1 }
 0x5b5   :  { %v3799_v0 = vpop.f32.mrf.mxu1 }
 0x5b6   :  { %v3853_v7 = vadd.f32 %v3852_v20, %v3799_v0  ;;  %5914 = vmatpush2.bf16.msra.mxu0 %v7451_v35  ;;  %v3937_v60 = vmul.f32 0.2, %v3851_v57  ;;  %v7463_v20 = vld [vmem:[#allocation3 + $0x6a0] ss:$8 sps:$4 sm:$0xff]   ;;  %vm3881_vm4 = vcmp.ge.f32.partialorder %v3851_v57, 0.0 }
 0x5b7   :  { %v3801_v59 = vpop.f32.mrf.mxu1  ;;  %5915 = vmatprep.subr.bf16.mxu0 %v7456_v41 }
 0x5b8   :  { %vm3882_vm1 = vcmp.ge.f32.partialorder %v3853_v7, 0.0  ;;  %v3938_v38 = vmul.f32 0.2, %v3853_v7  ;;  %v3855_v8 = vadd.f32 %v3854_v56, %v3801_v59  ;;  %v3993_v40 = vsel %vm3881_vm4, %v3851_v57, %v3937_v60 }
 0x5b9   :  { %v3803_v48 = vpop.f32.mrf.mxu1  ;;  %v4049_v13 = vmul.f32 1.4142135, %v3993_v40 }
 0x5ba   :  { %v3994_v55 = vsel %vm3882_vm1, %v3853_v7, %v3938_v38  ;;  %v3857_v23 = vadd.f32 %v3856_v28, %v3803_v48  ;;  %5916 = vmatpush2.bf16.msra.mxu0 %v7454_v14  ;;  %v3951_v18 = vmul.f32 0.2, %v3855_v8  ;;  %vm3895_vm3 = vcmp.ge.f32.partialorder %v3855_v8, 0.0 }
 0x5bb   :  { %v3807_v11 = vpop.f32.mrf.mxu1  ;;  %5885 = vmatmul.mubr.bf16.gmra.mxu1 %v4229_v63  ;;  %5917 = vmatprep.subr.bf16.mxu0 %v7459_v34  ;;  %v4050_v22 = vmul.f32 1.4142135, %v3994_v55  ;;  %v6329_v9 = vclamps-f32 %v4049_v13, 256.0 }
 0x5bc   :  { %vm3896_vm2 = vcmp.ge.f32.partialorder %v3857_v23, 0.0  ;;  %v3952_v45 = vmul.f32 0.2, %v3857_v23  ;;  %v4007_v54 = vsel %vm3895_vm3, %v3855_v8, %v3951_v18  ;;  %v3861_v58 = vadd.f32 %v3860_v2, %v3807_v11 }
 0x5bd   :  { %v3809_v4 = vpop.f32.mrf.mxu1  ;;  %v6330_v49 = vclamps-f32 %v4050_v22, 256.0  ;;  %v4063_v5 = vmul.f32 1.4142135, %v4007_v54 }
 0x5be   :  { %v4008_v32 = vsel %vm3896_vm2, %v3857_v23, %v3952_v45  ;;  %5918 = vmatpush2.bf16.msra.mxu0 %v7457_v17  ;;  %v3863_v62 = vadd.f32 %v3862_v36, %v3809_v4  ;;  %v3965_v26 = vmul.f32 0.2, %v3861_v58  ;;  %vm3909_vm8 = vcmp.ge.f32.partialorder %v3861_v58, 0.0 }
 0x5bf   :  { %v4064_v43 = vmul.f32 1.4142135, %v4008_v32  ;;  %v3811_v12 = vpop.f32.mrf.mxu1  ;;  %5919 = vmatprep.subr.bf16.mxu0 %v7462_v44  ;;  %v6343_v19 = vclamps-f32 %v4063_v5, 256.0 }
 0x5c0   :  { %v3966_v51 = vmul.f32 0.2, %v3863_v62  ;;  %vm3910_vm5 = vcmp.ge.f32.partialorder %v3863_v62, 0.0  ;;  %v3865_v30 = vadd.f32 %v3864_v21, %v3811_v12  ;;  %v4021_v35 = vsel %vm3909_vm8, %v3861_v58, %v3965_v26 }
 0x5c1   :  { %v6344_v15 = vclamps-f32 %v4064_v43, 256.0  ;;  %v3813_v27 = vpop.f32.mrf.mxu1  ;;  %v4217_v1 = vpack.c.bf16 %v6343_v19, %v6329_v9  ;;  %v4077_v2 = vmul.f32 1.4142135, %v4021_v35 }
 0x5c2   :  { %v3867_v25 = vadd.f32 %v3866_v53, %v3813_v27  ;;  %5920 = vmatpush2.bf16.msra.mxu0 %v7460_v37  ;;  %v4022_v56 = vsel %vm3910_vm5, %v3863_v62, %v3966_v51  ;;  %v3979_v61 = vmul.f32 0.2, %v3865_v30  ;;  %vm3923_vm7 = vcmp.ge.f32.partialorder %v3865_v30, 0.0 }
 0x5c3   :  { %5921 = vmatprep.subr.bf16.mxu0 %v7465_v47  ;;  %v4218_v29 = vpack.c.bf16 %v6344_v15, %v6330_v49  ;;  %v4078_v39 = vmul.f32 1.4142135, %v4022_v56  ;;  %v6357_v7 = vclamps-f32 %v4077_v2, 256.0 }
 0x5c4   :  { %vm3924_vm6 = vcmp.ge.f32.partialorder %v3867_v25, 0.0  ;;  %v3980_v6 = vmul.f32 0.2, %v3867_v25  ;;  %v4035_v31 = vsel %vm3923_vm7, %v3865_v30, %v3979_v61 }
 0x5c5   :  { %5927 = vmatprep.mubr.bf16.mxu0 %v4218_v29  ;;  %v6358_v16 = vclamps-f32 %v4078_v39, 256.0  ;;  %v4091_v41 = vmul.f32 1.4142135, %v4035_v31 }
 0x5c6   :  { %v4036_v33 = vsel %vm3924_vm6, %v3867_v25, %v3980_v6  ;;  %5922 = vmatpush2.bf16.msra.mxu0 %v7463_v20 }
 0x5c7   :  { %5923 = vmatprep.subr.bf16.mxu0 %v7468_v52  ;;  %v4092_v42 = vmul.f32 1.4142135, %v4036_v33  ;;  %v6371_v0 = vclamps-f32 %v4091_v41, 256.0 }
 0x5c9   :  { %v6372_v28 = vclamps-f32 %v4092_v42, 256.0  ;;  %v4231_v14 = vpack.c.bf16 %v6371_v0, %v6357_v7 }
 0x5ca   :  { %5924 = vmatpush2.bf16.msra.mxu0 %v7466_v10 }
 0x5cb   :  { %5925 = vmatprep.subr.bf16.mxu0 %v7471_v3  ;;  %v4232_v50 = vpack.c.bf16 %v6372_v28, %v6358_v16 }
 0x5ce   :  { %5926 = vmatpush2.bf16.msra.mxu0 %v7469_v24 }
 0x5d1   :  { %5928 = vmatmul.mubr.bf16.vlgmr.msra.gmra.mxu0 %v4217_v1  ;;  %v5611_v46 = vpop.f32.mrf.mxu0 }
 0x5d2   :  { %5937 = vmatprep.mubr.bf16.mxu0 %v4232_v50 }
 0x5d3   :  { %v5613_v59 = vpop.f32.mrf.mxu0 }
 0x5d5   :  { %v5615_v34 = vpop.f32.mrf.mxu0 }
 0x5d7   :  { %v5617_v38 = vpop.f32.mrf.mxu0 }
 0x5d9   :  { %5938 = vmatmul.mubr.bf16.gmra.mxu0 %v4231_v14  ;;  %v5621_v48 = vpop.f32.mrf.mxu0 }
 0x5db   :  { %v5623_v55 = vpop.f32.mrf.mxu0 }
 0x5dd   :  { %v5625_v17 = vpop.f32.mrf.mxu0 }
 0x5df   :  { %v9750_v11 = vpop.f32.mrf.mxu0 }
 0x5f3   :  { %v5664_v36 = vpop.f32.mrf.mxu1 }
 0x5f4   :  { %v5665_v10 = vadd.f32 %v5664_v36, %v5611_v46 }
 0x5f5   :  { %v5666_v63 = vpop.f32.mrf.mxu1 }
 0x5f6   :  { %v5667_v5 = vadd.f32 %v5666_v63, %v5613_v59 }
 0x5f7   :  { %v5668_v23 = vpop.f32.mrf.mxu1 }
 0x5f8   :  { %v5669_v42 = vadd.f32 %v5668_v23, %v5615_v34 }
 0x5f9   :  { %v5670_v8 = vpop.f32.mrf.mxu1 }
 0x5fa   :  { %v5671_v39 = vadd.f32 %v5670_v8, %v5617_v38 }
 0x5fb   :  { %v5674_v44 = vpop.f32.mrf.mxu1 }
 0x5fc   :  { %v5675_v28 = vadd.f32 %v5674_v44, %v5621_v48 }
 0x5fd   :  { %v5676_v21 = vpop.f32.mrf.mxu1 }
 0x5fe   :  { %v5677_v2 = vadd.f32 %v5676_v21, %v5623_v55 }
 0x5ff   :  { %v5678_v4 = vpop.f32.mrf.mxu1 }
 0x600   :  { %v5679_v36 = vadd.f32 %v5678_v4, %v5625_v17 }
 0x601   :  { %v5680_v32 = vpop.f32.mrf.mxu1 }
 0x602   :  { %v5681_v55 = vadd.f32 %v5680_v32, %v9750_v11 }
 0x611   :  { %v5717_v45 = vpop.f32.mrf.mxu0 }
 0x612   :  { %v5718_v56 = vadd.f32 %v5717_v45, %v5665_v10 }
 0x613   :  { %v5719_v22 = vpop.f32.mrf.mxu0 }
 0x614   :  { %v5720_v13 = vadd.f32 %v5719_v22, %v5667_v5 }
 0x615   :  { %v5721_v57 = vpop.f32.mrf.mxu0 }
 0x616   :  { %v5722_v24 = vadd.f32 %v5721_v57, %v5669_v42 }
 0x617   :  { %v5723_v37 = vpop.f32.mrf.mxu0 }
 0x618   :  { %v5724_v16 = vadd.f32 %v5723_v37, %v5671_v39 }
 0x619   :  { %v5727_v43 = vpop.f32.mrf.mxu0 }
 0x61a   :  { %v5728_v0 = vadd.f32 %v5727_v43, %v5675_v28 }
 0x61b   :  { %v5729_v12 = vpop.f32.mrf.mxu0 }
 0x61c   :  { %v5730_v63 = vadd.f32 %v5729_v12, %v5677_v2 }
 0x61d   :  { %v5731_v53 = vpop.f32.mrf.mxu0 }
 0x61e   :  { %v5732_v21 = vadd.f32 %v5731_v53, %v5679_v36 }
 0x61f   :  { %v5733_v15 = vpop.f32.mrf.mxu0 }
 0x620   :  { %v5734_v4 = vadd.f32 %v5733_v15, %v5681_v55 }
 0x633   :  { %v5770_v18 = vpop.f32.mrf.mxu1 }
 0x634   :  { %v5771_v26 = vadd.f32 %v5770_v18, %v5718_v56 }
 0x635   :  { %v5772_v62 = vpop.f32.mrf.mxu1 }
 0x636   :  { %v5773_v19 = vadd.f32 %v5772_v62, %v5720_v13 }
 0x637   :  { %v5774_v47 = vpop.f32.mrf.mxu1 }
 0x638   :  { %v5775_v1 = vadd.f32 %v5774_v47, %v5722_v24 }
 0x639   :  { %v5776_v49 = vpop.f32.mrf.mxu1 }
 0x63a   :  { %v5777_v14 = vadd.f32 %v5776_v49, %v5724_v16 }
 0x63b   :  { %v5780_v27 = vpop.f32.mrf.mxu1 }
 0x63c   :  { %v5781_v8 = vadd.f32 %v5780_v27, %v5728_v0 }
 0x63d   :  { %v5782_v25 = vpop.f32.mrf.mxu1 }
 0x63e   :  { %v5783_v57 = vadd.f32 %v5782_v25, %v5730_v63 }
 0x63f   :  { %v5784_v54 = vpop.f32.mrf.mxu1 }
 0x640   :  { %v5785_v12 = vadd.f32 %v5784_v54, %v5732_v21 }
 0x641   :  { %v5786_v29 = vpop.f32.mrf.mxu1 }
 0x642   :  { %v5787_v53 = vadd.f32 %v5786_v29, %v5734_v4 }
 0x651   :  { %v5823_v60 = vpop.f32.mrf.mxu0 }
 0x652   :  { %v5824_v31 = vadd.f32 %v5823_v60, %v5771_v26 }
 0x653   :  { %v5825_v20 = vpop.f32.mrf.mxu0 }
 0x654   :  { %v5826_v41 = vadd.f32 %v5825_v20, %v5773_v19 }
 0x655   :  { %v5827_v51 = vpop.f32.mrf.mxu0 }
 0x656   :  { %v5828_v46 = vadd.f32 %v5827_v51, %v5775_v1 }
 0x657   :  { %v5829_v52 = vpop.f32.mrf.mxu0 }
 0x658   :  { %v5830_v45 = vadd.f32 %v5829_v52, %v5777_v14 }
 0x659   :  { %v5833_v6 = vpop.f32.mrf.mxu0 }
 0x65a   :  { %v5834_v37 = vadd.f32 %v5833_v6, %v5781_v8 }
 0x65b   :  { %v5835_v58 = vpop.f32.mrf.mxu0 }
 0x65c   :  { %v5836_v47 = vadd.f32 %v5835_v58, %v5783_v57 }
 0x65d   :  { %v5837_v3 = vpop.f32.mrf.mxu0 }
 0x65e   :  { %v5838_v27 = vadd.f32 %v5837_v3, %v5785_v12 }
 0x65f   :  { %v5839_v9 = vpop.f32.mrf.mxu0 }
 0x660   :  { %v5840_v51 = vadd.f32 %v5839_v9, %v5787_v53 }
 0x673   :  { %v5876_v30 = vpop.f32.mrf.mxu1 }
 0x674   :  { %v5877_v50 = vadd.f32 %v5876_v30, %v5824_v31 }
 0x675   :  { %v5878_v40 = vpop.f32.mrf.mxu1 }
 0x676   :  { %v5879_v59 = vadd.f32 %v5878_v40, %v5826_v41 }
 0x677   :  { %v5880_v33 = vpop.f32.mrf.mxu1 }
 0x678   :  { %v5881_v48 = vadd.f32 %v5880_v33, %v5828_v46 }
 0x679   :  { %v5882_v61 = vpop.f32.mrf.mxu1 }
 0x67a   :  { %v5883_v18 = vadd.f32 %v5882_v61, %v5830_v45 }
 0x67b   :  { %v5886_v35 = vpop.f32.mrf.mxu1 }
 0x67c   :  { %v5887_v49 = vadd.f32 %v5886_v35, %v5834_v37 }
 0x67d   :  { %v5888_v38 = vpop.f32.mrf.mxu1 }
 0x67e   :  { %v5889_v60 = vadd.f32 %v5888_v38, %v5836_v47 }
 0x67f   :  { %v5890_v43 = vpop.f32.mrf.mxu1 }
 0x680   :  { %v5891_v54 = vadd.f32 %v5890_v43, %v5838_v27 }
 0x681   :  { %v5892_v15 = vpop.f32.mrf.mxu1 }
 0x682   :  { %v5893_v6 = vadd.f32 %v5892_v15, %v5840_v51 }
 0x691   :  { %v5929_v7 = vpop.f32.mrf.mxu0 }
 0x692   :  { %v5930_v34 = vadd.f32 %v5929_v7, %v5877_v50 }
 0x693   :  { %v5931_v23 = vpop.f32.mrf.mxu0 }
 0x694   :  { %5948 = vst [vmem:[%s9786_s9] sm:$0xff] %v5930_v34  ;;  %v5932_v44 = vadd.f32 %v5931_v23, %v5879_v59 }
 0x695   :  { %v5933_v22 = vpop.f32.mrf.mxu0 }
 0x696   :  { %5949 = vst [vmem:[%s9786_s9 + $0x8] sm:$0xff] %v5932_v44  ;;  %v5934_v17 = vadd.f32 %v5933_v22, %v5881_v48 }
 0x697   :  { %v5935_v62 = vpop.f32.mrf.mxu0 }
 0x698   :  { %5950 = vst [vmem:[%s9786_s9 + $0x10] sm:$0xff] %v5934_v17  ;;  %v5936_v11 = vadd.f32 %v5935_v62, %v5883_v18 }
 0x699   :  { %v5939_v32 = vpop.f32.mrf.mxu0 }
 0x69a   :  { %5951 = vst [vmem:[%s9786_s9 + $0x18] sm:$0xff] %v5936_v11  ;;  %v5940_v25 = vadd.f32 %v5939_v32, %v5887_v49 }
 0x69b   :  { %v5941_v20 = vpop.f32.mrf.mxu0 }
 0x69c   :  { %5952 = vst [vmem:[%s9786_s9 + $0x20] sm:$0xff] %v5940_v25  ;;  %v5942_v52 = vadd.f32 %v5941_v20, %v5889_v60 }
 0x69d   :  { %v5943_v30 = vpop.f32.mrf.mxu0 }
 0x69e   :  { %5953 = vst [vmem:[%s9786_s9 + $0x28] sm:$0xff] %v5942_v52  ;;  %v5944_v29 = vadd.f32 %v5943_v30, %v5891_v54 }
 0x69f   :  { %v5945_v40 = vpop.f32.mrf.mxu0 }
 0x6a0   :  { %5954 = vst [vmem:[%s9786_s9 + $0x30] sm:$0xff] %v5944_v29  ;;  %v5946_v58 = vadd.f32 %v5945_v40, %v5893_v6 }
 0x6a2   :  { %5955 = vst [vmem:[%s9786_s9 + $0x38] sm:$0xff] %v5946_v58 }
 0x6a3   :  { %5960 = vsyncpa [#allocation4], 1 }

</bundles_post_ra>
